<compile_context>
chip_gen: v6e
topology: v6e:2x2x1
jax: 0.10.0
libtpu: 0.0.40
codegen_flags: <defaults>
</compile_context>

<pallas_src>
import functools

import jax
import jax.numpy as jnp
from jax.experimental import pallas as pl
from jax.experimental.pallas import tpu as pltpu

BN_EPS = 1e-5
HIDDEN_DIMS = [128, 256, 512, 256, 128]
LANE = 128


def _round_up(n, m):
    return ((n + m - 1) // m) * m


def _pad128(d):
    return max(_round_up(d, LANE), LANE)


def _default_bf16_act():
    """bf16 activations on v6e/v7x; keep f32 epilogue on v5e and older (MXU-bound)."""
    try:
        kind = jax.devices()[0].device_kind.lower()
    except Exception:
        return True
    return not any(t in kind for t in ("v2", "v3", "v4", "v5"))


# ------------------------------------------------------------------- plan ---

def _build_plan(input_dim, hidden_dims=HIDDEN_DIMS):
    """Static per-matmul plan mirroring the nn.Sequential: (kind, din, dout).

    kinds:  "lbr"   = Linear + (folded BN) + ReLU        (Dropout = identity in eval)
            "res_a" = first  half of ResidualBlock (save residual, then Linear+BN+ReLU)
            "res_b" = second half of ResidualBlock (Linear+BN, +residual, ReLU)
            "final" = plain Linear(32, 1)
    """
    plan = [("lbr", input_dim, hidden_dims[0])]
    for i in range(len(hidden_dims) - 1):
        plan.append(("lbr", hidden_dims[i], hidden_dims[i + 1]))
        if i >= 1:
            d = hidden_dims[i + 1]
            plan.append(("res_a", d, d))
            plan.append(("res_b", d, d))
    plan.append(("lbr", hidden_dims[-1], 64))
    plan.append(("lbr", 64, 32))
    plan.append(("final", 32, 1))
    return tuple(plan)


# ----------------------------------------------------------------- kernel ---

def _make_fused_kernel(kplan, use_bf16_act):
    n_layers = len(kplan)

    def kernel(x_ref, *refs):
        # refs = (w_0 ... w_{L-1}, packed_biases, out)
        w_refs = refs[:n_layers]
        b_ref = refs[n_layers]
        o_ref = refs[n_layers + 1]

        act = x_ref[...]                                   # (tile, input_dim) f32
        residual = None
        for li, (kind, _din_p, dout_p) in enumerate(kplan):
            w = w_refs[li][...]                            # (din_p, dout_p) bf16
            b = b_ref[li:li + 1, 0:dout_p]                 # (1, dout_p)  f32
            # MXU in bf16, accumulate in f32; bias/relu/residual epilogue in f32.
            y = jnp.dot(act.astype(jnp.bfloat16), w,
                        preferred_element_type=jnp.float32) + b
            if kind == "res_b":
                y = y + residual                           # residual add in f32
            if kind != "final":
                y = jnp.maximum(y, 0.0)                    # ReLU
            # Save the residual (block input) in f32 at the block boundary.
            if li + 1 < n_layers and kplan[li + 1][0] == "res_a":
                residual = y
            if use_bf16_act and kind != "final":
                act = y.astype(jnp.bfloat16)               # fused relu + downcast
            else:
                act = y
        o_ref[...] = act                                   # (tile, 128) f32, col 0 valid

    return kernel


# ------------------------------------------------------------- parameters ---

def build_params(key, input_dim, hidden_dims=HIDDEN_DIMS):
    """He-init Linears, eval-mode BN folded in, outputs zero-padded to >=128 lanes.

    Returns:
      plan         : true-dim plan (for the f32 reference)
      kplan        : padded-dim plan used by the kernel, (kind, din_p, dout_p)
      weights      : list of (din_p, dout_p) bf16 arrays (BN folded, zero padded)
      biases       : (n_layers, max_dout_p) f32 packed bias array (BN folded)
      torch_params : list of (W (dout,din) f32, b (dout,) f32) un-folded originals
    """
    plan = _build_plan(input_dim, hidden_dims)
    n_layers = len(plan)
    bn_scale = (1.0 + BN_EPS) ** -0.5      # eval BN, fresh stats, gamma=1, beta=0

    max_dout_p = max(_pad128(d) for _, _, d in plan)
    biases = jnp.zeros((n_layers, max_dout_p), jnp.float32)

    kplan, weights, torch_params = [], [], []
    din_p_prev = input_dim
    for li, (kind, din, dout) in enumerate(plan):
        key, k = jax.random.split(key)
        # kaiming_normal_(mode='fan_in', nonlinearity='relu'): std = sqrt(2 / fan_in)
        w = jax.random.normal(k, (dout, din), jnp.float32) * jnp.sqrt(2.0 / din)
        b = jnp.zeros((dout,), jnp.float32)
        torch_params.append((w, b))

        dout_p = _pad128(dout)
        din_p = din_p_prev                   # padded dout of previous layer (or input_dim)

        scale = 1.0 if kind == "final" else bn_scale   # fold eval-mode BN
        w_t = (w * scale).T                             # (din, dout)
        w_pad = jnp.zeros((din_p, dout_p), jnp.float32).at[:din, :dout].set(w_t)
        weights.append(w_pad.astype(jnp.bfloat16))
        biases = biases.at[li, :dout].set(b * scale)

        kplan.append((kind, din_p, dout_p))
        din_p_prev = dout_p

    return plan, tuple(kplan), weights, biases, torch_params


# ----------------------------------------------------------------- forward ---

def forward(x, weights, biases, *, kplan, batch_tile=512, use_bf16_act=None,
            single_buffer_weights=False):
    if use_bf16_act is None:
        use_bf16_act = _default_bf16_act()

    batch, input_dim = x.shape
    # v7x megacore: aim for >= 2 grid steps so the "parallel" batch axis shards
    # across both TensorCores; cap the tile to amortize per-step overhead vs VMEM.
    tile = max(8, min(batch_tile, _round_up(pl.cdiv(batch, 2), 8)))
    padded = _round_up(batch, tile)
    if padded != batch:
        x = jnp.pad(x, ((0, padded - batch), (0, 0)))
    grid = (padded // tile,)

    kernel = _make_fused_kernel(kplan, use_bf16_act)

    # Constant-index weight/bias blocks are revisited every grid step; optionally
    # single-buffer them (halves weight VMEM). Off by default for portability.
    wb_kwargs = {"pipeline_mode": pl.Buffered(1)} if single_buffer_weights else {}

    in_specs = [pl.BlockSpec((tile, input_dim), lambda i: (i, 0))]
    for w in weights:
        in_specs.append(pl.BlockSpec(w.shape, lambda i: (0, 0), **wb_kwargs))
    in_specs.append(pl.BlockSpec(biases.shape, lambda i: (0, 0), **wb_kwargs))

    out_dim = kplan[-1][2]   # final Linear padded to 128 lanes (lane-dense store)
    out = pl.pallas_call(
        kernel,
        out_shape=jax.ShapeDtypeStruct((padded, out_dim), jnp.float32),
        grid=grid,
        in_specs=in_specs,
        out_specs=pl.BlockSpec((tile, out_dim), lambda i: (i, 0)),
        compiler_params=pltpu.CompilerParams(
            dimension_semantics=("parallel",),
            vmem_limit_bytes=64 * 1024 * 1024,
        ),
    )(x, *weights, biases)

    return out[:batch, :1]


# -------------------------------------------------------------- references ---

def reference_forward_kernel_math(x, weights, biases, *, kplan, use_bf16_act):
    """Pure-JAX replica of the exact kernel math (same bf16 params / casts)."""
    n_layers = len(kplan)
    act = x
    residual = None
    for li, (kind, _din_p, dout_p) in enumerate(kplan):
        w = weights[li]
        b = biases[li:li + 1, :dout_p]
        y = jnp.dot(act.astype(jnp.bfloat16), w,
                    preferred_element_type=jnp.float32) + b
        if kind == "res_b":
            y = y + residual
        if kind != "final":
            y = jnp.maximum(y, 0.0)
        if li + 1 < n_layers and kplan[li + 1][0] == "res_a":
            residual = y
        if use_bf16_act and kind != "final":
            act = y.astype(jnp.bfloat16)
        else:
            act = y
    return act[:, :1]


def reference_forward_f32(x, torch_params, *, plan):
    """True f32 reference with the original PyTorch eval-mode semantics."""
    bn_scale = (1.0 + BN_EPS) ** -0.5
    h = x
    residual = None
    for li, (kind, _din, _dout) in enumerate(plan):
        w, b = torch_params[li]
        if kind == "res_a":
            residual = h
        y = h @ w.T + b
        if kind != "final":
            y = y * bn_scale                 # eval-mode BN (fresh stats)
        if kind == "res_b":
            y = y + residual
        if kind != "final":
            y = jnp.maximum(y, 0.0)          # ReLU (Dropout = identity in eval)
        h = y
    return h


# -------------------------------------------------------------------- main ---

if __name__ == "__main__":
    key = jax.random.PRNGKey(0)
    key_x, key_p = jax.random.split(key)

    batch, input_dim = 8, 16
    x = jax.random.normal(key_x, (batch, input_dim), jnp.float32)

    plan, kplan, weights, biases, torch_params = build_params(key_p, input_dim)
    use_bf16_act = _default_bf16_act()

    fwd = jax.jit(functools.partial(forward, kplan=kplan, use_bf16_act=use_bf16_act))
    out = jax.block_until_ready(fwd(x, weights, biases))

    assert out.shape == (batch, 1), out.shape
    assert out.dtype == jnp.float32
    assert bool(jnp.all(jnp.isfinite(out)))

    # Tight check vs a pure-JAX replica of the kernel math (same bf16 params/casts).
    ref_k = jax.block_until_ready(
        reference_forward_kernel_math(x, weights, biases,
                                      kplan=kplan, use_bf16_act=use_bf16_act))
    assert bool(jnp.allclose(out, ref_k, rtol=2e-2, atol=2e-2)), (out, ref_k)

    # Loose check vs the true f32 (PyTorch eval-mode) reference: quantifies bf16 error.
    ref_f32 = jax.block_until_ready(reference_forward_f32(x, torch_params, plan=plan))
    rel_err = float(jnp.max(jnp.abs(out - ref_f32))) / (float(jnp.max(jnp.abs(ref_f32))) + 1e-3)
    assert rel_err < 0.2, rel_err

    print("KERNEL_OK")
</pallas_src>

<mosaic_0001>
module attributes {stable_mosaic.version = 11 : i64} {
  func.func @kernel(%arg0: i32, %arg1: memref<8x16xf32, #tpu.memory_space<vmem>>, %arg2: memref<16x128xbf16, #tpu.memory_space<vmem>>, %arg3: memref<128x256xbf16, #tpu.memory_space<vmem>>, %arg4: memref<256x512xbf16, #tpu.memory_space<vmem>>, %arg5: memref<512x512xbf16, #tpu.memory_space<vmem>>, %arg6: memref<512x512xbf16, #tpu.memory_space<vmem>>, %arg7: memref<512x256xbf16, #tpu.memory_space<vmem>>, %arg8: memref<256x256xbf16, #tpu.memory_space<vmem>>, %arg9: memref<256x256xbf16, #tpu.memory_space<vmem>>, %arg10: memref<256x128xbf16, #tpu.memory_space<vmem>>, %arg11: memref<128x128xbf16, #tpu.memory_space<vmem>>, %arg12: memref<128x128xbf16, #tpu.memory_space<vmem>>, %arg13: memref<128x128xbf16, #tpu.memory_space<vmem>>, %arg14: memref<128x128xbf16, #tpu.memory_space<vmem>>, %arg15: memref<128x128xbf16, #tpu.memory_space<vmem>>, %arg16: memref<14x512xf32, #tpu.memory_space<vmem>>, %arg17: memref<8x128xf32, #tpu.memory_space<vmem>>) attributes {dimension_semantics = [#tpu.dimension_semantics<parallel>], iteration_bounds = array<i64: 1>, scalar_prefetch = 0 : i64, scratch_operands = 0 : i64, tpu.core_type = #tpu.core_type<tc>, window_params = [{transform_indices = @transform_0, window_bounds = array<i64: 8, 16>}, {pipeline_mode = #tpu.pipeline_mode<synchronous>, transform_indices = @transform_1, window_bounds = array<i64: 16, 128>}, {pipeline_mode = #tpu.pipeline_mode<synchronous>, transform_indices = @transform_2, window_bounds = array<i64: 128, 256>}, {pipeline_mode = #tpu.pipeline_mode<synchronous>, transform_indices = @transform_3, window_bounds = array<i64: 256, 512>}, {pipeline_mode = #tpu.pipeline_mode<synchronous>, transform_indices = @transform_4, window_bounds = array<i64: 512, 512>}, {pipeline_mode = #tpu.pipeline_mode<synchronous>, transform_indices = @transform_5, window_bounds = array<i64: 512, 512>}, {pipeline_mode = #tpu.pipeline_mode<synchronous>, transform_indices = @transform_6, window_bounds = array<i64: 512, 256>}, {pipeline_mode = #tpu.pipeline_mode<synchronous>, transform_indices = @transform_7, window_bounds = array<i64: 256, 256>}, {pipeline_mode = #tpu.pipeline_mode<synchronous>, transform_indices = @transform_8, window_bounds = array<i64: 256, 256>}, {pipeline_mode = #tpu.pipeline_mode<synchronous>, transform_indices = @transform_9, window_bounds = array<i64: 256, 128>}, {pipeline_mode = #tpu.pipeline_mode<synchronous>, transform_indices = @transform_10, window_bounds = array<i64: 128, 128>}, {pipeline_mode = #tpu.pipeline_mode<synchronous>, transform_indices = @transform_11, window_bounds = array<i64: 128, 128>}, {pipeline_mode = #tpu.pipeline_mode<synchronous>, transform_indices = @transform_12, window_bounds = array<i64: 128, 128>}, {pipeline_mode = #tpu.pipeline_mode<synchronous>, transform_indices = @transform_13, window_bounds = array<i64: 128, 128>}, {pipeline_mode = #tpu.pipeline_mode<synchronous>, transform_indices = @transform_14, window_bounds = array<i64: 128, 128>}, {pipeline_mode = #tpu.pipeline_mode<synchronous>, transform_indices = @transform_15, window_bounds = array<i64: 14, 512>}, {transform_indices = @transform_16, window_bounds = array<i64: 8, 128>}]} {
    %c0 = arith.constant 0 : index
    %c0_0 = arith.constant 0 : index
    %0 = vector.load %arg1[%c0, %c0_0] : memref<8x16xf32, #tpu.memory_space<vmem>>, vector<8x16xf32>
    %c0_1 = arith.constant 0 : index
    %c0_2 = arith.constant 0 : index
    %1 = vector.load %arg2[%c0_1, %c0_2] : memref<16x128xbf16, #tpu.memory_space<vmem>>, vector<16x128xbf16>
    %c0_3 = arith.constant 0 : index
    %c0_4 = arith.constant 0 : index
    %2 = vector.load %arg16[%c0_3, %c0_4] : memref<14x512xf32, #tpu.memory_space<vmem>>, vector<1x128xf32>
    %3 = arith.truncf %0 : vector<8x16xf32> to vector<8x16xbf16>
    %cst = arith.constant dense<0.000000e+00> : vector<8x128xf32>
    %4 = tpu.matmul %3, %1, %cst {dimension_numbers = #tpu.dot_dimension_numbers<[1], [0], [0], [1], [0, 0, 1, 1], [], []>} : vector<8x16xbf16>, vector<16x128xbf16>, vector<8x128xf32> -> vector<8x128xf32>
    %5 = vector.broadcast %2 : vector<1x128xf32> to vector<8x128xf32>
    %6 = arith.addf %4, %5 : vector<8x128xf32>
    %cst_5 = arith.constant 0.000000e+00 : f32
    %7 = vector.broadcast %cst_5 : f32 to vector<8x128xf32>
    %8 = arith.maximumf %6, %7 : vector<8x128xf32>
    %9 = arith.truncf %8 : vector<8x128xf32> to vector<8x128xbf16>
    %c0_6 = arith.constant 0 : index
    %c0_7 = arith.constant 0 : index
    %10 = vector.load %arg3[%c0_6, %c0_7] : memref<128x256xbf16, #tpu.memory_space<vmem>>, vector<128x256xbf16>
    %c1 = arith.constant 1 : index
    %c0_8 = arith.constant 0 : index
    %11 = vector.load %arg16[%c1, %c0_8] : memref<14x512xf32, #tpu.memory_space<vmem>>, vector<1x256xf32>
    %cst_9 = arith.constant dense<0.000000e+00> : vector<8x256xf32>
    %12 = tpu.matmul %9, %10, %cst_9 {dimension_numbers = #tpu.dot_dimension_numbers<[1], [0], [0], [1], [0, 0, 1, 1], [], []>} : vector<8x128xbf16>, vector<128x256xbf16>, vector<8x256xf32> -> vector<8x256xf32>
    %13 = vector.broadcast %11 : vector<1x256xf32> to vector<8x256xf32>
    %14 = arith.addf %12, %13 : vector<8x256xf32>
    %cst_10 = arith.constant 0.000000e+00 : f32
    %15 = vector.broadcast %cst_10 : f32 to vector<8x256xf32>
    %16 = arith.maximumf %14, %15 : vector<8x256xf32>
    %17 = arith.truncf %16 : vector<8x256xf32> to vector<8x256xbf16>
    %c0_11 = arith.constant 0 : index
    %c0_12 = arith.constant 0 : index
    %18 = vector.load %arg4[%c0_11, %c0_12] : memref<256x512xbf16, #tpu.memory_space<vmem>>, vector<256x512xbf16>
    %c2 = arith.constant 2 : index
    %c0_13 = arith.constant 0 : index
    %19 = vector.load %arg16[%c2, %c0_13] : memref<14x512xf32, #tpu.memory_space<vmem>>, vector<1x512xf32>
    %cst_14 = arith.constant dense<0.000000e+00> : vector<8x512xf32>
    %20 = tpu.matmul %17, %18, %cst_14 {dimension_numbers = #tpu.dot_dimension_numbers<[1], [0], [0], [1], [0, 0, 1, 1], [], []>} : vector<8x256xbf16>, vector<256x512xbf16>, vector<8x512xf32> -> vector<8x512xf32>
    %21 = vector.broadcast %19 : vector<1x512xf32> to vector<8x512xf32>
    %22 = arith.addf %20, %21 : vector<8x512xf32>
    %cst_15 = arith.constant 0.000000e+00 : f32
    %23 = vector.broadcast %cst_15 : f32 to vector<8x512xf32>
    %24 = arith.maximumf %22, %23 : vector<8x512xf32>
    %25 = arith.truncf %24 : vector<8x512xf32> to vector<8x512xbf16>
    %c0_16 = arith.constant 0 : index
    %c0_17 = arith.constant 0 : index
    %26 = vector.load %arg5[%c0_16, %c0_17] : memref<512x512xbf16, #tpu.memory_space<vmem>>, vector<512x512xbf16>
    %c3 = arith.constant 3 : index
    %c0_18 = arith.constant 0 : index
    %27 = vector.load %arg16[%c3, %c0_18] : memref<14x512xf32, #tpu.memory_space<vmem>>, vector<1x512xf32>
    %cst_19 = arith.constant dense<0.000000e+00> : vector<8x512xf32>
    %28 = tpu.matmul %25, %26, %cst_19 {dimension_numbers = #tpu.dot_dimension_numbers<[1], [0], [0], [1], [0, 0, 1, 1], [], []>} : vector<8x512xbf16>, vector<512x512xbf16>, vector<8x512xf32> -> vector<8x512xf32>
    %29 = vector.broadcast %27 : vector<1x512xf32> to vector<8x512xf32>
    %30 = arith.addf %28, %29 : vector<8x512xf32>
    %cst_20 = arith.constant 0.000000e+00 : f32
    %31 = vector.broadcast %cst_20 : f32 to vector<8x512xf32>
    %32 = arith.maximumf %30, %31 : vector<8x512xf32>
    %33 = arith.truncf %32 : vector<8x512xf32> to vector<8x512xbf16>
    %c0_21 = arith.constant 0 : index
    %c0_22 = arith.constant 0 : index
    %34 = vector.load %arg6[%c0_21, %c0_22] : memref<512x512xbf16, #tpu.memory_space<vmem>>, vector<512x512xbf16>
    %c4 = arith.constant 4 : index
    %c0_23 = arith.constant 0 : index
    %35 = vector.load %arg16[%c4, %c0_23] : memref<14x512xf32, #tpu.memory_space<vmem>>, vector<1x512xf32>
    %cst_24 = arith.constant dense<0.000000e+00> : vector<8x512xf32>
    %36 = tpu.matmul %33, %34, %cst_24 {dimension_numbers = #tpu.dot_dimension_numbers<[1], [0], [0], [1], [0, 0, 1, 1], [], []>} : vector<8x512xbf16>, vector<512x512xbf16>, vector<8x512xf32> -> vector<8x512xf32>
    %37 = vector.broadcast %35 : vector<1x512xf32> to vector<8x512xf32>
    %38 = arith.addf %36, %37 : vector<8x512xf32>
    %39 = arith.addf %38, %24 : vector<8x512xf32>
    %cst_25 = arith.constant 0.000000e+00 : f32
    %40 = vector.broadcast %cst_25 : f32 to vector<8x512xf32>
    %41 = arith.maximumf %39, %40 : vector<8x512xf32>
    %42 = arith.truncf %41 : vector<8x512xf32> to vector<8x512xbf16>
    %c0_26 = arith.constant 0 : index
    %c0_27 = arith.constant 0 : index
    %43 = vector.load %arg7[%c0_26, %c0_27] : memref<512x256xbf16, #tpu.memory_space<vmem>>, vector<512x256xbf16>
    %c5 = arith.constant 5 : index
    %c0_28 = arith.constant 0 : index
    %44 = vector.load %arg16[%c5, %c0_28] : memref<14x512xf32, #tpu.memory_space<vmem>>, vector<1x256xf32>
    %cst_29 = arith.constant dense<0.000000e+00> : vector<8x256xf32>
    %45 = tpu.matmul %42, %43, %cst_29 {dimension_numbers = #tpu.dot_dimension_numbers<[1], [0], [0], [1], [0, 0, 1, 1], [], []>} : vector<8x512xbf16>, vector<512x256xbf16>, vector<8x256xf32> -> vector<8x256xf32>
    %46 = vector.broadcast %44 : vector<1x256xf32> to vector<8x256xf32>
    %47 = arith.addf %45, %46 : vector<8x256xf32>
    %cst_30 = arith.constant 0.000000e+00 : f32
    %48 = vector.broadcast %cst_30 : f32 to vector<8x256xf32>
    %49 = arith.maximumf %47, %48 : vector<8x256xf32>
    %50 = arith.truncf %49 : vector<8x256xf32> to vector<8x256xbf16>
    %c0_31 = arith.constant 0 : index
    %c0_32 = arith.constant 0 : index
    %51 = vector.load %arg8[%c0_31, %c0_32] : memref<256x256xbf16, #tpu.memory_space<vmem>>, vector<256x256xbf16>
    %c6 = arith.constant 6 : index
    %c0_33 = arith.constant 0 : index
    %52 = vector.load %arg16[%c6, %c0_33] : memref<14x512xf32, #tpu.memory_space<vmem>>, vector<1x256xf32>
    %cst_34 = arith.constant dense<0.000000e+00> : vector<8x256xf32>
    %53 = tpu.matmul %50, %51, %cst_34 {dimension_numbers = #tpu.dot_dimension_numbers<[1], [0], [0], [1], [0, 0, 1, 1], [], []>} : vector<8x256xbf16>, vector<256x256xbf16>, vector<8x256xf32> -> vector<8x256xf32>
    %54 = vector.broadcast %52 : vector<1x256xf32> to vector<8x256xf32>
    %55 = arith.addf %53, %54 : vector<8x256xf32>
    %cst_35 = arith.constant 0.000000e+00 : f32
    %56 = vector.broadcast %cst_35 : f32 to vector<8x256xf32>
    %57 = arith.maximumf %55, %56 : vector<8x256xf32>
    %58 = arith.truncf %57 : vector<8x256xf32> to vector<8x256xbf16>
    %c0_36 = arith.constant 0 : index
    %c0_37 = arith.constant 0 : index
    %59 = vector.load %arg9[%c0_36, %c0_37] : memref<256x256xbf16, #tpu.memory_space<vmem>>, vector<256x256xbf16>
    %c7 = arith.constant 7 : index
    %c0_38 = arith.constant 0 : index
    %60 = vector.load %arg16[%c7, %c0_38] : memref<14x512xf32, #tpu.memory_space<vmem>>, vector<1x256xf32>
    %cst_39 = arith.constant dense<0.000000e+00> : vector<8x256xf32>
    %61 = tpu.matmul %58, %59, %cst_39 {dimension_numbers = #tpu.dot_dimension_numbers<[1], [0], [0], [1], [0, 0, 1, 1], [], []>} : vector<8x256xbf16>, vector<256x256xbf16>, vector<8x256xf32> -> vector<8x256xf32>
    %62 = vector.broadcast %60 : vector<1x256xf32> to vector<8x256xf32>
    %63 = arith.addf %61, %62 : vector<8x256xf32>
    %64 = arith.addf %63, %49 : vector<8x256xf32>
    %cst_40 = arith.constant 0.000000e+00 : f32
    %65 = vector.broadcast %cst_40 : f32 to vector<8x256xf32>
    %66 = arith.maximumf %64, %65 : vector<8x256xf32>
    %67 = arith.truncf %66 : vector<8x256xf32> to vector<8x256xbf16>
    %c0_41 = arith.constant 0 : index
    %c0_42 = arith.constant 0 : index
    %68 = vector.load %arg10[%c0_41, %c0_42] : memref<256x128xbf16, #tpu.memory_space<vmem>>, vector<256x128xbf16>
    %c8 = arith.constant 8 : index
    %c0_43 = arith.constant 0 : index
    %69 = vector.load %arg16[%c8, %c0_43] : memref<14x512xf32, #tpu.memory_space<vmem>>, vector<1x128xf32>
    %cst_44 = arith.constant dense<0.000000e+00> : vector<8x128xf32>
    %70 = tpu.matmul %67, %68, %cst_44 {dimension_numbers = #tpu.dot_dimension_numbers<[1], [0], [0], [1], [0, 0, 1, 1], [], []>} : vector<8x256xbf16>, vector<256x128xbf16>, vector<8x128xf32> -> vector<8x128xf32>
    %71 = vector.broadcast %69 : vector<1x128xf32> to vector<8x128xf32>
    %72 = arith.addf %70, %71 : vector<8x128xf32>
    %cst_45 = arith.constant 0.000000e+00 : f32
    %73 = vector.broadcast %cst_45 : f32 to vector<8x128xf32>
    %74 = arith.maximumf %72, %73 : vector<8x128xf32>
    %75 = arith.truncf %74 : vector<8x128xf32> to vector<8x128xbf16>
    %c0_46 = arith.constant 0 : index
    %c0_47 = arith.constant 0 : index
    %76 = vector.load %arg11[%c0_46, %c0_47] : memref<128x128xbf16, #tpu.memory_space<vmem>>, vector<128x128xbf16>
    %c9 = arith.constant 9 : index
    %c0_48 = arith.constant 0 : index
    %77 = vector.load %arg16[%c9, %c0_48] : memref<14x512xf32, #tpu.memory_space<vmem>>, vector<1x128xf32>
    %cst_49 = arith.constant dense<0.000000e+00> : vector<8x128xf32>
    %78 = tpu.matmul %75, %76, %cst_49 {dimension_numbers = #tpu.dot_dimension_numbers<[1], [0], [0], [1], [0, 0, 1, 1], [], []>} : vector<8x128xbf16>, vector<128x128xbf16>, vector<8x128xf32> -> vector<8x128xf32>
    %79 = vector.broadcast %77 : vector<1x128xf32> to vector<8x128xf32>
    %80 = arith.addf %78, %79 : vector<8x128xf32>
    %cst_50 = arith.constant 0.000000e+00 : f32
    %81 = vector.broadcast %cst_50 : f32 to vector<8x128xf32>
    %82 = arith.maximumf %80, %81 : vector<8x128xf32>
    %83 = arith.truncf %82 : vector<8x128xf32> to vector<8x128xbf16>
    %c0_51 = arith.constant 0 : index
    %c0_52 = arith.constant 0 : index
    %84 = vector.load %arg12[%c0_51, %c0_52] : memref<128x128xbf16, #tpu.memory_space<vmem>>, vector<128x128xbf16>
    %c10 = arith.constant 10 : index
    %c0_53 = arith.constant 0 : index
    %85 = vector.load %arg16[%c10, %c0_53] : memref<14x512xf32, #tpu.memory_space<vmem>>, vector<1x128xf32>
    %cst_54 = arith.constant dense<0.000000e+00> : vector<8x128xf32>
    %86 = tpu.matmul %83, %84, %cst_54 {dimension_numbers = #tpu.dot_dimension_numbers<[1], [0], [0], [1], [0, 0, 1, 1], [], []>} : vector<8x128xbf16>, vector<128x128xbf16>, vector<8x128xf32> -> vector<8x128xf32>
    %87 = vector.broadcast %85 : vector<1x128xf32> to vector<8x128xf32>
    %88 = arith.addf %86, %87 : vector<8x128xf32>
    %89 = arith.addf %88, %74 : vector<8x128xf32>
    %cst_55 = arith.constant 0.000000e+00 : f32
    %90 = vector.broadcast %cst_55 : f32 to vector<8x128xf32>
    %91 = arith.maximumf %89, %90 : vector<8x128xf32>
    %92 = arith.truncf %91 : vector<8x128xf32> to vector<8x128xbf16>
    %c0_56 = arith.constant 0 : index
    %c0_57 = arith.constant 0 : index
    %93 = vector.load %arg13[%c0_56, %c0_57] : memref<128x128xbf16, #tpu.memory_space<vmem>>, vector<128x128xbf16>
    %c11 = arith.constant 11 : index
    %c0_58 = arith.constant 0 : index
    %94 = vector.load %arg16[%c11, %c0_58] : memref<14x512xf32, #tpu.memory_space<vmem>>, vector<1x128xf32>
    %cst_59 = arith.constant dense<0.000000e+00> : vector<8x128xf32>
    %95 = tpu.matmul %92, %93, %cst_59 {dimension_numbers = #tpu.dot_dimension_numbers<[1], [0], [0], [1], [0, 0, 1, 1], [], []>} : vector<8x128xbf16>, vector<128x128xbf16>, vector<8x128xf32> -> vector<8x128xf32>
    %96 = vector.broadcast %94 : vector<1x128xf32> to vector<8x128xf32>
    %97 = arith.addf %95, %96 : vector<8x128xf32>
    %cst_60 = arith.constant 0.000000e+00 : f32
    %98 = vector.broadcast %cst_60 : f32 to vector<8x128xf32>
    %99 = arith.maximumf %97, %98 : vector<8x128xf32>
    %100 = arith.truncf %99 : vector<8x128xf32> to vector<8x128xbf16>
    %c0_61 = arith.constant 0 : index
    %c0_62 = arith.constant 0 : index
    %101 = vector.load %arg14[%c0_61, %c0_62] : memref<128x128xbf16, #tpu.memory_space<vmem>>, vector<128x128xbf16>
    %c12 = arith.constant 12 : index
    %c0_63 = arith.constant 0 : index
    %102 = vector.load %arg16[%c12, %c0_63] : memref<14x512xf32, #tpu.memory_space<vmem>>, vector<1x128xf32>
    %cst_64 = arith.constant dense<0.000000e+00> : vector<8x128xf32>
    %103 = tpu.matmul %100, %101, %cst_64 {dimension_numbers = #tpu.dot_dimension_numbers<[1], [0], [0], [1], [0, 0, 1, 1], [], []>} : vector<8x128xbf16>, vector<128x128xbf16>, vector<8x128xf32> -> vector<8x128xf32>
    %104 = vector.broadcast %102 : vector<1x128xf32> to vector<8x128xf32>
    %105 = arith.addf %103, %104 : vector<8x128xf32>
    %cst_65 = arith.constant 0.000000e+00 : f32
    %106 = vector.broadcast %cst_65 : f32 to vector<8x128xf32>
    %107 = arith.maximumf %105, %106 : vector<8x128xf32>
    %108 = arith.truncf %107 : vector<8x128xf32> to vector<8x128xbf16>
    %c0_66 = arith.constant 0 : index
    %c0_67 = arith.constant 0 : index
    %109 = vector.load %arg15[%c0_66, %c0_67] : memref<128x128xbf16, #tpu.memory_space<vmem>>, vector<128x128xbf16>
    %c13 = arith.constant 13 : index
    %c0_68 = arith.constant 0 : index
    %110 = vector.load %arg16[%c13, %c0_68] : memref<14x512xf32, #tpu.memory_space<vmem>>, vector<1x128xf32>
    %cst_69 = arith.constant dense<0.000000e+00> : vector<8x128xf32>
    %111 = tpu.matmul %108, %109, %cst_69 {dimension_numbers = #tpu.dot_dimension_numbers<[1], [0], [0], [1], [0, 0, 1, 1], [], []>} : vector<8x128xbf16>, vector<128x128xbf16>, vector<8x128xf32> -> vector<8x128xf32>
    %112 = vector.broadcast %110 : vector<1x128xf32> to vector<8x128xf32>
    %113 = arith.addf %111, %112 : vector<8x128xf32>
    %c0_70 = arith.constant 0 : index
    %c0_71 = arith.constant 0 : index
    %114 = vector.load %arg17[%c0_70, %c0_71] : memref<8x128xf32, #tpu.memory_space<vmem>>, vector<8x128xf32>
    tpu.vector_store %arg17[%c0_70, %c0_71], %113 {strides = array<i32>} : memref<8x128xf32, #tpu.memory_space<vmem>>, vector<8x128xf32>,
    return
  }
  func.func @transform_0(%arg0: i32) -> (i32, i32) {
    %c0_i32 = arith.constant 0 : i32
    %c0_i32_0 = arith.constant 0 : i32
    return %arg0, %c0_i32 : i32, i32
  }
  func.func @transform_1(%arg0: i32) -> (i32, i32) {
    %c0_i32 = arith.constant 0 : i32
    %c0_i32_0 = arith.constant 0 : i32
    %c0_i32_1 = arith.constant 0 : i32
    return %c0_i32, %c0_i32_0 : i32, i32
  }
  func.func @transform_2(%arg0: i32) -> (i32, i32) {
    %c0_i32 = arith.constant 0 : i32
    %c0_i32_0 = arith.constant 0 : i32
    %c0_i32_1 = arith.constant 0 : i32
    return %c0_i32, %c0_i32_0 : i32, i32
  }
  func.func @transform_3(%arg0: i32) -> (i32, i32) {
    %c0_i32 = arith.constant 0 : i32
    %c0_i32_0 = arith.constant 0 : i32
    %c0_i32_1 = arith.constant 0 : i32
    return %c0_i32, %c0_i32_0 : i32, i32
  }
  func.func @transform_4(%arg0: i32) -> (i32, i32) {
    %c0_i32 = arith.constant 0 : i32
    %c0_i32_0 = arith.constant 0 : i32
    %c0_i32_1 = arith.constant 0 : i32
    return %c0_i32, %c0_i32_0 : i32, i32
  }
  func.func @transform_5(%arg0: i32) -> (i32, i32) {
    %c0_i32 = arith.constant 0 : i32
    %c0_i32_0 = arith.constant 0 : i32
    %c0_i32_1 = arith.constant 0 : i32
    return %c0_i32, %c0_i32_0 : i32, i32
  }
  func.func @transform_6(%arg0: i32) -> (i32, i32) {
    %c0_i32 = arith.constant 0 : i32
    %c0_i32_0 = arith.constant 0 : i32
    %c0_i32_1 = arith.constant 0 : i32
    return %c0_i32, %c0_i32_0 : i32, i32
  }
  func.func @transform_7(%arg0: i32) -> (i32, i32) {
    %c0_i32 = arith.constant 0 : i32
    %c0_i32_0 = arith.constant 0 : i32
    %c0_i32_1 = arith.constant 0 : i32
    return %c0_i32, %c0_i32_0 : i32, i32
  }
  func.func @transform_8(%arg0: i32) -> (i32, i32) {
    %c0_i32 = arith.constant 0 : i32
    %c0_i32_0 = arith.constant 0 : i32
    %c0_i32_1 = arith.constant 0 : i32
    return %c0_i32, %c0_i32_0 : i32, i32
  }
  func.func @transform_9(%arg0: i32) -> (i32, i32) {
    %c0_i32 = arith.constant 0 : i32
    %c0_i32_0 = arith.constant 0 : i32
    %c0_i32_1 = arith.constant 0 : i32
    return %c0_i32, %c0_i32_0 : i32, i32
  }
  func.func @transform_10(%arg0: i32) -> (i32, i32) {
    %c0_i32 = arith.constant 0 : i32
    %c0_i32_0 = arith.constant 0 : i32
    %c0_i32_1 = arith.constant 0 : i32
    return %c0_i32, %c0_i32_0 : i32, i32
  }
  func.func @transform_11(%arg0: i32) -> (i32, i32) {
    %c0_i32 = arith.constant 0 : i32
    %c0_i32_0 = arith.constant 0 : i32
    %c0_i32_1 = arith.constant 0 : i32
    return %c0_i32, %c0_i32_0 : i32, i32
  }
  func.func @transform_12(%arg0: i32) -> (i32, i32) {
    %c0_i32 = arith.constant 0 : i32
    %c0_i32_0 = arith.constant 0 : i32
    %c0_i32_1 = arith.constant 0 : i32
    return %c0_i32, %c0_i32_0 : i32, i32
  }
  func.func @transform_13(%arg0: i32) -> (i32, i32) {
    %c0_i32 = arith.constant 0 : i32
    %c0_i32_0 = arith.constant 0 : i32
    %c0_i32_1 = arith.constant 0 : i32
    return %c0_i32, %c0_i32_0 : i32, i32
  }
  func.func @transform_14(%arg0: i32) -> (i32, i32) {
    %c0_i32 = arith.constant 0 : i32
    %c0_i32_0 = arith.constant 0 : i32
    %c0_i32_1 = arith.constant 0 : i32
    return %c0_i32, %c0_i32_0 : i32, i32
  }
  func.func @transform_15(%arg0: i32) -> (i32, i32) {
    %c0_i32 = arith.constant 0 : i32
    %c0_i32_0 = arith.constant 0 : i32
    %c0_i32_1 = arith.constant 0 : i32
    return %c0_i32, %c0_i32_0 : i32, i32
  }
  func.func @transform_16(%arg0: i32) -> (i32, i32) {
    %c0_i32 = arith.constant 0 : i32
    %c0_i32_0 = arith.constant 0 : i32
    return %arg0, %c0_i32 : i32, i32
  }
}

</mosaic_0001>

<bundles_post_ra>
// kernel: forward.1
= control target key start
LH: loop header
LB: loop body
LE: loop exit
PB: predicated region body
PF: predicated region fallthrough
CT: control target
= control target key end

     0   :  { %s6775_s0 = inlined_call_operand.hbm [shape: f32[8,16], index: 0, kind: input, shape index: {}]   ;;  %s6776_s1 = inlined_call_operand.hbm [shape: bf16[16,128], index: 1, kind: input, shape index: {}]   ;;  %s6777_s2 = inlined_call_operand.hbm [shape: bf16[128,256], index: 2, kind: input, shape index: {}]   ;;  %s6778_s3 = inlined_call_operand.hbm [shape: bf16[256,512], index: 3, kind: input, shape index: {}]   ;;  %s6779_s4 = inlined_call_operand.hbm [shape: bf16[512,512], index: 4, kind: input, shape index: {}]   ;;  %s6780_s5 = inlined_call_operand.hbm [shape: bf16[512,512], index: 5, kind: input, shape index: {}]   ;;  %s6781_s6 = inlined_call_operand.hbm [shape: bf16[512,256], index: 6, kind: input, shape index: {}]   ;;  %s6782_s7 = inlined_call_operand.hbm [shape: bf16[256,256], index: 7, kind: input, shape index: {}]   ;;  %s6783_s8 = inlined_call_operand.hbm [shape: bf16[256,256], index: 8, kind: input, shape index: {}]   ;;  %s6784_s9 = inlined_call_operand.hbm [shape: bf16[256,128], index: 9, kind: input, shape index: {}]   ;;  %s6785_s10 = inlined_call_operand.hbm [shape: bf16[128,128], index: 10, kind: input, shape index: {}]   ;;  %s6786_s11 = inlined_call_operand.hbm [shape: bf16[128,128], index: 11, kind: input, shape index: {}]   ;;  %s6787_s12 = inlined_call_operand.hbm [shape: bf16[128,128], index: 12, kind: input, shape index: {}]   ;;  %s6788_s13 = inlined_call_operand.hbm [shape: bf16[128,128], index: 13, kind: input, shape index: {}]   ;;  %s6789_s14 = inlined_call_operand.hbm [shape: bf16[128,128], index: 14, kind: input, shape index: {}]   ;;  %s6790_s15 = inlined_call_operand.hbm [shape: f32[14,512], index: 15, kind: input, shape index: {}]   ;;  %s6791_s16 = inlined_call_operand.vmem [shape: f32[8,128], index: 16, kind: output, shape index: {}]  }
   0x1   :  { %6792 = sst [smem:[#allocation36_spill]] %s6775_s0 }
   0x2   :  { %21 = vsyncpa [#allocation3], 0 }
   0x3   :  { %22 = vsyncpa [#allocation5], 0 }
   0x4   :  { %23 = vsyncpa [#allocation8], 0 }
   0x5   :  { %24 = vsyncpa [#allocation11], 0 }
   0x6   :  { %25 = vsyncpa [#allocation14], 0 }
   0x7   :  { %26 = vsyncpa [#allocation17], 0 }
   0x8   :  { %27 = vsyncpa [#allocation20], 0 }
   0x9   :  { %28 = vsyncpa [#allocation23], 0 }
   0xa   :  { %29 = vsyncpa [#allocation26], 0  ;;  %s6426_s21 = smov [#allocation4]  }
   0xb   :  { %s45_s22 = sshll.u32 %s6426_s21, 4  ;;  %s46_s22 = int_to_ptr.vmem [resolvable:$true] %s45_s22 }
   0xc   :  { %s6096_s23 = scalar_lea.vmem %s46_s22, 128  ;;  %p6101_p1 = scmp.lt.s32.totalorder %s46_s22, %s46_s22 }
   0xd   :  { %p6097_p0 = scmp.ne.s32.totalorder %s46_s22, %s6096_s23  ;;  %p6102_p2 = scmp.lt.s32.totalorder %s6096_s23, %s6096_s23 }
   0xf   :  { %p6103_p3 = por %p6102_p2, %p6101_p1 }
  0x11   :  { %p6104_p4 = pnand %p6103_p3, %p6097_p0 }
  0x13   :  { %6107 = shalt.err (!%p6104_p4)
}
  0x14   :  { %s6427_s24 = smov 64   ;;  %s6428_s25 = smov 4  }
  0x15   :  { %51 = dma.hbm_to_vmem [thread:$0]  %s6776_s1, 128, %s46_s22, [#allocation5], %s6427_s24, %s6427_s24, %s6428_s25  }
  0x16   :  { %s6429_s28 = smov [#allocation7]  }
  0x17   :  { %s69_s29 = sshll.u32 %s6429_s28, 4  ;;  %s70_s29 = int_to_ptr.vmem [resolvable:$true] %s69_s29 }
  0x18   :  { %s6116_s30 = scalar_lea.vmem %s70_s29, 8192  ;;  %p6121_p6 = scmp.lt.s32.totalorder %s70_s29, %s70_s29 }
  0x19   :  { %p6117_p5 = scmp.ne.s32.totalorder %s70_s29, %s6116_s30  ;;  %p6122_p7 = scmp.lt.s32.totalorder %s6116_s30, %s6116_s30 }
  0x1b   :  { %p6123_p8 = por %p6122_p7, %p6121_p6 }
  0x1d   :  { %p6124_p9 = pnand %p6123_p8, %p6117_p5 }
  0x1f   :  { %6127 = shalt.err (!%p6124_p9)
}
  0x20   :  { %s6430_s0 = smov 256   ;;  %s6431_s17 = smov 16  }
  0x21   :  { %75 = dma.hbm_to_vmem [thread:$0]  %s6778_s3, 8192, %s70_s29, [#allocation8], %s6430_s0, %s6430_s0, %s6431_s17  }
  0x22   :  { %s6432_s1 = smov [#allocation10]  }
  0x23   :  { %s93_s20 = sshll.u32 %s6432_s1, 4  ;;  %s94_s20 = int_to_ptr.vmem [resolvable:$true] %s93_s20 }
  0x24   :  { %s6136_s21 = scalar_lea.vmem %s94_s20, 16384  ;;  %p6141_p11 = scmp.lt.s32.totalorder %s94_s20, %s94_s20 }
  0x25   :  { %p6137_p10 = scmp.ne.s32.totalorder %s94_s20, %s6136_s21  ;;  %p6142_p12 = scmp.lt.s32.totalorder %s6136_s21, %s6136_s21 }
  0x27   :  { %p6143_p13 = por %p6142_p12, %p6141_p11 }
  0x29   :  { %p6144_p0 = pnand %p6143_p13, %p6137_p10 }
  0x2b   :  { %6147 = shalt.err (!%p6144_p0)
}
  0x2c   :  { %99 = dma.hbm_to_vmem [thread:$0]  %s6780_s5, 16384, %s94_s20, [#allocation11], %s6430_s0, %s6430_s0, %s6431_s17  }
  0x2d   :  { %s6433_s26 = smov [#allocation13]   ;;  %s6434_s3 = smov [#allocation16]  }
  0x2e   :  { %s117_s27 = sshll.u32 %s6433_s26, 4  ;;  %s141_s28 = sshll.u32 %s6434_s3, 4  ;;  %s118_s27 = int_to_ptr.vmem [resolvable:$true] %s117_s27  ;;  %s142_s28 = int_to_ptr.vmem [resolvable:$true] %s141_s28 }
  0x2f   :  { %s6156_s29 = scalar_lea.vmem %s118_s27, 4096  ;;  %p6161_p2 = scmp.lt.s32.totalorder %s118_s27, %s118_s27 }
  0x30   :  { %p6157_p1 = scmp.ne.s32.totalorder %s118_s27, %s6156_s29  ;;  %p6162_p3 = scmp.lt.s32.totalorder %s6156_s29, %s6156_s29 }
  0x32   :  { %p6163_p4 = por %p6162_p3, %p6161_p2 }
  0x34   :  { %p6164_p5 = pnand %p6163_p4, %p6157_p1 }
  0x36   :  { %6167 = shalt.err (!%p6164_p5)
}
  0x37   :  { %s6435_s30 = smov 128   ;;  %s6436_s18 = smov 8  }
  0x38   :  { %123 = dma.hbm_to_vmem [thread:$0]  %s6782_s7, 4096, %s118_s27, [#allocation14], %s6435_s30, %s6435_s30, %s6436_s18  }
  0x39   :  { %s6176_s5 = scalar_lea.vmem %s142_s28, 2048  ;;  %p6181_p7 = scmp.lt.s32.totalorder %s142_s28, %s142_s28 }
  0x3a   :  { %p6177_p6 = scmp.ne.s32.totalorder %s142_s28, %s6176_s5  ;;  %p6182_p8 = scmp.lt.s32.totalorder %s6176_s5, %s6176_s5 }
  0x3c   :  { %p6183_p9 = por %p6182_p8, %p6181_p7 }
  0x3e   :  { %p6184_p10 = pnand %p6183_p9, %p6177_p6 }
  0x40   :  { %6187 = shalt.err (!%p6184_p10)
}
  0x41   :  { %147 = dma.hbm_to_vmem [thread:$0]  %s6784_s9, 2048, %s142_s28, [#allocation17], %s6427_s24, %s6427_s24, %s6428_s25  }
  0x42   :  { %s6437_s22 = smov [#allocation19]   ;;  %s6438_s26 = smov [#allocation22]  }
  0x43   :  { %s165_s23 = sshll.u32 %s6437_s22, 4  ;;  %s189_s7 = sshll.u32 %s6438_s26, 4  ;;  %s166_s23 = int_to_ptr.vmem [resolvable:$true] %s165_s23  ;;  %s190_s7 = int_to_ptr.vmem [resolvable:$true] %s189_s7 }
  0x44   :  { %s6196_s27 = scalar_lea.vmem %s166_s23, 1024  ;;  %p6201_p12 = scmp.lt.s32.totalorder %s166_s23, %s166_s23 }
  0x45   :  { %p6197_p11 = scmp.ne.s32.totalorder %s166_s23, %s6196_s27  ;;  %p6202_p13 = scmp.lt.s32.totalorder %s6196_s27, %s6196_s27 }
  0x47   :  { %p6203_p0 = por %p6202_p13, %p6201_p12 }
  0x49   :  { %p6204_p1 = pnand %p6203_p0, %p6197_p11 }
  0x4b   :  { %6207 = shalt.err (!%p6204_p1)
}
  0x4c   :  { %171 = dma.hbm_to_vmem [thread:$0]  %s6786_s11, 1024, %s166_s23, [#allocation20], %s6427_s24, %s6427_s24, %s6428_s25  }
  0x4d   :  { %s6216_s9 = scalar_lea.vmem %s190_s7, 1024  ;;  %p6221_p3 = scmp.lt.s32.totalorder %s190_s7, %s190_s7 }
  0x4e   :  { %p6217_p2 = scmp.ne.s32.totalorder %s190_s7, %s6216_s9  ;;  %p6222_p4 = scmp.lt.s32.totalorder %s6216_s9, %s6216_s9 }
  0x50   :  { %p6223_p5 = por %p6222_p4, %p6221_p3 }
  0x52   :  { %p6224_p6 = pnand %p6223_p5, %p6217_p2 }
  0x54   :  { %6227 = shalt.err (!%p6224_p6)
}
  0x55   :  { %195 = dma.hbm_to_vmem [thread:$0]  %s6788_s13, 1024, %s190_s7, [#allocation23], %s6427_s24, %s6427_s24, %s6428_s25  }
  0x56   :  { %s6439_s1 = smov [#allocation2]   ;;  %s6440_s20 = smov [#allocation6]  }
  0x57   :  { %s36_s5 = sshll.u32 %s6439_s1, 4  ;;  %s57_s11 = sshll.u32 %s6440_s20, 4  ;;  %s37_s5 = int_to_ptr.vmem [resolvable:$true] %s36_s5  ;;  %s58_s11 = int_to_ptr.vmem [resolvable:$true] %s57_s11 }
  0x58   :  { %s6236_s21 = scalar_lea.vmem %s37_s5, 128  ;;  %p6241_p8 = scmp.lt.s32.totalorder %s37_s5, %s37_s5 }
  0x59   :  { %p6237_p7 = scmp.ne.s32.totalorder %s37_s5, %s6236_s21  ;;  %p6242_p9 = scmp.lt.s32.totalorder %s6236_s21, %s6236_s21 }
  0x5b   :  { %p6243_p10 = por %p6242_p9, %p6241_p8 }
  0x5d   :  { %p6244_p11 = pnand %p6243_p10, %p6237_p7 }
  0x5f   :  { %6247 = shalt.err (!%p6244_p11)
}
  0x60   :  { %s6793_s26 = sld [smem:[#allocation36_spill]]  ;;  %s6256_s27 = scalar_lea.vmem %s58_s11, 2048 }
  0x61   :  { %p6257_p12 = scmp.ne.s32.totalorder %s58_s11, %s6256_s27  ;;  %p6261_p13 = scmp.lt.s32.totalorder %s58_s11, %s58_s11 }
  0x62   :  { %p6262_p0 = scmp.lt.s32.totalorder %s6256_s27, %s6256_s27 }
  0x64   :  { %p6263_p1 = por %p6262_p0, %p6261_p13 }
  0x66   :  { %39 = dma.hbm_to_vmem [thread:$0]  %s6793_s26, 128, %s37_s5, [#allocation3]  }
  0x67   :  { %p6264_p2 = pnand %p6263_p1, %p6257_p12 }
  0x69   :  { %6267 = shalt.err (!%p6264_p2)
}
  0x6a   :  { %63 = dma.hbm_to_vmem [thread:$0]  %s6777_s2, 2048, %s58_s11, [#allocation5], %s6435_s30, %s6435_s30, %s6436_s18  }
  0x6b   :  { %s6441_s3 = smov [#allocation9]   ;;  %s6442_s9 = smov [#allocation12]  }
  0x6c   :  { %s81_s29 = sshll.u32 %s6441_s3, 4  ;;  %s105_s28 = sshll.u32 %s6442_s9, 4  ;;  %s82_s29 = int_to_ptr.vmem [resolvable:$true] %s81_s29  ;;  %s106_s28 = int_to_ptr.vmem [resolvable:$true] %s105_s28 }
  0x6d   :  { %s6276_s19 = scalar_lea.vmem %s82_s29, 16384  ;;  %p6281_p4 = scmp.lt.s32.totalorder %s82_s29, %s82_s29 }
  0x6e   :  { %p6277_p3 = scmp.ne.s32.totalorder %s82_s29, %s6276_s19  ;;  %p6282_p5 = scmp.lt.s32.totalorder %s6276_s19, %s6276_s19 }
  0x70   :  { %p6283_p6 = por %p6282_p5, %p6281_p4 }
  0x72   :  { %p6284_p7 = pnand %p6283_p6, %p6277_p3 }
  0x74   :  { %6287 = shalt.err (!%p6284_p7)
}
  0x75   :  { %87 = dma.hbm_to_vmem [thread:$0]  %s6779_s4, 16384, %s82_s29, [#allocation8], %s6430_s0, %s6430_s0, %s6431_s17  }
  0x76   :  { %s6296_s2 = scalar_lea.vmem %s106_s28, 8192  ;;  %p6301_p9 = scmp.lt.s32.totalorder %s106_s28, %s106_s28 }
  0x77   :  { %p6297_p8 = scmp.ne.s32.totalorder %s106_s28, %s6296_s2  ;;  %p6302_p10 = scmp.lt.s32.totalorder %s6296_s2, %s6296_s2 }
  0x79   :  { %p6303_p11 = por %p6302_p10, %p6301_p9 }
  0x7b   :  { %p6304_p12 = pnand %p6303_p11, %p6297_p8 }
  0x7d   :  { %6307 = shalt.err (!%p6304_p12)
}
  0x7e   :  { %111 = dma.hbm_to_vmem [thread:$0]  %s6781_s6, 8192, %s106_s28, [#allocation11], %s6435_s30, %s6435_s30, %s6436_s18  }
  0x7f   :  { %s6443_s21 = smov [#allocation15]   ;;  %s6444_s23 = smov [#allocation18]  }
  0x80   :  { %s129_s22 = sshll.u32 %s6443_s21, 4  ;;  %s153_s4 = sshll.u32 %s6444_s23, 4  ;;  %s130_s22 = int_to_ptr.vmem [resolvable:$true] %s129_s22  ;;  %s154_s4 = int_to_ptr.vmem [resolvable:$true] %s153_s4 }
  0x81   :  { %s6316_s0 = scalar_lea.vmem %s130_s22, 4096  ;;  %p6321_p0 = scmp.lt.s32.totalorder %s130_s22, %s130_s22 }
  0x82   :  { %p6317_p13 = scmp.ne.s32.totalorder %s130_s22, %s6316_s0  ;;  %p6322_p1 = scmp.lt.s32.totalorder %s6316_s0, %s6316_s0 }
  0x84   :  { %p6323_p2 = por %p6322_p1, %p6321_p0 }
  0x86   :  { %p6324_p3 = pnand %p6323_p2, %p6317_p13 }
  0x88   :  { %6327 = shalt.err (!%p6324_p3)
}
  0x89   :  { %135 = dma.hbm_to_vmem [thread:$0]  %s6783_s8, 4096, %s130_s22, [#allocation14], %s6435_s30, %s6435_s30, %s6436_s18  }
  0x8a   :  { %s6336_s6 = scalar_lea.vmem %s154_s4, 1024  ;;  %p6341_p5 = scmp.lt.s32.totalorder %s154_s4, %s154_s4 }
  0x8b   :  { %p6337_p4 = scmp.ne.s32.totalorder %s154_s4, %s6336_s6  ;;  %p6342_p6 = scmp.lt.s32.totalorder %s6336_s6, %s6336_s6 }
  0x8d   :  { %p6343_p7 = por %p6342_p6, %p6341_p5 }
  0x8f   :  { %p6344_p8 = pnand %p6343_p7, %p6337_p4 }
  0x91   :  { %6347 = shalt.err (!%p6344_p8)
}
  0x92   :  { %159 = dma.hbm_to_vmem [thread:$0]  %s6785_s10, 1024, %s154_s4, [#allocation17], %s6427_s24, %s6427_s24, %s6428_s25  }
  0x93   :  { %s6445_s7 = smov [#allocation21]   ;;  %s6446_s29 = smov [#allocation24]  }
  0x94   :  { %s177_s3 = sshll.u32 %s6445_s7, 4  ;;  %s201_s8 = sshll.u32 %s6446_s29, 4  ;;  %s178_s3 = int_to_ptr.vmem [resolvable:$true] %s177_s3  ;;  %s202_s8 = int_to_ptr.vmem [resolvable:$true] %s201_s8 }
  0x95   :  { %s6356_s30 = scalar_lea.vmem %s178_s3, 1024  ;;  %p6361_p10 = scmp.lt.s32.totalorder %s178_s3, %s178_s3 }
  0x96   :  { %p6357_p9 = scmp.ne.s32.totalorder %s178_s3, %s6356_s30  ;;  %p6362_p11 = scmp.lt.s32.totalorder %s6356_s30, %s6356_s30 }
  0x98   :  { %p6363_p12 = por %p6362_p11, %p6361_p10 }
  0x9a   :  { %p6364_p13 = pnand %p6363_p12, %p6357_p9 }
  0x9c   :  { %6367 = shalt.err (!%p6364_p13)
}
  0x9d   :  { %183 = dma.hbm_to_vmem [thread:$0]  %s6787_s12, 1024, %s178_s3, [#allocation20], %s6427_s24, %s6427_s24, %s6428_s25  }
  0x9e   :  { %s6376_s10 = scalar_lea.vmem %s202_s8, 1024  ;;  %p6381_p1 = scmp.lt.s32.totalorder %s202_s8, %s202_s8 }
  0x9f   :  { %p6377_p0 = scmp.ne.s32.totalorder %s202_s8, %s6376_s10  ;;  %p6382_p2 = scmp.lt.s32.totalorder %s6376_s10, %s6376_s10 }
  0xa1   :  { %p6383_p3 = por %p6382_p2, %p6381_p1 }
  0xa3   :  { %p6384_p4 = pnand %p6383_p3, %p6377_p0 }
  0xa5   :  { %6387 = shalt.err (!%p6384_p4)
}
  0xa6   :  { %207 = dma.hbm_to_vmem [thread:$0]  %s6789_s14, 1024, %s202_s8, [#allocation23], %s6427_s24, %s6427_s24, %s6428_s25  }
  0xa7   :  { %s6447_s1 = smov [#allocation25]  }
  0xa8   :  { %s213_s5 = sshll.u32 %s6447_s1, 4  ;;  %s214_s5 = int_to_ptr.vmem [resolvable:$true] %s213_s5 }
  0xa9   :  { %s6396_s2 = scalar_lea.vmem %s214_s5, 1024  ;;  %p6401_p6 = scmp.lt.s32.totalorder %s214_s5, %s214_s5 }
  0xaa   :  { %p6397_p5 = scmp.ne.s32.totalorder %s214_s5, %s6396_s2  ;;  %p6402_p7 = scmp.lt.s32.totalorder %s6396_s2, %s6396_s2 }
  0xac   :  { %p6403_p8 = por %p6402_p7, %p6401_p6 }
  0xae   :  { %p6404_p9 = pnand %p6403_p8, %p6397_p5 }
  0xb0   :  { %6407 = shalt.err (!%p6404_p9)
}
  0xb1   :  { %s6448_s12 = smov 512   ;;  %s6449_s20 = smov 32  }
  0xb2   :  { %219 = dma.hbm_to_vmem [thread:$0]  %s6790_s15, 1024, %s214_s5, [#allocation26], %s6448_s12, %s6448_s12, %s6449_s20  }
  0xb3   :  { %6408 = dma.done.wait [#allocation3], 128  }
  0xb4   :  { %6409 = vsyncadd [#allocation3], 4294967168 }
  0xb5   :  { %6410 = dma.done.wait [#allocation5], 2176  }
  0xb6   :  { %6411 = vsyncadd [#allocation5], 4294965120 }
  0xb7   :  { %6412 = dma.done.wait [#allocation8], 24576  }
  0xb8   :  { %6413 = vsyncadd [#allocation8], 4294942720 }
  0xb9   :  { %6414 = dma.done.wait [#allocation11], 24576  }
  0xba   :  { %6415 = vsyncadd [#allocation11], 4294942720 }
  0xbb   :  { %6416 = dma.done.wait [#allocation14], 8192  }
  0xbc   :  { %6417 = vsyncadd [#allocation14], 4294959104 }
  0xbd   :  { %6418 = dma.done.wait [#allocation17], 3072  }
  0xbe   :  { %6419 = vsyncadd [#allocation17], 4294964224 }
  0xbf   :  { %6420 = dma.done.wait [#allocation20], 2048  }
  0xc0   :  { %6421 = vsyncadd [#allocation20], 4294965248 }
  0xc1   :  { %6422 = dma.done.wait [#allocation23], 2048  }
  0xc2   :  { %6423 = vsyncadd [#allocation23], 4294965248 }
  0xc3   :  { %6424 = dma.done.wait [#allocation26], 1024  }
  0xc4   :  { %6425 = vsyncadd [#allocation26], 4294966272  ;;  %v6450_v0 = vmov 0.0   ;;  %vm6451_vm0 = vmmov 0   ;;  %v5335_v1 = vld [vmem:[#allocation4] sm:$0xff]   ;;  %v269_v2 = vld [vmem:[#allocation2] sm:$0xff] }
  0xc5   :  { %5202 = vmatprep.subr.bf16.mxu0 %v6450_v0  ;;  %5204 = vmatprep.mubr.msk.bf16.mxu0 %vm6451_vm0, %v6450_v0  ;;  %v273_v3 = vpack.c.bf16 %v269_v2, %v269_v2  ;;  %vm280_vm1 = vcmask 130048   ;;  %v5336_v4 = vld [vmem:[#allocation6 + $0x74] ss:$8 sps:$4 sm:$0xff]   ;;  %v5338_v5 = vld [vmem:[#allocation6 + $0x70] ss:$8 sps:$4 sm:$0xff]   ;;  %v6452_v20 = vmov 0  }
  0xc6   :  { %5203 = vmatpush3.bf16.msra.mxu0 %v5335_v1  ;;  %v5339_v6 = vld [vmem:[#allocation6 + $0x64] ss:$8 sps:$4 sm:$0xff]   ;;  %435 = vmatprep.subr.bf16.mxu1 %v5336_v4  ;;  %v5341_v7 = vld [vmem:[#allocation6 + $0x60] ss:$8 sps:$4 sm:$0xff]   ;;  %v5342_v8 = vld [vmem:[#allocation6 + $0x54] ss:$8 sps:$4 sm:$0xff]  }
  0xc7   :  { %436 = vmatpush1.bf16.msra.mxu1 %v5338_v5  ;;  %v5344_v9 = vld [vmem:[#allocation6 + $0x50] ss:$8 sps:$4 sm:$0xff]   ;;  %v5345_v10 = vld [vmem:[#allocation6 + $0x44] ss:$8 sps:$4 sm:$0xff]   ;;  %v5347_v11 = vld [vmem:[#allocation6 + $0x40] ss:$8 sps:$4 sm:$0xff]   ;;  %467 = vmatprep.mubr.bf16.mxu1 %v6452_v20 }
  0xc8   :  { %437 = vmatprep.subr.bf16.mxu1 %v5339_v6  ;;  %v5348_v12 = vld [vmem:[#allocation6 + $0x34] ss:$8 sps:$4 sm:$0xff]   ;;  %v5350_v13 = vld [vmem:[#allocation6 + $0x30] ss:$8 sps:$4 sm:$0xff]   ;;  %v5351_v14 = vld [vmem:[#allocation6 + $0x24] ss:$8 sps:$4 sm:$0xff]  }
  0xc9   :  { %5205 = vmatmul.mubr.msk.bf16.vlgmr.msra.gmra.mxu0 %vm280_vm1, %v273_v3  ;;  %v5353_v15 = vld [vmem:[#allocation6 + $0x20] ss:$8 sps:$4 sm:$0xff]   ;;  %v5354_v16 = vld [vmem:[#allocation6 + $0x14] ss:$8 sps:$4 sm:$0xff]   ;;  %v5356_v17 = vld [vmem:[#allocation6 + $0x10] ss:$8 sps:$4 sm:$0xff]  }
  0xca   :  { %v5357_v18 = vld [vmem:[#allocation6 + $0x4] ss:$8 sps:$4 sm:$0xff]   ;;  %v5359_v19 = vld [vmem:[#allocation6] ss:$8 sps:$4 sm:$0xff]  }
  0xcb   :  { %438 = vmatpush1.bf16.msra.mxu1 %v5341_v7  ;;  %v5360_v21 = vld [vmem:[#allocation7 + $0xe0] ss:$16 sps:$4 sm:$0xff]   ;;  %v5362_v22 = vld [vmem:[#allocation7 + $0xe4] ss:$16 sps:$4 sm:$0xff]   ;;  %v5365_v23 = vld [vmem:[#allocation7 + $0xec] ss:$16 sps:$4 sm:$0xff]  }
  0xcc   :  { %439 = vmatprep.subr.bf16.mxu1 %v5342_v8  ;;  %v5368_v24 = vld [vmem:[#allocation7 + $0xc4] ss:$16 sps:$4 sm:$0xff]   ;;  %887 = vmatprep.subr.bf16.mxu0 %v5362_v22  ;;  %v5366_v25 = vld [vmem:[#allocation7 + $0xc0] ss:$16 sps:$4 sm:$0xff]   ;;  %v5363_v54 = vld [vmem:[#allocation7 + $0xe8] ss:$16 sps:$4 sm:$0xff]  }
  0xcd   :  { %888 = vmatpush1.bf16.msra.mxu0 %v5360_v21  ;;  %v5374_v26 = vld [vmem:[#allocation7 + $0xa4] ss:$16 sps:$4 sm:$0xff]   ;;  %v5372_v27 = vld [vmem:[#allocation7 + $0xa0] ss:$16 sps:$4 sm:$0xff]   ;;  %v5371_v56 = vld [vmem:[#allocation7 + $0xcc] ss:$16 sps:$4 sm:$0xff]  }
  0xce   :  { %889 = vmatprep.subr.bf16.mxu0 %v5368_v24  ;;  %v5380_v28 = vld [vmem:[#allocation7 + $0x84] ss:$16 sps:$4 sm:$0xff]   ;;  %v5378_v29 = vld [vmem:[#allocation7 + $0x80] ss:$16 sps:$4 sm:$0xff]   ;;  %v5369_v60 = vld [vmem:[#allocation7 + $0xc8] ss:$16 sps:$4 sm:$0xff]  }
  0xcf   :  { %440 = vmatpush1.bf16.msra.mxu1 %v5344_v9  ;;  %v5386_v30 = vld [vmem:[#allocation7 + $0x64] ss:$16 sps:$4 sm:$0xff]   ;;  %v5384_v31 = vld [vmem:[#allocation7 + $0x60] ss:$16 sps:$4 sm:$0xff]   ;;  %v5377_v61 = vld [vmem:[#allocation7 + $0xac] ss:$16 sps:$4 sm:$0xff]  }
  0xd0   :  { %441 = vmatprep.subr.bf16.mxu1 %v5345_v10  ;;  %v5392_v32 = vld [vmem:[#allocation7 + $0x44] ss:$16 sps:$4 sm:$0xff]   ;;  %v5390_v33 = vld [vmem:[#allocation7 + $0x40] ss:$16 sps:$4 sm:$0xff]   ;;  %v5375_v62 = vld [vmem:[#allocation7 + $0xa8] ss:$16 sps:$4 sm:$0xff]  }
  0xd1   :  { %890 = vmatpush1.bf16.msra.mxu0 %v5366_v25  ;;  %v5398_v34 = vld [vmem:[#allocation7 + $0x24] ss:$16 sps:$4 sm:$0xff]   ;;  %v5396_v35 = vld [vmem:[#allocation7 + $0x20] ss:$16 sps:$4 sm:$0xff]   ;;  %v5383_v63 = vld [vmem:[#allocation7 + $0x8c] ss:$16 sps:$4 sm:$0xff]  }
  0xd2   :  { %891 = vmatprep.subr.bf16.mxu0 %v5374_v26  ;;  %v5404_v36 = vld [vmem:[#allocation7 + $0x4] ss:$16 sps:$4 sm:$0xff]   ;;  %v5402_v37 = vld [vmem:[#allocation7] ss:$16 sps:$4 sm:$0xff]   ;;  %v5381_v1 = vld [vmem:[#allocation7 + $0x88] ss:$16 sps:$4 sm:$0xff]  }
  0xd3   :  { %442 = vmatpush1.bf16.msra.mxu1 %v5347_v11  ;;  %v5410_v38 = vld [vmem:[#allocation7 + $0x1e4] ss:$16 sps:$4 sm:$0xff]   ;;  %v5408_v39 = vld [vmem:[#allocation7 + $0x1e0] ss:$16 sps:$4 sm:$0xff]   ;;  %v5389_v2 = vld [vmem:[#allocation7 + $0x6c] ss:$16 sps:$4 sm:$0xff]  }
  0xd4   :  { %443 = vmatprep.subr.bf16.mxu1 %v5348_v12  ;;  %v5416_v40 = vld [vmem:[#allocation7 + $0x1c4] ss:$16 sps:$4 sm:$0xff]   ;;  %v5414_v41 = vld [vmem:[#allocation7 + $0x1c0] ss:$16 sps:$4 sm:$0xff]   ;;  %v5387_v3 = vld [vmem:[#allocation7 + $0x68] ss:$16 sps:$4 sm:$0xff]  }
  0xd5   :  { %892 = vmatpush1.bf16.msra.mxu0 %v5372_v27  ;;  %v5422_v42 = vld [vmem:[#allocation7 + $0x1a4] ss:$16 sps:$4 sm:$0xff]   ;;  %v5420_v43 = vld [vmem:[#allocation7 + $0x1a0] ss:$16 sps:$4 sm:$0xff]   ;;  %v5395_v4 = vld [vmem:[#allocation7 + $0x4c] ss:$16 sps:$4 sm:$0xff]  }
  0xd6   :  { %893 = vmatprep.subr.bf16.mxu0 %v5380_v28  ;;  %v5428_v44 = vld [vmem:[#allocation7 + $0x184] ss:$16 sps:$4 sm:$0xff]   ;;  %v5426_v45 = vld [vmem:[#allocation7 + $0x180] ss:$16 sps:$4 sm:$0xff]   ;;  %v5393_v5 = vld [vmem:[#allocation7 + $0x48] ss:$16 sps:$4 sm:$0xff]  }
  0xd7   :  { %444 = vmatpush1.bf16.msra.mxu1 %v5350_v13  ;;  %v5434_v46 = vld [vmem:[#allocation7 + $0x164] ss:$16 sps:$4 sm:$0xff]   ;;  %v5432_v47 = vld [vmem:[#allocation7 + $0x160] ss:$16 sps:$4 sm:$0xff]   ;;  %v5401_v6 = vld [vmem:[#allocation7 + $0x2c] ss:$16 sps:$4 sm:$0xff]  }
  0xd8   :  { %445 = vmatprep.subr.bf16.mxu1 %v5351_v14  ;;  %v5440_v48 = vld [vmem:[#allocation7 + $0x144] ss:$16 sps:$4 sm:$0xff]   ;;  %v5438_v49 = vld [vmem:[#allocation7 + $0x140] ss:$16 sps:$4 sm:$0xff]   ;;  %v5399_v7 = vld [vmem:[#allocation7 + $0x28] ss:$16 sps:$4 sm:$0xff]  }
  0xd9   :  { %894 = vmatpush1.bf16.msra.mxu0 %v5378_v29  ;;  %v272_v50 = vld [vmem:[#allocation25] ss:$0 sm:$0xff]  ;;  %v5407_v8 = vld [vmem:[#allocation7 + $0xc] ss:$16 sps:$4 sm:$0xff]   ;;  %v5405_v9 = vld [vmem:[#allocation7 + $0x8] ss:$16 sps:$4 sm:$0xff]  }
  0xda   :  { %895 = vmatprep.subr.bf16.mxu0 %v5386_v30  ;;  %v5413_v10 = vld [vmem:[#allocation7 + $0x1ec] ss:$16 sps:$4 sm:$0xff]   ;;  %v5411_v11 = vld [vmem:[#allocation7 + $0x1e8] ss:$16 sps:$4 sm:$0xff]   ;;  %v5446_v22 = vld [vmem:[#allocation7 + $0x124] ss:$16 sps:$4 sm:$0xff]  }
  0xdb   :  { %446 = vmatpush1.bf16.msra.mxu1 %v5353_v15  ;;  %v5419_v12 = vld [vmem:[#allocation7 + $0x1cc] ss:$16 sps:$4 sm:$0xff]   ;;  %v5417_v13 = vld [vmem:[#allocation7 + $0x1c8] ss:$16 sps:$4 sm:$0xff]   ;;  %v5444_v24 = vld [vmem:[#allocation7 + $0x120] ss:$16 sps:$4 sm:$0xff]  }
  0xdc   :  { %447 = vmatprep.subr.bf16.mxu1 %v5354_v16  ;;  %v5425_v14 = vld [vmem:[#allocation7 + $0x1ac] ss:$16 sps:$4 sm:$0xff]   ;;  %v5423_v15 = vld [vmem:[#allocation7 + $0x1a8] ss:$16 sps:$4 sm:$0xff]   ;;  %v5452_v26 = vld [vmem:[#allocation7 + $0x104] ss:$16 sps:$4 sm:$0xff]  }
  0xdd   :  { %896 = vmatpush1.bf16.msra.mxu0 %v5384_v31  ;;  %v5431_v16 = vld [vmem:[#allocation7 + $0x18c] ss:$16 sps:$4 sm:$0xff]   ;;  %v5441_v21 = vld [vmem:[#allocation7 + $0x148] ss:$16 sps:$4 sm:$0xff]   ;;  %v5450_v28 = vld [vmem:[#allocation7 + $0x100] ss:$16 sps:$4 sm:$0xff]  }
  0xde   :  { %897 = vmatprep.subr.bf16.mxu0 %v5392_v32  ;;  %v5443_v20 = vld [vmem:[#allocation7 + $0x14c] ss:$16 sps:$4 sm:$0xff]   ;;  %v5447_v25 = vld [vmem:[#allocation7 + $0x128] ss:$16 sps:$4 sm:$0xff]   ;;  %v5458_v30 = vld [vmem:[#allocation9 + $0xe4] ss:$16 sps:$4 sm:$0xff]   ;;  %v345_v32 = vlaneseq }
  0xdf   :  { %448 = vmatpush1.bf16.msra.mxu1 %v5356_v17  ;;  %v5429_v17 = vld [vmem:[#allocation7 + $0x188] ss:$16 sps:$4 sm:$0xff]   ;;  %v5455_v27 = vld [vmem:[#allocation7 + $0x10c] ss:$16 sps:$4 sm:$0xff]   ;;  %v5461_v31 = vld [vmem:[#allocation9 + $0x2e4] ss:$16 sps:$4 sm:$0xff]  }
  0xe0   :  { %449 = vmatprep.subr.bf16.mxu1 %v5357_v18  ;;  %v5437_v18 = vld [vmem:[#allocation7 + $0x16c] ss:$16 sps:$4 sm:$0xff]   ;;  %v5453_v29 = vld [vmem:[#allocation7 + $0x108] ss:$16 sps:$4 sm:$0xff]  }
  0xe1   :  { %898 = vmatpush1.bf16.msra.mxu0 %v5390_v33  ;;  %v6631_v33 = vshrl.u32 %v345_v32, 7  ;;  %v5530_v32 = vld [vmem:[#allocation9 + $0x164] ss:$16 sps:$4 sm:$0xff]  }
  0xe2   :  { %899 = vmatprep.subr.bf16.mxu0 %v5398_v34 }
  0xe3   :  { %450 = vmatpush1.bf16.msra.mxu1 %v5359_v19  ;;  %v5435_v19 = vld [vmem:[#allocation7 + $0x168] ss:$16 sps:$4 sm:$0xff]   ;;  %v6634_v34 = vsub.s32 0, %v6631_v33 }
  0xe4   :  { %928 = vmatprep.subr.bf16.mxu1 %v5365_v23  ;;  %v5449_v23 = vld [vmem:[#allocation7 + $0x12c] ss:$16 sps:$4 sm:$0xff]  }
  0xe5   :  { %900 = vmatpush1.bf16.msra.mxu0 %v5396_v35  ;;  %v343_v35 = vld [vmem:[#allocation25 + $0x1] ss:$8 sm:$0x3] }
  0xe6   :  { %901 = vmatprep.subr.bf16.mxu0 %v5404_v36  ;;  %v6637_v36 = vsub.s32 1, %v6631_v33 }
  0xe9   :  { %902 = vmatpush1.bf16.msra.mxu0 %v5402_v37  ;;  %v348_v37 = vrot.slane %v343_v35, %v6634_v34 }
  0xea   :  { %903 = vmatprep.subr.bf16.mxu0 %v5410_v38  ;;  %v352_v38 = vrot.slane %v343_v35, %v6637_v36  ;;  %v5533_v35 = vld [vmem:[#allocation9 + $0x364] ss:$16 sps:$4 sm:$0xff]  }
  0xed   :  { %904 = vmatpush2.bf16.msra.mxu0 %v5408_v39 }
  0xee   :  { %905 = vmatprep.subr.bf16.mxu0 %v5416_v40 }
  0xf1   :  { %906 = vmatpush2.bf16.msra.mxu0 %v5414_v41 }
  0xf2   :  { %907 = vmatprep.subr.bf16.mxu0 %v5422_v42 }
  0xf5   :  { %908 = vmatpush2.bf16.msra.mxu0 %v5420_v43 }
  0xf6   :  { %909 = vmatprep.subr.bf16.mxu0 %v5428_v44 }
  0xf9   :  { %910 = vmatpush2.bf16.msra.mxu0 %v5426_v45 }
  0xfa   :  { %911 = vmatprep.subr.bf16.mxu0 %v5434_v46 }
  0xfd   :  { %912 = vmatpush2.bf16.msra.mxu0 %v5432_v47 }
  0xfe   :  { %913 = vmatprep.subr.bf16.mxu0 %v5440_v48  ;;  %v5456_v48 = vld [vmem:[#allocation9 + $0xe0] ss:$16 sps:$4 sm:$0xff]  }
 0x101   :  { %914 = vmatpush2.bf16.msra.mxu0 %v5438_v49  ;;  %v5459_v49 = vld [vmem:[#allocation9 + $0x2e0] ss:$16 sps:$4 sm:$0xff]  }
 0x102   :  { %915 = vmatprep.subr.bf16.mxu0 %v5446_v22  ;;  %v5510_v22 = vld [vmem:[#allocation9 + $0x1c0] ss:$16 sps:$4 sm:$0xff]  }
 0x105   :  { %916 = vmatpush2.bf16.msra.mxu0 %v5444_v24  ;;  %v5518_v24 = vld [vmem:[#allocation9 + $0x1a4] ss:$16 sps:$4 sm:$0xff]  }
 0x106   :  { %917 = vmatprep.subr.bf16.mxu0 %v5452_v26  ;;  %v5516_v26 = vld [vmem:[#allocation9 + $0x1a0] ss:$16 sps:$4 sm:$0xff]  }
 0x109   :  { %918 = vmatpush2.bf16.msra.mxu0 %v5450_v28  ;;  %v5524_v28 = vld [vmem:[#allocation9 + $0x184] ss:$16 sps:$4 sm:$0xff]  }
 0x10a   :  { %1768 = vmatprep.subr.bf16.mxu0 %v5458_v30  ;;  %v5522_v30 = vld [vmem:[#allocation9 + $0x180] ss:$16 sps:$4 sm:$0xff]  }
 0x189   :  { %v318_v51 = vpop.f32.mrf.mxu0 }
 0x18a   :  { %v319_v52 = vadd.f32 %v318_v51, %v272_v50  ;;  %v5464_v51 = vld [vmem:[#allocation9 + $0xc4] ss:$16 sps:$4 sm:$0xff]  }
 0x18b   :  { %v5206_v53 = vpop.f32.mrf.mxu0 }
 0x18c   :  { %v324_v55 = vmax.f32 %v319_v52, 0.0  ;;  %v5467_v52 = vld [vmem:[#allocation9 + $0x2c4] ss:$16 sps:$4 sm:$0xff]   ;;  %v5462_v53 = vld [vmem:[#allocation9 + $0xc0] ss:$16 sps:$4 sm:$0xff]  }
 0x18d   :  { %v321_v57 = vpop.f32.mrf.mxu0 }
 0x18e   :  { %v325_v58 = vpack.c.bf16 %v324_v55, %v324_v55  ;;  %v5470_v55 = vld [vmem:[#allocation9 + $0xa4] ss:$16 sps:$4 sm:$0xff]   ;;  %v5468_v57 = vld [vmem:[#allocation9 + $0xa0] ss:$16 sps:$4 sm:$0xff]  }
 0x18f   :  { %v5207_v59 = vpop.f32.mrf.mxu0 }
 0x190   :  { %468 = vmatmul.mubr.bf16.vlgmr.msra.gmra.mxu1 %v325_v58  ;;  %v5471_v58 = vld [vmem:[#allocation9 + $0x2a0] ss:$16 sps:$4 sm:$0xff]   ;;  %v5476_v59 = vld [vmem:[#allocation9 + $0x84] ss:$16 sps:$4 sm:$0xff]  }
 0x191   :  { %929 = vmatpush1.bf16.msra.mxu1 %v5363_v54  ;;  %v5465_v54 = vld [vmem:[#allocation9 + $0x2c0] ss:$16 sps:$4 sm:$0xff]  }
 0x192   :  { %930 = vmatprep.subr.bf16.mxu1 %v5371_v56  ;;  %v5473_v56 = vld [vmem:[#allocation9 + $0x2a4] ss:$16 sps:$4 sm:$0xff]  }
 0x195   :  { %931 = vmatpush1.bf16.msra.mxu1 %v5369_v60  ;;  %v5479_v60 = vld [vmem:[#allocation9 + $0x284] ss:$16 sps:$4 sm:$0xff]  }
 0x196   :  { %932 = vmatprep.subr.bf16.mxu1 %v5377_v61  ;;  %v5474_v61 = vld [vmem:[#allocation9 + $0x80] ss:$16 sps:$4 sm:$0xff]  }
 0x199   :  { %933 = vmatpush1.bf16.msra.mxu1 %v5375_v62  ;;  %v5477_v62 = vld [vmem:[#allocation9 + $0x280] ss:$16 sps:$4 sm:$0xff]  }
 0x19a   :  { %934 = vmatprep.subr.bf16.mxu1 %v5383_v63  ;;  %v5482_v63 = vld [vmem:[#allocation9 + $0x64] ss:$16 sps:$4 sm:$0xff]  }
 0x19d   :  { %935 = vmatpush1.bf16.msra.mxu1 %v5381_v1  ;;  %v5485_v1 = vld [vmem:[#allocation9 + $0x264] ss:$16 sps:$4 sm:$0xff]  }
 0x19e   :  { %936 = vmatprep.subr.bf16.mxu1 %v5389_v2  ;;  %v5480_v2 = vld [vmem:[#allocation9 + $0x60] ss:$16 sps:$4 sm:$0xff]  }
 0x1a1   :  { %937 = vmatpush1.bf16.msra.mxu1 %v5387_v3  ;;  %v5483_v3 = vld [vmem:[#allocation9 + $0x260] ss:$16 sps:$4 sm:$0xff]  }
 0x1a2   :  { %938 = vmatprep.subr.bf16.mxu1 %v5395_v4  ;;  %v5488_v4 = vld [vmem:[#allocation9 + $0x44] ss:$16 sps:$4 sm:$0xff]  }
 0x1a5   :  { %939 = vmatpush1.bf16.msra.mxu1 %v5393_v5  ;;  %v5491_v5 = vld [vmem:[#allocation9 + $0x244] ss:$16 sps:$4 sm:$0xff]  }
 0x1a6   :  { %940 = vmatprep.subr.bf16.mxu1 %v5401_v6  ;;  %v5486_v6 = vld [vmem:[#allocation9 + $0x40] ss:$16 sps:$4 sm:$0xff]  }
 0x1a9   :  { %941 = vmatpush1.bf16.msra.mxu1 %v5399_v7  ;;  %v5489_v7 = vld [vmem:[#allocation9 + $0x240] ss:$16 sps:$4 sm:$0xff]  }
 0x1aa   :  { %942 = vmatprep.subr.bf16.mxu1 %v5407_v8  ;;  %v5494_v8 = vld [vmem:[#allocation9 + $0x24] ss:$16 sps:$4 sm:$0xff]  }
 0x1ad   :  { %943 = vmatpush1.bf16.msra.mxu1 %v5405_v9  ;;  %v5497_v9 = vld [vmem:[#allocation9 + $0x224] ss:$16 sps:$4 sm:$0xff]  }
 0x1ae   :  { %944 = vmatprep.subr.bf16.mxu1 %v5413_v10  ;;  %v5492_v10 = vld [vmem:[#allocation9 + $0x20] ss:$16 sps:$4 sm:$0xff]  }
 0x1b1   :  { %945 = vmatpush2.bf16.msra.mxu1 %v5411_v11  ;;  %v5495_v11 = vld [vmem:[#allocation9 + $0x220] ss:$16 sps:$4 sm:$0xff]  }
 0x1b2   :  { %946 = vmatprep.subr.bf16.mxu1 %v5419_v12  ;;  %v5500_v12 = vld [vmem:[#allocation9 + $0x4] ss:$16 sps:$4 sm:$0xff]  }
 0x1b5   :  { %947 = vmatpush2.bf16.msra.mxu1 %v5417_v13  ;;  %v5503_v13 = vld [vmem:[#allocation9 + $0x204] ss:$16 sps:$4 sm:$0xff]  }
 0x1b6   :  { %948 = vmatprep.subr.bf16.mxu1 %v5425_v14  ;;  %v5498_v14 = vld [vmem:[#allocation9] ss:$16 sps:$4 sm:$0xff]  }
 0x1b9   :  { %949 = vmatpush2.bf16.msra.mxu1 %v5423_v15  ;;  %v5501_v15 = vld [vmem:[#allocation9 + $0x200] ss:$16 sps:$4 sm:$0xff]  }
 0x1ba   :  { %950 = vmatprep.subr.bf16.mxu1 %v5431_v16  ;;  %v5506_v16 = vld [vmem:[#allocation9 + $0x1e4] ss:$16 sps:$4 sm:$0xff]  }
 0x1bd   :  { %951 = vmatpush2.bf16.msra.mxu1 %v5429_v17  ;;  %v5509_v17 = vld [vmem:[#allocation9 + $0x3e4] ss:$16 sps:$4 sm:$0xff]  }
 0x1be   :  { %952 = vmatprep.subr.bf16.mxu1 %v5437_v18  ;;  %v5504_v18 = vld [vmem:[#allocation9 + $0x1e0] ss:$16 sps:$4 sm:$0xff]  }
 0x1c1   :  { %953 = vmatpush2.bf16.msra.mxu1 %v5435_v19  ;;  %v5507_v19 = vld [vmem:[#allocation9 + $0x3e0] ss:$16 sps:$4 sm:$0xff]  }
 0x1c2   :  { %954 = vmatprep.subr.bf16.mxu1 %v5443_v20  ;;  %v5512_v20 = vld [vmem:[#allocation9 + $0x1c4] ss:$16 sps:$4 sm:$0xff]  }
 0x1c5   :  { %955 = vmatpush2.bf16.msra.mxu1 %v5441_v21  ;;  %v5515_v21 = vld [vmem:[#allocation9 + $0x3c4] ss:$16 sps:$4 sm:$0xff]  }
 0x1c6   :  { %956 = vmatprep.subr.bf16.mxu1 %v5449_v23  ;;  %v5513_v23 = vld [vmem:[#allocation9 + $0x3c0] ss:$16 sps:$4 sm:$0xff]  }
 0x1c9   :  { %957 = vmatpush2.bf16.msra.mxu1 %v5447_v25  ;;  %v5521_v25 = vld [vmem:[#allocation9 + $0x3a4] ss:$16 sps:$4 sm:$0xff]  }
 0x1ca   :  { %958 = vmatprep.subr.bf16.mxu1 %v5455_v27  ;;  %v5519_v27 = vld [vmem:[#allocation9 + $0x3a0] ss:$16 sps:$4 sm:$0xff]  }
 0x1cd   :  { %959 = vmatpush2.bf16.msra.mxu1 %v5453_v29  ;;  %v5527_v29 = vld [vmem:[#allocation9 + $0x384] ss:$16 sps:$4 sm:$0xff]  }
 0x1ce   :  { %1809 = vmatprep.subr.bf16.mxu1 %v5461_v31  ;;  %v5525_v31 = vld [vmem:[#allocation9 + $0x380] ss:$16 sps:$4 sm:$0xff]  }
 0x250   :  { %v469_v39 = vpop.f32.mrf.mxu1 }
 0x251   :  { %v470_v40 = vadd.f32 %v469_v39, %v348_v37  ;;  %v5528_v37 = vld [vmem:[#allocation9 + $0x160] ss:$16 sps:$4 sm:$0xff]   ;;  %v5536_v39 = vld [vmem:[#allocation9 + $0x144] ss:$16 sps:$4 sm:$0xff]  }
 0x252   :  { %v471_v41 = vpop.f32.mrf.mxu1 }
 0x253   :  { %v472_v42 = vadd.f32 %v471_v41, %v352_v38  ;;  %v476_v43 = vmax.f32 %v470_v40, 0.0  ;;  %v5531_v38 = vld [vmem:[#allocation9 + $0x360] ss:$16 sps:$4 sm:$0xff]   ;;  %v5539_v40 = vld [vmem:[#allocation9 + $0x344] ss:$16 sps:$4 sm:$0xff]  }
 0x254   :  { %v473_v44 = vpop.f32.mrf.mxu1  ;;  %v5534_v41 = vld [vmem:[#allocation9 + $0x140] ss:$16 sps:$4 sm:$0xff]  }
 0x255   :  { %v477_v45 = vmax.f32 %v472_v42, 0.0  ;;  %v478_v50 = vpack.c.bf16 %v476_v43, %v476_v43  ;;  %v5537_v42 = vld [vmem:[#allocation9 + $0x340] ss:$16 sps:$4 sm:$0xff]   ;;  %v5542_v43 = vld [vmem:[#allocation9 + $0x124] ss:$16 sps:$4 sm:$0xff]  }
 0x256   :  { %v474_v46 = vpop.f32.mrf.mxu1  ;;  %v5545_v44 = vld [vmem:[#allocation9 + $0x324] ss:$16 sps:$4 sm:$0xff]  }
 0x257   :  { %v479_v47 = vpack.c.bf16 %v477_v45, %v477_v45  ;;  %v5540_v45 = vld [vmem:[#allocation9 + $0x120] ss:$16 sps:$4 sm:$0xff]  }
 0x258   :  { %v5543_v46 = vld [vmem:[#allocation9 + $0x320] ss:$16 sps:$4 sm:$0xff]  }
 0x259   :  { %919 = vmatprep.mubr.bf16.mxu0 %v479_v47  ;;  %960 = vmatprep.mubr.bf16.mxu1 %v479_v47  ;;  %v5548_v47 = vld [vmem:[#allocation9 + $0x104] ss:$16 sps:$4 sm:$0xff]  }
 0x25a   :  { %920 = vmatmul.mubr.bf16.vlgmr.msra.gmra.mxu0 %v478_v50  ;;  %961 = vmatmul.mubr.bf16.vlgmr.msra.gmra.mxu1 %v478_v50  ;;  %v5549_v50 = vld [vmem:[#allocation9 + $0x300] ss:$16 sps:$4 sm:$0xff]  }
 0x25b   :  { %1769 = vmatpush1.bf16.msra.mxu0 %v5456_v48  ;;  %1810 = vmatpush1.bf16.msra.mxu1 %v5459_v49  ;;  %v5551_v48 = vld [vmem:[#allocation9 + $0x304] ss:$16 sps:$4 sm:$0xff]   ;;  %v5546_v49 = vld [vmem:[#allocation9 + $0x100] ss:$16 sps:$4 sm:$0xff]  }
 0x25c   :  { %1770 = vmatprep.subr.bf16.mxu0 %v5464_v51  ;;  %1811 = vmatprep.subr.bf16.mxu1 %v5467_v52  ;;  %v5554_v51 = vld [vmem:[#allocation9 + $0xec] ss:$16 sps:$4 sm:$0xff]  }
 0x25d   :  { %v5557_v52 = vld [vmem:[#allocation9 + $0x2ec] ss:$16 sps:$4 sm:$0xff]  }
 0x25f   :  { %1771 = vmatpush1.bf16.msra.mxu0 %v5462_v53  ;;  %1812 = vmatpush1.bf16.msra.mxu1 %v5465_v54  ;;  %v6642_v53 = vsub.s32 2, %v6631_v33  ;;  %v545_v54 = vld [vmem:[#allocation25 + $0x2] ss:$8 sm:$0xf] }
 0x260   :  { %1772 = vmatprep.subr.bf16.mxu0 %v5470_v55  ;;  %1813 = vmatprep.subr.bf16.mxu1 %v5473_v56  ;;  %v6645_v55 = vsub.s32 3, %v6631_v33  ;;  %v550_v56 = vrot.slane %v545_v54, %v6634_v34 }
 0x263   :  { %1773 = vmatpush1.bf16.msra.mxu0 %v5468_v57  ;;  %1814 = vmatpush1.bf16.msra.mxu1 %v5471_v58  ;;  %v558_v57 = vrot.slane %v545_v54, %v6642_v53  ;;  %v554_v58 = vrot.slane %v545_v54, %v6637_v36 }
 0x264   :  { %1774 = vmatprep.subr.bf16.mxu0 %v5476_v59  ;;  %1815 = vmatprep.subr.bf16.mxu1 %v5479_v60  ;;  %v562_v59 = vrot.slane %v545_v54, %v6645_v55  ;;  %v5608_v54 = vld [vmem:[#allocation9 + $0x1cc] ss:$16 sps:$4 sm:$0xff]  }
 0x267   :  { %1775 = vmatpush1.bf16.msra.mxu0 %v5474_v61  ;;  %1816 = vmatpush1.bf16.msra.mxu1 %v5477_v62 }
 0x268   :  { %1776 = vmatprep.subr.bf16.mxu0 %v5482_v63  ;;  %1817 = vmatprep.subr.bf16.mxu1 %v5485_v1 }
 0x26b   :  { %1777 = vmatpush1.bf16.msra.mxu0 %v5480_v2  ;;  %1818 = vmatpush1.bf16.msra.mxu1 %v5483_v3 }
 0x26c   :  { %1778 = vmatprep.subr.bf16.mxu0 %v5488_v4  ;;  %1819 = vmatprep.subr.bf16.mxu1 %v5491_v5 }
 0x26f   :  { %1779 = vmatpush1.bf16.msra.mxu0 %v5486_v6  ;;  %1820 = vmatpush1.bf16.msra.mxu1 %v5489_v7 }
 0x270   :  { %1780 = vmatprep.subr.bf16.mxu0 %v5494_v8  ;;  %1821 = vmatprep.subr.bf16.mxu1 %v5497_v9 }
 0x273   :  { %1781 = vmatpush1.bf16.msra.mxu0 %v5492_v10  ;;  %1822 = vmatpush1.bf16.msra.mxu1 %v5495_v11 }
 0x274   :  { %1782 = vmatprep.subr.bf16.mxu0 %v5500_v12  ;;  %1823 = vmatprep.subr.bf16.mxu1 %v5503_v13 }
 0x277   :  { %1783 = vmatpush1.bf16.msra.mxu0 %v5498_v14  ;;  %1824 = vmatpush1.bf16.msra.mxu1 %v5501_v15  ;;  %v5552_v14 = vld [vmem:[#allocation9 + $0xe8] ss:$16 sps:$4 sm:$0xff]  }
 0x278   :  { %1784 = vmatprep.subr.bf16.mxu0 %v5506_v16  ;;  %1825 = vmatprep.subr.bf16.mxu1 %v5509_v17  ;;  %v5555_v15 = vld [vmem:[#allocation9 + $0x2e8] ss:$16 sps:$4 sm:$0xff]  }
 0x27b   :  { %1785 = vmatpush2.bf16.msra.mxu0 %v5504_v18  ;;  %1826 = vmatpush2.bf16.msra.mxu1 %v5507_v19  ;;  %v5560_v18 = vld [vmem:[#allocation9 + $0xcc] ss:$16 sps:$4 sm:$0xff]  }
 0x27c   :  { %1786 = vmatprep.subr.bf16.mxu0 %v5512_v20  ;;  %1827 = vmatprep.subr.bf16.mxu1 %v5515_v21  ;;  %v5563_v19 = vld [vmem:[#allocation9 + $0x2cc] ss:$16 sps:$4 sm:$0xff]   ;;  %v5558_v20 = vld [vmem:[#allocation9 + $0xc8] ss:$16 sps:$4 sm:$0xff]  }
 0x27d   :  { %v5561_v21 = vld [vmem:[#allocation9 + $0x2c8] ss:$16 sps:$4 sm:$0xff]  }
 0x27f   :  { %1787 = vmatpush2.bf16.msra.mxu0 %v5510_v22  ;;  %1828 = vmatpush2.bf16.msra.mxu1 %v5513_v23  ;;  %v5566_v22 = vld [vmem:[#allocation9 + $0xac] ss:$16 sps:$4 sm:$0xff]  }
 0x280   :  { %1788 = vmatprep.subr.bf16.mxu0 %v5518_v24  ;;  %1829 = vmatprep.subr.bf16.mxu1 %v5521_v25  ;;  %v5569_v23 = vld [vmem:[#allocation9 + $0x2ac] ss:$16 sps:$4 sm:$0xff]   ;;  %v5564_v24 = vld [vmem:[#allocation9 + $0xa8] ss:$16 sps:$4 sm:$0xff]  }
 0x281   :  { %v5567_v25 = vld [vmem:[#allocation9 + $0x2a8] ss:$16 sps:$4 sm:$0xff]  }
 0x283   :  { %1789 = vmatpush2.bf16.msra.mxu0 %v5516_v26  ;;  %1830 = vmatpush2.bf16.msra.mxu1 %v5519_v27  ;;  %v5572_v26 = vld [vmem:[#allocation9 + $0x8c] ss:$16 sps:$4 sm:$0xff]  }
 0x284   :  { %1790 = vmatprep.subr.bf16.mxu0 %v5524_v28  ;;  %1831 = vmatprep.subr.bf16.mxu1 %v5527_v29  ;;  %v5575_v27 = vld [vmem:[#allocation9 + $0x28c] ss:$16 sps:$4 sm:$0xff]   ;;  %v5570_v28 = vld [vmem:[#allocation9 + $0x88] ss:$16 sps:$4 sm:$0xff]  }
 0x285   :  { %v5573_v29 = vld [vmem:[#allocation9 + $0x288] ss:$16 sps:$4 sm:$0xff]  }
 0x287   :  { %1791 = vmatpush2.bf16.msra.mxu0 %v5522_v30  ;;  %1832 = vmatpush2.bf16.msra.mxu1 %v5525_v31  ;;  %v5578_v30 = vld [vmem:[#allocation9 + $0x6c] ss:$16 sps:$4 sm:$0xff]  }
 0x288   :  { %1792 = vmatprep.subr.bf16.mxu0 %v5530_v32  ;;  %1833 = vmatprep.subr.bf16.mxu1 %v5533_v35  ;;  %v5581_v31 = vld [vmem:[#allocation9 + $0x26c] ss:$16 sps:$4 sm:$0xff]   ;;  %v5576_v32 = vld [vmem:[#allocation9 + $0x68] ss:$16 sps:$4 sm:$0xff]  }
 0x289   :  { %v5579_v35 = vld [vmem:[#allocation9 + $0x268] ss:$16 sps:$4 sm:$0xff]  }
 0x28b   :  { %1793 = vmatpush2.bf16.msra.mxu0 %v5528_v37  ;;  %1834 = vmatpush2.bf16.msra.mxu1 %v5531_v38  ;;  %v5584_v37 = vld [vmem:[#allocation9 + $0x4c] ss:$16 sps:$4 sm:$0xff]  }
 0x28c   :  { %1794 = vmatprep.subr.bf16.mxu0 %v5536_v39  ;;  %1835 = vmatprep.subr.bf16.mxu1 %v5539_v40  ;;  %v5587_v38 = vld [vmem:[#allocation9 + $0x24c] ss:$16 sps:$4 sm:$0xff]   ;;  %v5582_v39 = vld [vmem:[#allocation9 + $0x48] ss:$16 sps:$4 sm:$0xff]  }
 0x28d   :  { %v5585_v40 = vld [vmem:[#allocation9 + $0x248] ss:$16 sps:$4 sm:$0xff]  }
 0x28f   :  { %1795 = vmatpush2.bf16.msra.mxu0 %v5534_v41  ;;  %1836 = vmatpush2.bf16.msra.mxu1 %v5537_v42  ;;  %v5590_v41 = vld [vmem:[#allocation9 + $0x2c] ss:$16 sps:$4 sm:$0xff]  }
 0x290   :  { %1796 = vmatprep.subr.bf16.mxu0 %v5542_v43  ;;  %1837 = vmatprep.subr.bf16.mxu1 %v5545_v44  ;;  %v5593_v42 = vld [vmem:[#allocation9 + $0x22c] ss:$16 sps:$4 sm:$0xff]   ;;  %v5588_v43 = vld [vmem:[#allocation9 + $0x28] ss:$16 sps:$4 sm:$0xff]  }
 0x291   :  { %v5591_v44 = vld [vmem:[#allocation9 + $0x228] ss:$16 sps:$4 sm:$0xff]  }
 0x293   :  { %1797 = vmatpush2.bf16.msra.mxu0 %v5540_v45  ;;  %1838 = vmatpush2.bf16.msra.mxu1 %v5543_v46  ;;  %v5596_v45 = vld [vmem:[#allocation9 + $0xc] ss:$16 sps:$4 sm:$0xff]  }
 0x294   :  { %1798 = vmatprep.subr.bf16.mxu0 %v5548_v47  ;;  %1839 = vmatprep.subr.bf16.mxu1 %v5551_v48  ;;  %v5599_v46 = vld [vmem:[#allocation9 + $0x20c] ss:$16 sps:$4 sm:$0xff]   ;;  %v5594_v47 = vld [vmem:[#allocation9 + $0x8] ss:$16 sps:$4 sm:$0xff]  }
 0x295   :  { %v5597_v48 = vld [vmem:[#allocation9 + $0x208] ss:$16 sps:$4 sm:$0xff]  }
 0x297   :  { %1799 = vmatpush2.bf16.msra.mxu0 %v5546_v49  ;;  %1840 = vmatpush2.bf16.msra.mxu1 %v5549_v50  ;;  %v5602_v49 = vld [vmem:[#allocation9 + $0x1ec] ss:$16 sps:$4 sm:$0xff]  }
 0x298   :  { %1850 = vmatprep.subr.bf16.mxu0 %v5554_v51  ;;  %1891 = vmatprep.subr.bf16.mxu1 %v5557_v52  ;;  %v5605_v50 = vld [vmem:[#allocation9 + $0x3ec] ss:$16 sps:$4 sm:$0xff]   ;;  %v5600_v51 = vld [vmem:[#allocation9 + $0x1e8] ss:$16 sps:$4 sm:$0xff]  }
 0x299   :  { %v5603_v52 = vld [vmem:[#allocation9 + $0x3e8] ss:$16 sps:$4 sm:$0xff]  }
 0x31a   :  { %v921_v60 = vpop.f32.mrf.mxu0  ;;  %v962_v61 = vpop.f32.mrf.mxu1 }
 0x31b   :  { %v922_v62 = vadd.f32 %v921_v60, %v550_v56  ;;  %v963_v63 = vadd.f32 %v962_v61, %v558_v57  ;;  %v5611_v56 = vld [vmem:[#allocation9 + $0x3cc] ss:$16 sps:$4 sm:$0xff]   ;;  %v5606_v57 = vld [vmem:[#allocation9 + $0x1c8] ss:$16 sps:$4 sm:$0xff]  }
 0x31c   :  { %v923_v1 = vpop.f32.mrf.mxu0  ;;  %v964_v2 = vpop.f32.mrf.mxu1  ;;  %v5617_v60 = vld [vmem:[#allocation9 + $0x3ac] ss:$16 sps:$4 sm:$0xff]   ;;  %v5612_v61 = vld [vmem:[#allocation9 + $0x1a8] ss:$16 sps:$4 sm:$0xff]  }
 0x31d   :  { %v924_v3 = vadd.f32 %v923_v1, %v554_v58  ;;  %v965_v4 = vadd.f32 %v964_v2, %v562_v59  ;;  %v6651_v5 = vmax.f32 %v922_v62, 0.0  ;;  %v6653_v33 = vmax.f32 %v963_v63, 0.0  ;;  %v5609_v58 = vld [vmem:[#allocation9 + $0x3c8] ss:$16 sps:$4 sm:$0xff]   ;;  %v5614_v59 = vld [vmem:[#allocation9 + $0x1ac] ss:$16 sps:$4 sm:$0xff]  }
 0x31e   :  { %v925_v6 = vpop.f32.mrf.mxu0  ;;  %v966_v7 = vpop.f32.mrf.mxu1  ;;  %v5615_v62 = vld [vmem:[#allocation9 + $0x3a8] ss:$16 sps:$4 sm:$0xff]   ;;  %v5620_v63 = vld [vmem:[#allocation9 + $0x18c] ss:$16 sps:$4 sm:$0xff]  }
 0x31f   :  { %v6655_v8 = vmax.f32 %v924_v3, 0.0  ;;  %v6657_v9 = vmax.f32 %v965_v4, 0.0  ;;  %v6665_v16 = vpack.c.bf16 %v6651_v5, %v6651_v5  ;;  %v6669_v17 = vpack.c.bf16 %v6653_v33, %v6653_v33  ;;  %v5623_v1 = vld [vmem:[#allocation9 + $0x38c] ss:$16 sps:$4 sm:$0xff]   ;;  %v5618_v2 = vld [vmem:[#allocation9 + $0x188] ss:$16 sps:$4 sm:$0xff]  }
 0x320   :  { %v926_v10 = vpop.f32.mrf.mxu0  ;;  %v967_v11 = vpop.f32.mrf.mxu1  ;;  %v5621_v3 = vld [vmem:[#allocation9 + $0x388] ss:$16 sps:$4 sm:$0xff]   ;;  %v5626_v4 = vld [vmem:[#allocation9 + $0x16c] ss:$16 sps:$4 sm:$0xff]  }
 0x321   :  { %v974_v12 = vpack.c.bf16 %v6655_v8, %v6655_v8  ;;  %v976_v13 = vpack.c.bf16 %v6657_v9, %v6657_v9  ;;  %v5629_v6 = vld [vmem:[#allocation9 + $0x36c] ss:$16 sps:$4 sm:$0xff]   ;;  %v5624_v7 = vld [vmem:[#allocation9 + $0x168] ss:$16 sps:$4 sm:$0xff]  }
 0x322   :  { %v5627_v10 = vld [vmem:[#allocation9 + $0x368] ss:$16 sps:$4 sm:$0xff]   ;;  %v5632_v11 = vld [vmem:[#allocation9 + $0x14c] ss:$16 sps:$4 sm:$0xff]  }
 0x323   :  { %1800 = vmatprep.mubr.bf16.mxu0 %v974_v12  ;;  %1841 = vmatprep.mubr.bf16.mxu1 %v976_v13 }
 0x324   :  { %1801 = vmatmul.mubr.bf16.vlgmr.msra.gmra.mxu0 %v6665_v16  ;;  %1842 = vmatmul.mubr.bf16.vlgmr.msra.gmra.mxu1 %v6669_v17 }
 0x325   :  { %1851 = vmatpush1.bf16.msra.mxu0 %v5552_v14  ;;  %1892 = vmatpush1.bf16.msra.mxu1 %v5555_v15  ;;  %v5633_v14 = vld [vmem:[#allocation9 + $0x348] ss:$16 sps:$4 sm:$0xff]   ;;  %v5638_v15 = vld [vmem:[#allocation9 + $0x12c] ss:$16 sps:$4 sm:$0xff]  }
 0x326   :  { %1882 = vmatprep.mubr.bf16.mxu0 %v974_v12  ;;  %1923 = vmatprep.mubr.bf16.mxu1 %v976_v13  ;;  %v5635_v12 = vld [vmem:[#allocation9 + $0x34c] ss:$16 sps:$4 sm:$0xff]   ;;  %v5630_v13 = vld [vmem:[#allocation9 + $0x148] ss:$16 sps:$4 sm:$0xff]  }
 0x327   :  { %1852 = vmatprep.subr.bf16.mxu0 %v5560_v18  ;;  %1893 = vmatprep.subr.bf16.mxu1 %v5563_v19  ;;  %v5641_v18 = vld [vmem:[#allocation9 + $0x32c] ss:$16 sps:$4 sm:$0xff]   ;;  %v5636_v19 = vld [vmem:[#allocation9 + $0x128] ss:$16 sps:$4 sm:$0xff]  }
 0x329   :  { %1853 = vmatpush1.bf16.msra.mxu0 %v5558_v20  ;;  %1894 = vmatpush1.bf16.msra.mxu1 %v5561_v21  ;;  %v5639_v20 = vld [vmem:[#allocation9 + $0x328] ss:$16 sps:$4 sm:$0xff]   ;;  %v5644_v21 = vld [vmem:[#allocation9 + $0x10c] ss:$16 sps:$4 sm:$0xff]  }
 0x32a   :  { %1854 = vmatprep.subr.bf16.mxu0 %v5566_v22  ;;  %1895 = vmatprep.subr.bf16.mxu1 %v5569_v23  ;;  %v5647_v22 = vld [vmem:[#allocation9 + $0x30c] ss:$16 sps:$4 sm:$0xff]   ;;  %v5642_v23 = vld [vmem:[#allocation9 + $0x108] ss:$16 sps:$4 sm:$0xff]  }
 0x32d   :  { %1855 = vmatpush1.bf16.msra.mxu0 %v5564_v24  ;;  %1896 = vmatpush1.bf16.msra.mxu1 %v5567_v25  ;;  %v5645_v24 = vld [vmem:[#allocation9 + $0x308] ss:$16 sps:$4 sm:$0xff]   ;;  %v5650_v25 = vld [vmem:[#allocation10 + $0xe4] ss:$16 sps:$4 sm:$0xff]  }
 0x32e   :  { %1856 = vmatprep.subr.bf16.mxu0 %v5572_v26  ;;  %1897 = vmatprep.subr.bf16.mxu1 %v5575_v27  ;;  %v5648_v26 = vld [vmem:[#allocation10 + $0xe0] ss:$16 sps:$4 sm:$0xff]   ;;  %v5653_v27 = vld [vmem:[#allocation10 + $0xc4] ss:$16 sps:$4 sm:$0xff]  }
 0x331   :  { %1857 = vmatpush1.bf16.msra.mxu0 %v5570_v28  ;;  %1898 = vmatpush1.bf16.msra.mxu1 %v5573_v29  ;;  %v5651_v28 = vld [vmem:[#allocation10 + $0xc0] ss:$16 sps:$4 sm:$0xff]   ;;  %v5656_v29 = vld [vmem:[#allocation10 + $0xa4] ss:$16 sps:$4 sm:$0xff]  }
 0x332   :  { %1858 = vmatprep.subr.bf16.mxu0 %v5578_v30  ;;  %1899 = vmatprep.subr.bf16.mxu1 %v5581_v31  ;;  %v5654_v30 = vld [vmem:[#allocation10 + $0xa0] ss:$16 sps:$4 sm:$0xff]   ;;  %v5659_v31 = vld [vmem:[#allocation10 + $0x84] ss:$16 sps:$4 sm:$0xff]  }
 0x335   :  { %1859 = vmatpush1.bf16.msra.mxu0 %v5576_v32  ;;  %1900 = vmatpush1.bf16.msra.mxu1 %v5579_v35  ;;  %v5657_v32 = vld [vmem:[#allocation10 + $0x80] ss:$16 sps:$4 sm:$0xff]  }
 0x336   :  { %1860 = vmatprep.subr.bf16.mxu0 %v5584_v37  ;;  %1901 = vmatprep.subr.bf16.mxu1 %v5587_v38  ;;  %v5696_v35 = vld [vmem:[#allocation10 + $0x2e0] ss:$16 sps:$4 sm:$0xff]   ;;  %v5698_v37 = vld [vmem:[#allocation10 + $0x2e4] ss:$16 sps:$4 sm:$0xff]  }
 0x337   :  { %v5662_v38 = vld [vmem:[#allocation10 + $0x64] ss:$16 sps:$4 sm:$0xff]  }
 0x339   :  { %1861 = vmatpush1.bf16.msra.mxu0 %v5582_v39  ;;  %1902 = vmatpush1.bf16.msra.mxu1 %v5585_v40  ;;  %v5702_v39 = vld [vmem:[#allocation10 + $0x2c0] ss:$16 sps:$4 sm:$0xff]   ;;  %v5665_v40 = vld [vmem:[#allocation10 + $0x44] ss:$16 sps:$4 sm:$0xff]  }
 0x33a   :  { %1862 = vmatprep.subr.bf16.mxu0 %v5590_v41  ;;  %1903 = vmatprep.subr.bf16.mxu1 %v5593_v42  ;;  %v5663_v41 = vld [vmem:[#allocation10 + $0x40] ss:$16 sps:$4 sm:$0xff]  }
 0x33b   :  { %v5708_v42 = vld [vmem:[#allocation10 + $0x2a0] ss:$16 sps:$4 sm:$0xff]  }
 0x33d   :  { %1863 = vmatpush1.bf16.msra.mxu0 %v5588_v43  ;;  %1904 = vmatpush1.bf16.msra.mxu1 %v5591_v44  ;;  %v5710_v43 = vld [vmem:[#allocation10 + $0x2a4] ss:$16 sps:$4 sm:$0xff]  }
 0x33e   :  { %1864 = vmatprep.subr.bf16.mxu0 %v5596_v45  ;;  %1905 = vmatprep.subr.bf16.mxu1 %v5599_v46  ;;  %v5668_v44 = vld [vmem:[#allocation10 + $0x24] ss:$16 sps:$4 sm:$0xff]   ;;  %v5666_v45 = vld [vmem:[#allocation10 + $0x20] ss:$16 sps:$4 sm:$0xff]  }
 0x33f   :  { %v5714_v46 = vld [vmem:[#allocation10 + $0x280] ss:$16 sps:$4 sm:$0xff]  }
 0x341   :  { %1865 = vmatpush1.bf16.msra.mxu0 %v5594_v47  ;;  %1906 = vmatpush1.bf16.msra.mxu1 %v5597_v48  ;;  %v5716_v47 = vld [vmem:[#allocation10 + $0x284] ss:$16 sps:$4 sm:$0xff]  }
 0x342   :  { %1866 = vmatprep.subr.bf16.mxu0 %v5602_v49  ;;  %1907 = vmatprep.subr.bf16.mxu1 %v5605_v50  ;;  %v5671_v48 = vld [vmem:[#allocation10 + $0x4] ss:$16 sps:$4 sm:$0xff]   ;;  %v5669_v49 = vld [vmem:[#allocation10] ss:$16 sps:$4 sm:$0xff]  }
 0x343   :  { %v5720_v50 = vld [vmem:[#allocation10 + $0x260] ss:$16 sps:$4 sm:$0xff]  }
 0x345   :  { %1867 = vmatpush2.bf16.msra.mxu0 %v5600_v51  ;;  %1908 = vmatpush2.bf16.msra.mxu1 %v5603_v52  ;;  %v5722_v51 = vld [vmem:[#allocation10 + $0x264] ss:$16 sps:$4 sm:$0xff]  }
 0x346   :  { %1868 = vmatprep.subr.bf16.mxu0 %v5608_v54  ;;  %1909 = vmatprep.subr.bf16.mxu1 %v5611_v56  ;;  %v5674_v52 = vld [vmem:[#allocation10 + $0x1e4] ss:$16 sps:$4 sm:$0xff]   ;;  %v5672_v54 = vld [vmem:[#allocation10 + $0x1e0] ss:$16 sps:$4 sm:$0xff]  }
 0x347   :  { %v5726_v56 = vld [vmem:[#allocation10 + $0x240] ss:$16 sps:$4 sm:$0xff]  }
 0x349   :  { %1869 = vmatpush2.bf16.msra.mxu0 %v5606_v57  ;;  %1910 = vmatpush2.bf16.msra.mxu1 %v5609_v58  ;;  %v5728_v57 = vld [vmem:[#allocation10 + $0x244] ss:$16 sps:$4 sm:$0xff]  }
 0x34a   :  { %1870 = vmatprep.subr.bf16.mxu0 %v5614_v59  ;;  %1911 = vmatprep.subr.bf16.mxu1 %v5617_v60  ;;  %v5677_v58 = vld [vmem:[#allocation10 + $0x1c4] ss:$16 sps:$4 sm:$0xff]   ;;  %v5675_v59 = vld [vmem:[#allocation10 + $0x1c0] ss:$16 sps:$4 sm:$0xff]  }
 0x34b   :  { %v5732_v60 = vld [vmem:[#allocation10 + $0x220] ss:$16 sps:$4 sm:$0xff]  }
 0x34d   :  { %1871 = vmatpush2.bf16.msra.mxu0 %v5612_v61  ;;  %1912 = vmatpush2.bf16.msra.mxu1 %v5615_v62  ;;  %v5734_v61 = vld [vmem:[#allocation10 + $0x224] ss:$16 sps:$4 sm:$0xff]  }
 0x34e   :  { %1872 = vmatprep.subr.bf16.mxu0 %v5620_v63  ;;  %1913 = vmatprep.subr.bf16.mxu1 %v5623_v1  ;;  %v5680_v62 = vld [vmem:[#allocation10 + $0x1a4] ss:$16 sps:$4 sm:$0xff]   ;;  %v5678_v63 = vld [vmem:[#allocation10 + $0x1a0] ss:$16 sps:$4 sm:$0xff]  }
 0x34f   :  { %v5738_v1 = vld [vmem:[#allocation10 + $0x200] ss:$16 sps:$4 sm:$0xff]  }
 0x351   :  { %1873 = vmatpush2.bf16.msra.mxu0 %v5618_v2  ;;  %1914 = vmatpush2.bf16.msra.mxu1 %v5621_v3  ;;  %v5740_v2 = vld [vmem:[#allocation10 + $0x204] ss:$16 sps:$4 sm:$0xff]  }
 0x352   :  { %1874 = vmatprep.subr.bf16.mxu0 %v5626_v4  ;;  %1915 = vmatprep.subr.bf16.mxu1 %v5629_v6  ;;  %v5683_v3 = vld [vmem:[#allocation10 + $0x184] ss:$16 sps:$4 sm:$0xff]   ;;  %v5681_v4 = vld [vmem:[#allocation10 + $0x180] ss:$16 sps:$4 sm:$0xff]  }
 0x353   :  { %v5744_v6 = vld [vmem:[#allocation10 + $0x3e0] ss:$16 sps:$4 sm:$0xff]  }
 0x355   :  { %1875 = vmatpush2.bf16.msra.mxu0 %v5624_v7  ;;  %1916 = vmatpush2.bf16.msra.mxu1 %v5627_v10  ;;  %v5746_v7 = vld [vmem:[#allocation10 + $0x3e4] ss:$16 sps:$4 sm:$0xff]  }
 0x356   :  { %1876 = vmatprep.subr.bf16.mxu0 %v5632_v11  ;;  %1917 = vmatprep.subr.bf16.mxu1 %v5635_v12  ;;  %v5686_v10 = vld [vmem:[#allocation10 + $0x164] ss:$16 sps:$4 sm:$0xff]   ;;  %v5684_v11 = vld [vmem:[#allocation10 + $0x160] ss:$16 sps:$4 sm:$0xff]  }
 0x357   :  { %v5750_v12 = vld [vmem:[#allocation10 + $0x3c0] ss:$16 sps:$4 sm:$0xff]  }
 0x359   :  { %1877 = vmatpush2.bf16.msra.mxu0 %v5630_v13  ;;  %1918 = vmatpush2.bf16.msra.mxu1 %v5633_v14  ;;  %v5752_v13 = vld [vmem:[#allocation10 + $0x3c4] ss:$16 sps:$4 sm:$0xff]  }
 0x35a   :  { %1878 = vmatprep.subr.bf16.mxu0 %v5638_v15  ;;  %1919 = vmatprep.subr.bf16.mxu1 %v5641_v18  ;;  %v5689_v14 = vld [vmem:[#allocation10 + $0x144] ss:$16 sps:$4 sm:$0xff]   ;;  %v5687_v15 = vld [vmem:[#allocation10 + $0x140] ss:$16 sps:$4 sm:$0xff]  }
 0x35b   :  { %v5756_v18 = vld [vmem:[#allocation10 + $0x3a0] ss:$16 sps:$4 sm:$0xff]  }
 0x35d   :  { %1879 = vmatpush2.bf16.msra.mxu0 %v5636_v19  ;;  %1920 = vmatpush2.bf16.msra.mxu1 %v5639_v20  ;;  %v5758_v19 = vld [vmem:[#allocation10 + $0x3a4] ss:$16 sps:$4 sm:$0xff]  }
 0x35e   :  { %1880 = vmatprep.subr.bf16.mxu0 %v5644_v21  ;;  %1921 = vmatprep.subr.bf16.mxu1 %v5647_v22  ;;  %v5692_v20 = vld [vmem:[#allocation10 + $0x124] ss:$16 sps:$4 sm:$0xff]   ;;  %v5690_v21 = vld [vmem:[#allocation10 + $0x120] ss:$16 sps:$4 sm:$0xff]  }
 0x35f   :  { %v5762_v22 = vld [vmem:[#allocation10 + $0x380] ss:$16 sps:$4 sm:$0xff]  }
 0x361   :  { %1881 = vmatpush2.bf16.msra.mxu0 %v5642_v23  ;;  %1922 = vmatpush2.bf16.msra.mxu1 %v5645_v24  ;;  %v5764_v23 = vld [vmem:[#allocation10 + $0x384] ss:$16 sps:$4 sm:$0xff]  }
 0x362   :  { %2731 = vmatprep.subr.bf16.mxu0 %v5650_v25  ;;  %2772 = vmatprep.subr.bf16.mxu1 %v5698_v37  ;;  %v5695_v24 = vld [vmem:[#allocation10 + $0x104] ss:$16 sps:$4 sm:$0xff]   ;;  %v5693_v25 = vld [vmem:[#allocation10 + $0x100] ss:$16 sps:$4 sm:$0xff]  }
 0x363   :  { %v5786_v37 = vld [vmem:[#allocation10 + $0x300] ss:$16 sps:$4 sm:$0xff]  }
 0x364   :  { %1883 = vmatmul.mubr.bf16.vlgmr.msra.gmra.mxu0 %v6665_v16  ;;  %1924 = vmatmul.mubr.bf16.vlgmr.msra.gmra.mxu1 %v6669_v17  ;;  %v5660_v16 = vld [vmem:[#allocation10 + $0x60] ss:$16 sps:$4 sm:$0xff]   ;;  %v5704_v17 = vld [vmem:[#allocation10 + $0x2c4] ss:$16 sps:$4 sm:$0xff]  }
 0x365   :  { %2732 = vmatpush1.bf16.msra.mxu0 %v5648_v26  ;;  %2773 = vmatpush1.bf16.msra.mxu1 %v5696_v35  ;;  %v5768_v26 = vld [vmem:[#allocation10 + $0x360] ss:$16 sps:$4 sm:$0xff]   ;;  %v5788_v35 = vld [vmem:[#allocation10 + $0x304] ss:$16 sps:$4 sm:$0xff]  }
 0x366   :  { %2733 = vmatprep.subr.bf16.mxu0 %v5653_v27  ;;  %2774 = vmatprep.subr.bf16.mxu1 %v5704_v17  ;;  %v5770_v27 = vld [vmem:[#allocation10 + $0x364] ss:$16 sps:$4 sm:$0xff]  }
 0x369   :  { %2734 = vmatpush1.bf16.msra.mxu0 %v5651_v28  ;;  %2775 = vmatpush1.bf16.msra.mxu1 %v5702_v39  ;;  %v5701_v28 = vld [vmem:[#allocation10 + $0xec] ss:$16 sps:$4 sm:$0xff]  }
 0x36a   :  { %2735 = vmatprep.subr.bf16.mxu0 %v5656_v29  ;;  %2776 = vmatprep.subr.bf16.mxu1 %v5710_v43  ;;  %v5774_v29 = vld [vmem:[#allocation10 + $0x340] ss:$16 sps:$4 sm:$0xff]  }
 0x36d   :  { %2736 = vmatpush1.bf16.msra.mxu0 %v5654_v30  ;;  %2777 = vmatpush1.bf16.msra.mxu1 %v5708_v42  ;;  %v5776_v30 = vld [vmem:[#allocation10 + $0x344] ss:$16 sps:$4 sm:$0xff]  }
 0x36e   :  { %2737 = vmatprep.subr.bf16.mxu0 %v5659_v31  ;;  %2778 = vmatprep.subr.bf16.mxu1 %v5716_v47  ;;  %v5782_v31 = vld [vmem:[#allocation10 + $0x324] ss:$16 sps:$4 sm:$0xff]  }
 0x371   :  { %2738 = vmatpush1.bf16.msra.mxu0 %v5657_v32  ;;  %2779 = vmatpush1.bf16.msra.mxu1 %v5714_v46  ;;  %v5780_v32 = vld [vmem:[#allocation10 + $0x320] ss:$16 sps:$4 sm:$0xff]  }
 0x372   :  { %2739 = vmatprep.subr.bf16.mxu0 %v5662_v38  ;;  %2780 = vmatprep.subr.bf16.mxu1 %v5722_v51  ;;  %v5794_v38 = vld [vmem:[#allocation10 + $0x2ec] ss:$16 sps:$4 sm:$0xff]  }
 0x375   :  { %2740 = vmatpush1.bf16.msra.mxu0 %v5660_v16  ;;  %2781 = vmatpush1.bf16.msra.mxu1 %v5720_v50  ;;  %v6675_v16 = vld [vmem:[#allocation25 + $0x3] ss:$8 sm:$0xf] }
 0x376   :  { %2741 = vmatprep.subr.bf16.mxu0 %v5665_v40  ;;  %2782 = vmatprep.subr.bf16.mxu1 %v5728_v57  ;;  %v1111_v39 = vrot.slane %v6675_v16, %v6634_v34  ;;  %v1115_v17 = vrot.slane %v6675_v16, %v6637_v36  ;;  %v5699_v57 = vld [vmem:[#allocation10 + $0xe8] ss:$16 sps:$4 sm:$0xff]  }
 0x379   :  { %2742 = vmatpush1.bf16.msra.mxu0 %v5663_v41  ;;  %2783 = vmatpush1.bf16.msra.mxu1 %v5726_v56 }
 0x37a   :  { %2743 = vmatprep.subr.bf16.mxu0 %v5668_v44  ;;  %2784 = vmatprep.subr.bf16.mxu1 %v5734_v61  ;;  %v5713_v61 = vld [vmem:[#allocation10 + $0xac] ss:$16 sps:$4 sm:$0xff]  }
 0x37d   :  { %2744 = vmatpush1.bf16.msra.mxu0 %v5666_v45  ;;  %2785 = vmatpush1.bf16.msra.mxu1 %v5732_v60  ;;  %v5705_v60 = vld [vmem:[#allocation10 + $0xc8] ss:$16 sps:$4 sm:$0xff]  }
 0x37e   :  { %2745 = vmatprep.subr.bf16.mxu0 %v5671_v48  ;;  %2786 = vmatprep.subr.bf16.mxu1 %v5740_v2  ;;  %v5725_v2 = vld [vmem:[#allocation10 + $0x6c] ss:$16 sps:$4 sm:$0xff]  }
 0x381   :  { %2746 = vmatpush1.bf16.msra.mxu0 %v5669_v49  ;;  %2787 = vmatpush1.bf16.msra.mxu1 %v5738_v1  ;;  %v5717_v1 = vld [vmem:[#allocation10 + $0x88] ss:$16 sps:$4 sm:$0xff]  }
 0x382   :  { %2747 = vmatprep.subr.bf16.mxu0 %v5674_v52  ;;  %2788 = vmatprep.subr.bf16.mxu1 %v5746_v7  ;;  %v5737_v7 = vld [vmem:[#allocation10 + $0x2c] ss:$16 sps:$4 sm:$0xff]  }
 0x385   :  { %2748 = vmatpush2.bf16.msra.mxu0 %v5672_v54  ;;  %2789 = vmatpush2.bf16.msra.mxu1 %v5744_v6  ;;  %v5729_v6 = vld [vmem:[#allocation10 + $0x48] ss:$16 sps:$4 sm:$0xff]  }
 0x386   :  { %2749 = vmatprep.subr.bf16.mxu0 %v5677_v58  ;;  %2790 = vmatprep.subr.bf16.mxu1 %v5752_v13  ;;  %v5749_v13 = vld [vmem:[#allocation10 + $0x1ec] ss:$16 sps:$4 sm:$0xff]  }
 0x389   :  { %2750 = vmatpush2.bf16.msra.mxu0 %v5675_v59  ;;  %2791 = vmatpush2.bf16.msra.mxu1 %v5750_v12  ;;  %v5707_v59 = vld [vmem:[#allocation10 + $0xcc] ss:$16 sps:$4 sm:$0xff]   ;;  %v5741_v12 = vld [vmem:[#allocation10 + $0x8] ss:$16 sps:$4 sm:$0xff]  }
 0x38a   :  { %2751 = vmatprep.subr.bf16.mxu0 %v5680_v62  ;;  %2792 = vmatprep.subr.bf16.mxu1 %v5758_v19  ;;  %v5711_v62 = vld [vmem:[#allocation10 + $0xa8] ss:$16 sps:$4 sm:$0xff]   ;;  %v5761_v19 = vld [vmem:[#allocation10 + $0x1ac] ss:$16 sps:$4 sm:$0xff]  }
 0x38d   :  { %2752 = vmatpush2.bf16.msra.mxu0 %v5678_v63  ;;  %2793 = vmatpush2.bf16.msra.mxu1 %v5756_v18  ;;  %v5719_v63 = vld [vmem:[#allocation10 + $0x8c] ss:$16 sps:$4 sm:$0xff]   ;;  %v5753_v18 = vld [vmem:[#allocation10 + $0x1c8] ss:$16 sps:$4 sm:$0xff]  }
 0x38e   :  { %2753 = vmatprep.subr.bf16.mxu0 %v5683_v3  ;;  %2794 = vmatprep.subr.bf16.mxu1 %v5764_v23  ;;  %v5723_v3 = vld [vmem:[#allocation10 + $0x68] ss:$16 sps:$4 sm:$0xff]   ;;  %v5773_v23 = vld [vmem:[#allocation10 + $0x16c] ss:$16 sps:$4 sm:$0xff]  }
 0x391   :  { %2754 = vmatpush2.bf16.msra.mxu0 %v5681_v4  ;;  %2795 = vmatpush2.bf16.msra.mxu1 %v5762_v22  ;;  %v5731_v4 = vld [vmem:[#allocation10 + $0x4c] ss:$16 sps:$4 sm:$0xff]   ;;  %v5765_v22 = vld [vmem:[#allocation10 + $0x188] ss:$16 sps:$4 sm:$0xff]  }
 0x392   :  { %2755 = vmatprep.subr.bf16.mxu0 %v5686_v10  ;;  %2796 = vmatprep.subr.bf16.mxu1 %v5770_v27  ;;  %v5735_v10 = vld [vmem:[#allocation10 + $0x28] ss:$16 sps:$4 sm:$0xff]  }
 0x393   :  { %v5777_v27 = vld [vmem:[#allocation10 + $0x148] ss:$16 sps:$4 sm:$0xff]  }
 0x395   :  { %2756 = vmatpush2.bf16.msra.mxu0 %v5684_v11  ;;  %2797 = vmatpush2.bf16.msra.mxu1 %v5768_v26  ;;  %v5743_v11 = vld [vmem:[#allocation10 + $0xc] ss:$16 sps:$4 sm:$0xff]   ;;  %v1119_v26 = vrot.slane %v6675_v16, %v6642_v53 }
 0x396   :  { %2757 = vmatprep.subr.bf16.mxu0 %v5689_v14  ;;  %2798 = vmatprep.subr.bf16.mxu1 %v5776_v30  ;;  %v5747_v14 = vld [vmem:[#allocation10 + $0x1e8] ss:$16 sps:$4 sm:$0xff]  }
 0x399   :  { %2758 = vmatpush2.bf16.msra.mxu0 %v5687_v15  ;;  %2799 = vmatpush2.bf16.msra.mxu1 %v5774_v29  ;;  %v5755_v15 = vld [vmem:[#allocation10 + $0x1cc] ss:$16 sps:$4 sm:$0xff]   ;;  %v1123_v29 = vrot.slane %v6675_v16, %v6645_v55 }
 0x39a   :  { %2759 = vmatprep.subr.bf16.mxu0 %v5692_v20  ;;  %2800 = vmatprep.subr.bf16.mxu1 %v5782_v31  ;;  %v5759_v20 = vld [vmem:[#allocation10 + $0x1a8] ss:$16 sps:$4 sm:$0xff]  }
 0x39d   :  { %2760 = vmatpush2.bf16.msra.mxu0 %v5690_v21  ;;  %2801 = vmatpush2.bf16.msra.mxu1 %v5780_v32  ;;  %v5767_v21 = vld [vmem:[#allocation10 + $0x18c] ss:$16 sps:$4 sm:$0xff]  }
 0x39e   :  { %2761 = vmatprep.subr.bf16.mxu0 %v5695_v24  ;;  %2802 = vmatprep.subr.bf16.mxu1 %v5788_v35  ;;  %v5771_v24 = vld [vmem:[#allocation10 + $0x168] ss:$16 sps:$4 sm:$0xff]  }
 0x39f   :  { %v5783_v35 = vld [vmem:[#allocation10 + $0x128] ss:$16 sps:$4 sm:$0xff]  }
 0x3a1   :  { %2762 = vmatpush2.bf16.msra.mxu0 %v5693_v25  ;;  %2803 = vmatpush2.bf16.msra.mxu1 %v5786_v37  ;;  %v5779_v25 = vld [vmem:[#allocation10 + $0x14c] ss:$16 sps:$4 sm:$0xff]  }
 0x3a2   :  { %2813 = vmatprep.subr.bf16.mxu0 %v5701_v28  ;;  %2854 = vmatprep.subr.bf16.mxu1 %v5794_v38  ;;  %v5785_v28 = vld [vmem:[#allocation10 + $0x12c] ss:$16 sps:$4 sm:$0xff]  }
 0x3e4   :  { %v1802_v40 = vpop.f32.mrf.mxu0  ;;  %v1843_v41 = vpop.f32.mrf.mxu1 }
 0x3e5   :  { %v1803_v42 = vadd.f32 %v1802_v40, %v1111_v39  ;;  %v5791_v39 = vld [vmem:[#allocation10 + $0x10c] ss:$16 sps:$4 sm:$0xff]  }
 0x3e6   :  { %v1804_v43 = vpop.f32.mrf.mxu0  ;;  %v1845_v44 = vpop.f32.mrf.mxu1 }
 0x3e7   :  { %v1844_v45 = vadd.f32 %v1843_v41, %v1803_v42  ;;  %v1805_v46 = vadd.f32 %v1804_v43, %v1115_v17 }
 0x3e8   :  { %v1806_v47 = vpop.f32.mrf.mxu0  ;;  %v1847_v48 = vpop.f32.mrf.mxu1 }
 0x3e9   :  { %v1846_v49 = vadd.f32 %v1845_v44, %v1805_v46  ;;  %v1932_v50 = vmax.f32 %v1844_v45, 0.0  ;;  %v5789_v44 = vld [vmem:[#allocation10 + $0x108] ss:$16 sps:$4 sm:$0xff]  }
 0x3ea   :  { %v1807_v51 = vpop.f32.mrf.mxu0  ;;  %v1848_v52 = vpop.f32.mrf.mxu1 }
 0x3eb   :  { %v1933_v54 = vmax.f32 %v1846_v49, 0.0  ;;  %v6681_v58 = vpack.c.bf16 %v1932_v50, %v1932_v50  ;;  %v5792_v49 = vld [vmem:[#allocation10 + $0x2e8] ss:$16 sps:$4 sm:$0xff]   ;;  %v5797_v51 = vld [vmem:[#allocation10 + $0x2cc] ss:$16 sps:$4 sm:$0xff]  }
 0x3ec   :  { %v5795_v52 = vld [vmem:[#allocation10 + $0x2c8] ss:$16 sps:$4 sm:$0xff]  }
 0x3ed   :  { %v1937_v56 = vpack.c.bf16 %v1933_v54, %v1933_v54  ;;  %v5800_v54 = vld [vmem:[#allocation10 + $0x2ac] ss:$16 sps:$4 sm:$0xff]  }
 0x3ef   :  { %2763 = vmatprep.mubr.bf16.mxu0 %v1937_v56 }
 0x3f0   :  { %2764 = vmatmul.mubr.bf16.vlgmr.msra.gmra.mxu0 %v6681_v58 }
 0x3f1   :  { %2814 = vmatpush1.bf16.msra.mxu0 %v5699_v57  ;;  %2845 = vmatprep.mubr.bf16.mxu0 %v1937_v56  ;;  %v5798_v56 = vld [vmem:[#allocation10 + $0x2a8] ss:$16 sps:$4 sm:$0xff]   ;;  %v5803_v57 = vld [vmem:[#allocation10 + $0x28c] ss:$16 sps:$4 sm:$0xff]  }
 0x3f2   :  { %2815 = vmatprep.subr.bf16.mxu0 %v5707_v59  ;;  %v5840_v59 = vld [vmem:[#allocation12 + $0x70] ss:$8 sps:$4 sm:$0xff]  }
 0x3f5   :  { %2816 = vmatpush1.bf16.msra.mxu0 %v5705_v60  ;;  %v5842_v60 = vld [vmem:[#allocation12 + $0x74] ss:$8 sps:$4 sm:$0xff]  }
 0x3f6   :  { %2817 = vmatprep.subr.bf16.mxu0 %v5713_v61  ;;  %v5845_v61 = vld [vmem:[#allocation12 + $0x64] ss:$8 sps:$4 sm:$0xff]  }
 0x3f9   :  { %2818 = vmatpush1.bf16.msra.mxu0 %v5711_v62  ;;  %v5801_v62 = vld [vmem:[#allocation10 + $0x288] ss:$16 sps:$4 sm:$0xff]  }
 0x3fa   :  { %2819 = vmatprep.subr.bf16.mxu0 %v5719_v63  ;;  %v5843_v63 = vld [vmem:[#allocation12 + $0x60] ss:$8 sps:$4 sm:$0xff]  }
 0x3fd   :  { %2820 = vmatpush1.bf16.msra.mxu0 %v5717_v1  ;;  %v5806_v1 = vld [vmem:[#allocation10 + $0x26c] ss:$16 sps:$4 sm:$0xff]  }
 0x3fe   :  { %2821 = vmatprep.subr.bf16.mxu0 %v5725_v2  ;;  %v5804_v2 = vld [vmem:[#allocation10 + $0x268] ss:$16 sps:$4 sm:$0xff]  }
 0x401   :  { %2822 = vmatpush1.bf16.msra.mxu0 %v5723_v3  ;;  %v5846_v3 = vld [vmem:[#allocation12 + $0x50] ss:$8 sps:$4 sm:$0xff]  }
 0x402   :  { %2823 = vmatprep.subr.bf16.mxu0 %v5731_v4  ;;  %v5809_v4 = vld [vmem:[#allocation10 + $0x24c] ss:$16 sps:$4 sm:$0xff]  }
 0x405   :  { %2824 = vmatpush1.bf16.msra.mxu0 %v5729_v6  ;;  %v5851_v6 = vld [vmem:[#allocation12 + $0x44] ss:$8 sps:$4 sm:$0xff]  }
 0x406   :  { %2825 = vmatprep.subr.bf16.mxu0 %v5737_v7  ;;  %v5807_v7 = vld [vmem:[#allocation10 + $0x248] ss:$16 sps:$4 sm:$0xff]  }
 0x409   :  { %2826 = vmatpush1.bf16.msra.mxu0 %v5735_v10  ;;  %v5849_v10 = vld [vmem:[#allocation12 + $0x40] ss:$8 sps:$4 sm:$0xff]  }
 0x40a   :  { %2827 = vmatprep.subr.bf16.mxu0 %v5743_v11  ;;  %v5812_v11 = vld [vmem:[#allocation10 + $0x22c] ss:$16 sps:$4 sm:$0xff]  }
 0x40d   :  { %2828 = vmatpush1.bf16.msra.mxu0 %v5741_v12  ;;  %v5854_v12 = vld [vmem:[#allocation12 + $0x34] ss:$8 sps:$4 sm:$0xff]  }
 0x40e   :  { %2829 = vmatprep.subr.bf16.mxu0 %v5749_v13  ;;  %v5810_v13 = vld [vmem:[#allocation10 + $0x228] ss:$16 sps:$4 sm:$0xff]  }
 0x411   :  { %2830 = vmatpush2.bf16.msra.mxu0 %v5747_v14  ;;  %v5852_v14 = vld [vmem:[#allocation12 + $0x30] ss:$8 sps:$4 sm:$0xff]  }
 0x412   :  { %2831 = vmatprep.subr.bf16.mxu0 %v5755_v15  ;;  %v5815_v15 = vld [vmem:[#allocation10 + $0x20c] ss:$16 sps:$4 sm:$0xff]  }
 0x415   :  { %2832 = vmatpush2.bf16.msra.mxu0 %v5753_v18  ;;  %v5857_v18 = vld [vmem:[#allocation12 + $0x24] ss:$8 sps:$4 sm:$0xff]  }
 0x416   :  { %2833 = vmatprep.subr.bf16.mxu0 %v5761_v19  ;;  %v5813_v19 = vld [vmem:[#allocation10 + $0x208] ss:$16 sps:$4 sm:$0xff]  }
 0x419   :  { %2834 = vmatpush2.bf16.msra.mxu0 %v5759_v20  ;;  %v5855_v20 = vld [vmem:[#allocation12 + $0x20] ss:$8 sps:$4 sm:$0xff]  }
 0x41a   :  { %2835 = vmatprep.subr.bf16.mxu0 %v5767_v21  ;;  %v5818_v21 = vld [vmem:[#allocation10 + $0x3ec] ss:$16 sps:$4 sm:$0xff]  }
 0x41d   :  { %2836 = vmatpush2.bf16.msra.mxu0 %v5765_v22  ;;  %v5860_v22 = vld [vmem:[#allocation12 + $0x14] ss:$8 sps:$4 sm:$0xff]  }
 0x41e   :  { %2837 = vmatprep.subr.bf16.mxu0 %v5773_v23  ;;  %v5816_v23 = vld [vmem:[#allocation10 + $0x3e8] ss:$16 sps:$4 sm:$0xff]  }
 0x421   :  { %2838 = vmatpush2.bf16.msra.mxu0 %v5771_v24  ;;  %v5858_v24 = vld [vmem:[#allocation12 + $0x10] ss:$8 sps:$4 sm:$0xff]  }
 0x422   :  { %2839 = vmatprep.subr.bf16.mxu0 %v5779_v25  ;;  %v5821_v25 = vld [vmem:[#allocation10 + $0x3cc] ss:$16 sps:$4 sm:$0xff]  }
 0x424   :  { %v1884_v30 = vpop.f32.mrf.mxu0  ;;  %v1925_v31 = vpop.f32.mrf.mxu1 }
 0x425   :  { %v1885_v32 = vadd.f32 %v1884_v30, %v1119_v26  ;;  %2840 = vmatpush2.bf16.msra.mxu0 %v5777_v27  ;;  %v5863_v26 = vld [vmem:[#allocation12 + $0x4] ss:$8 sps:$4 sm:$0xff]   ;;  %v5819_v27 = vld [vmem:[#allocation10 + $0x3c8] ss:$16 sps:$4 sm:$0xff]   ;;  %v5866_v30 = vld [vmem:[#allocation12 + $0xf4] ss:$8 sps:$4 sm:$0xff]  }
 0x426   :  { %v1886_v37 = vpop.f32.mrf.mxu0  ;;  %v1927_v38 = vpop.f32.mrf.mxu1  ;;  %2841 = vmatprep.subr.bf16.mxu0 %v5785_v28  ;;  %v5861_v28 = vld [vmem:[#allocation12] ss:$8 sps:$4 sm:$0xff]  }
 0x427   :  { %v1926_v17 = vadd.f32 %v1925_v31, %v1885_v32  ;;  %v1887_v40 = vadd.f32 %v1886_v37, %v1123_v29  ;;  %v5824_v29 = vld [vmem:[#allocation10 + $0x3ac] ss:$16 sps:$4 sm:$0xff]   ;;  %v5822_v31 = vld [vmem:[#allocation10 + $0x3a8] ss:$16 sps:$4 sm:$0xff]  }
 0x428   :  { %v1888_v41 = vpop.f32.mrf.mxu0  ;;  %v1929_v42 = vpop.f32.mrf.mxu1  ;;  %v5864_v32 = vld [vmem:[#allocation12 + $0xf0] ss:$8 sps:$4 sm:$0xff]   ;;  %v5869_v37 = vld [vmem:[#allocation12 + $0xe4] ss:$8 sps:$4 sm:$0xff]  }
 0x429   :  { %v1928_v43 = vadd.f32 %v1927_v38, %v1887_v40  ;;  %2842 = vmatpush2.bf16.msra.mxu0 %v5783_v35  ;;  %v1934_v45 = vmax.f32 %v1926_v17, 0.0  ;;  %v5827_v35 = vld [vmem:[#allocation10 + $0x38c] ss:$16 sps:$4 sm:$0xff]   ;;  %v5825_v38 = vld [vmem:[#allocation10 + $0x388] ss:$16 sps:$4 sm:$0xff]  }
 0x42a   :  { %v1889_v46 = vpop.f32.mrf.mxu0  ;;  %v1930_v47 = vpop.f32.mrf.mxu1  ;;  %2843 = vmatprep.subr.bf16.mxu0 %v5791_v39  ;;  %v5867_v39 = vld [vmem:[#allocation12 + $0xe0] ss:$8 sps:$4 sm:$0xff]   ;;  %v5830_v17 = vld [vmem:[#allocation10 + $0x36c] ss:$16 sps:$4 sm:$0xff]   ;;  %v5870_v42 = vld [vmem:[#allocation12 + $0xd0] ss:$8 sps:$4 sm:$0xff]  }
 0x42b   :  { %v1935_v16 = vmax.f32 %v1928_v43, 0.0  ;;  %v6688_v50 = vpack.c.bf16 %v1934_v45, %v1934_v45  ;;  %v5872_v40 = vld [vmem:[#allocation12 + $0xd4] ss:$8 sps:$4 sm:$0xff]   ;;  %v5828_v41 = vld [vmem:[#allocation10 + $0x368] ss:$16 sps:$4 sm:$0xff]  }
 0x42c   :  { %v5833_v43 = vld [vmem:[#allocation10 + $0x34c] ss:$16 sps:$4 sm:$0xff]   ;;  %v5831_v45 = vld [vmem:[#allocation10 + $0x348] ss:$16 sps:$4 sm:$0xff]  }
 0x42d   :  { %v1939_v48 = vpack.c.bf16 %v1935_v16, %v1935_v16  ;;  %2844 = vmatpush2.bf16.msra.mxu0 %v5789_v44  ;;  %v5875_v44 = vld [vmem:[#allocation12 + $0xc4] ss:$8 sps:$4 sm:$0xff]   ;;  %v5873_v46 = vld [vmem:[#allocation12 + $0xc0] ss:$8 sps:$4 sm:$0xff]   ;;  %v5878_v16 = vld [vmem:[#allocation12 + $0xb4] ss:$8 sps:$4 sm:$0xff]  }
 0x42e   :  { %3304 = vmatprep.subr.bf16.mxu0 %v5842_v60  ;;  %v5836_v47 = vld [vmem:[#allocation10 + $0x32c] ss:$16 sps:$4 sm:$0xff]  }
 0x42f   :  { %2804 = vmatprep.mubr.bf16.mxu1 %v1939_v48  ;;  %v5887_v60 = vld [vmem:[#allocation12 + $0x84] ss:$8 sps:$4 sm:$0xff]  }
 0x430   :  { %2805 = vmatmul.mubr.bf16.vlgmr.msra.gmra.mxu1 %v6688_v50  ;;  %2846 = vmatmul.mubr.bf16.vlgmr.msra.gmra.mxu0 %v6681_v58  ;;  %v5848_v58 = vld [vmem:[#allocation12 + $0x54] ss:$8 sps:$4 sm:$0xff]  }
 0x431   :  { %2855 = vmatpush1.bf16.msra.mxu1 %v5792_v49  ;;  %2886 = vmatprep.mubr.bf16.mxu1 %v1939_v48  ;;  %v5834_v48 = vld [vmem:[#allocation10 + $0x328] ss:$16 sps:$4 sm:$0xff]  }
 0x432   :  { %2856 = vmatprep.subr.bf16.mxu1 %v5797_v51  ;;  %3305 = vmatpush1.bf16.msra.mxu0 %v5840_v59  ;;  %v5876_v49 = vld [vmem:[#allocation12 + $0xb0] ss:$8 sps:$4 sm:$0xff]   ;;  %v5839_v51 = vld [vmem:[#allocation10 + $0x30c] ss:$16 sps:$4 sm:$0xff]  }
 0x433   :  { %3306 = vmatprep.subr.bf16.mxu0 %v5845_v61  ;;  %v5882_v59 = vld [vmem:[#allocation12 + $0x90] ss:$8 sps:$4 sm:$0xff]   ;;  %v5885_v61 = vld [vmem:[#allocation12 + $0x80] ss:$8 sps:$4 sm:$0xff]  }
 0x435   :  { %2857 = vmatpush1.bf16.msra.mxu1 %v5795_v52  ;;  %v5837_v52 = vld [vmem:[#allocation10 + $0x308] ss:$16 sps:$4 sm:$0xff]  }
 0x436   :  { %2858 = vmatprep.subr.bf16.mxu1 %v5800_v54  ;;  %3307 = vmatpush1.bf16.msra.mxu0 %v5843_v63  ;;  %v5881_v54 = vld [vmem:[#allocation12 + $0xa4] ss:$8 sps:$4 sm:$0xff]   ;;  %v5888_v63 = vld [vmem:[#allocation12 + $0x170] ss:$8 sps:$4 sm:$0xff]  }
 0x437   :  { %3308 = vmatprep.subr.bf16.mxu0 %v5848_v58  ;;  %v5891_v58 = vld [vmem:[#allocation12 + $0x160] ss:$8 sps:$4 sm:$0xff]  }
 0x439   :  { %2859 = vmatpush1.bf16.msra.mxu1 %v5798_v56  ;;  %v5879_v56 = vld [vmem:[#allocation12 + $0xa0] ss:$8 sps:$4 sm:$0xff]  }
 0x43a   :  { %2860 = vmatprep.subr.bf16.mxu1 %v5803_v57  ;;  %3309 = vmatpush1.bf16.msra.mxu0 %v5846_v3  ;;  %v5884_v57 = vld [vmem:[#allocation12 + $0x94] ss:$8 sps:$4 sm:$0xff]   ;;  %v5899_v3 = vld [vmem:[#allocation12 + $0x144] ss:$8 sps:$4 sm:$0xff]  }
 0x43b   :  { %3310 = vmatprep.subr.bf16.mxu0 %v5851_v6  ;;  %v5902_v6 = vld [vmem:[#allocation12 + $0x134] ss:$8 sps:$4 sm:$0xff]  }
 0x43d   :  { %2861 = vmatpush1.bf16.msra.mxu1 %v5801_v62  ;;  %v5890_v62 = vld [vmem:[#allocation12 + $0x174] ss:$8 sps:$4 sm:$0xff]  }
 0x43e   :  { %2862 = vmatprep.subr.bf16.mxu1 %v5806_v1  ;;  %3311 = vmatpush1.bf16.msra.mxu0 %v5849_v10  ;;  %v5893_v1 = vld [vmem:[#allocation12 + $0x164] ss:$8 sps:$4 sm:$0xff]  }
 0x43f   :  { %3312 = vmatprep.subr.bf16.mxu0 %v5854_v12  ;;  %v5905_v10 = vld [vmem:[#allocation12 + $0x124] ss:$8 sps:$4 sm:$0xff]   ;;  %v5908_v12 = vld [vmem:[#allocation12 + $0x114] ss:$8 sps:$4 sm:$0xff]  }
 0x441   :  { %2863 = vmatpush1.bf16.msra.mxu1 %v5804_v2  ;;  %v5896_v2 = vld [vmem:[#allocation12 + $0x154] ss:$8 sps:$4 sm:$0xff]  }
 0x442   :  { %2864 = vmatprep.subr.bf16.mxu1 %v5809_v4  ;;  %3313 = vmatpush1.bf16.msra.mxu0 %v5852_v14  ;;  %v5897_v4 = vld [vmem:[#allocation12 + $0x140] ss:$8 sps:$4 sm:$0xff]   ;;  %v5911_v14 = vld [vmem:[#allocation12 + $0x104] ss:$8 sps:$4 sm:$0xff]  }
 0x443   :  { %3314 = vmatprep.subr.bf16.mxu0 %v5857_v18  ;;  %v5914_v18 = vld [vmem:[#allocation12 + $0x1f4] ss:$8 sps:$4 sm:$0xff]  }
 0x445   :  { %2865 = vmatpush1.bf16.msra.mxu1 %v5807_v7  ;;  %v5900_v7 = vld [vmem:[#allocation12 + $0x130] ss:$8 sps:$4 sm:$0xff]  }
 0x446   :  { %2866 = vmatprep.subr.bf16.mxu1 %v5812_v11  ;;  %3315 = vmatpush1.bf16.msra.mxu0 %v5855_v20  ;;  %v5903_v11 = vld [vmem:[#allocation12 + $0x120] ss:$8 sps:$4 sm:$0xff]   ;;  %v5917_v20 = vld [vmem:[#allocation12 + $0x1e4] ss:$8 sps:$4 sm:$0xff]  }
 0x447   :  { %3316 = vmatprep.subr.bf16.mxu0 %v5860_v22  ;;  %v5920_v22 = vld [vmem:[#allocation12 + $0x1d4] ss:$8 sps:$4 sm:$0xff]  }
 0x449   :  { %2867 = vmatpush1.bf16.msra.mxu1 %v5810_v13  ;;  %v5906_v13 = vld [vmem:[#allocation12 + $0x110] ss:$8 sps:$4 sm:$0xff]  }
 0x44a   :  { %2868 = vmatprep.subr.bf16.mxu1 %v5815_v15  ;;  %3317 = vmatpush1.bf16.msra.mxu0 %v5858_v24  ;;  %v5909_v15 = vld [vmem:[#allocation12 + $0x100] ss:$8 sps:$4 sm:$0xff]   ;;  %v5923_v24 = vld [vmem:[#allocation12 + $0x1c4] ss:$8 sps:$4 sm:$0xff]  }
 0x44b   :  { %3318 = vmatprep.subr.bf16.mxu0 %v5863_v26  ;;  %v5926_v26 = vld [vmem:[#allocation12 + $0x1b4] ss:$8 sps:$4 sm:$0xff]  }
 0x44d   :  { %2869 = vmatpush1.bf16.msra.mxu1 %v5813_v19  ;;  %v5912_v19 = vld [vmem:[#allocation12 + $0x1f0] ss:$8 sps:$4 sm:$0xff]  }
 0x44e   :  { %2870 = vmatprep.subr.bf16.mxu1 %v5818_v21  ;;  %3319 = vmatpush1.bf16.msra.mxu0 %v5861_v28  ;;  %v5915_v21 = vld [vmem:[#allocation12 + $0x1e0] ss:$8 sps:$4 sm:$0xff]   ;;  %v5929_v28 = vld [vmem:[#allocation12 + $0x1a4] ss:$8 sps:$4 sm:$0xff]  }
 0x44f   :  { %3320 = vmatprep.subr.bf16.mxu0 %v5866_v30 }
 0x451   :  { %2871 = vmatpush2.bf16.msra.mxu1 %v5816_v23  ;;  %v5918_v23 = vld [vmem:[#allocation12 + $0x1d0] ss:$8 sps:$4 sm:$0xff]  }
 0x452   :  { %2872 = vmatprep.subr.bf16.mxu1 %v5821_v25  ;;  %3321 = vmatpush2.bf16.msra.mxu0 %v5864_v32  ;;  %v5921_v25 = vld [vmem:[#allocation12 + $0x1c0] ss:$8 sps:$4 sm:$0xff]   ;;  %v5932_v32 = vld [vmem:[#allocation12 + $0x194] ss:$8 sps:$4 sm:$0xff]  }
 0x453   :  { %3322 = vmatprep.subr.bf16.mxu0 %v5869_v37 }
 0x455   :  { %2873 = vmatpush2.bf16.msra.mxu1 %v5819_v27  ;;  %v5924_v27 = vld [vmem:[#allocation12 + $0x1b0] ss:$8 sps:$4 sm:$0xff]  }
 0x456   :  { %2874 = vmatprep.subr.bf16.mxu1 %v5824_v29  ;;  %3323 = vmatpush2.bf16.msra.mxu0 %v5867_v39  ;;  %v5927_v29 = vld [vmem:[#allocation12 + $0x1a0] ss:$8 sps:$4 sm:$0xff]   ;;  %v5935_v39 = vld [vmem:[#allocation12 + $0x184] ss:$8 sps:$4 sm:$0xff]  }
 0x457   :  { %3324 = vmatprep.subr.bf16.mxu0 %v5872_v40  ;;  %v2069_v40 = vld [vmem:[#allocation25 + $0x4] ss:$8 sm:$0xf] }
 0x459   :  { %2875 = vmatpush2.bf16.msra.mxu1 %v5822_v31 }
 0x45a   :  { %2876 = vmatprep.subr.bf16.mxu1 %v5827_v35  ;;  %3325 = vmatpush2.bf16.msra.mxu0 %v5870_v42  ;;  %v5930_v35 = vld [vmem:[#allocation12 + $0x190] ss:$8 sps:$4 sm:$0xff]   ;;  %v2078_v42 = vrot.slane %v2069_v40, %v6637_v36 }
 0x45b   :  { %3326 = vmatprep.subr.bf16.mxu0 %v5875_v44 }
 0x45d   :  { %2877 = vmatpush2.bf16.msra.mxu1 %v5825_v38 }
 0x45e   :  { %2878 = vmatprep.subr.bf16.mxu1 %v5830_v17  ;;  %3327 = vmatpush2.bf16.msra.mxu0 %v5873_v46  ;;  %v5933_v17 = vld [vmem:[#allocation12 + $0x180] ss:$8 sps:$4 sm:$0xff]  }
 0x45f   :  { %3328 = vmatprep.subr.bf16.mxu0 %v5878_v16 }
 0x461   :  { %2879 = vmatpush2.bf16.msra.mxu1 %v5828_v41  ;;  %v2074_v41 = vrot.slane %v2069_v40, %v6634_v34 }
 0x462   :  { %2880 = vmatprep.subr.bf16.mxu1 %v5833_v43  ;;  %3329 = vmatpush2.bf16.msra.mxu0 %v5876_v49 }
 0x463   :  { %3330 = vmatprep.subr.bf16.mxu0 %v5881_v54 }
 0x465   :  { %2881 = vmatpush2.bf16.msra.mxu1 %v5831_v45 }
 0x466   :  { %2882 = vmatprep.subr.bf16.mxu1 %v5836_v47  ;;  %3331 = vmatpush2.bf16.msra.mxu0 %v5879_v56 }
 0x467   :  { %3332 = vmatprep.subr.bf16.mxu0 %v5884_v57 }
 0x469   :  { %2883 = vmatpush2.bf16.msra.mxu1 %v5834_v48 }
 0x46a   :  { %2884 = vmatprep.subr.bf16.mxu1 %v5839_v51  ;;  %3333 = vmatpush2.bf16.msra.mxu0 %v5882_v59 }
 0x46b   :  { %3334 = vmatprep.subr.bf16.mxu0 %v5887_v60 }
 0x46d   :  { %2885 = vmatpush2.bf16.msra.mxu1 %v5837_v52 }
 0x46e   :  { %3335 = vmatpush2.bf16.msra.mxu0 %v5885_v61  ;;  %3345 = vmatprep.subr.bf16.mxu1 %v5890_v62 }
 0x470   :  { %2887 = vmatmul.mubr.bf16.vlgmr.msra.gmra.mxu1 %v6688_v50  ;;  %v5894_v50 = vld [vmem:[#allocation12 + $0x150] ss:$8 sps:$4 sm:$0xff]  }
 0x471   :  { %3346 = vmatpush1.bf16.msra.mxu1 %v5888_v63 }
 0x472   :  { %3347 = vmatprep.subr.bf16.mxu1 %v5893_v1  ;;  %v2082_v1 = vrot.slane %v2069_v40, %v6642_v53  ;;  %v5936_v53 = vld [vmem:[#allocation13 + $0x70] ss:$8 sps:$4 sm:$0xff]  }
 0x475   :  { %3348 = vmatpush1.bf16.msra.mxu1 %v5891_v58  ;;  %v2086_v58 = vrot.slane %v2069_v40, %v6645_v55  ;;  %v5938_v55 = vld [vmem:[#allocation13 + $0x74] ss:$8 sps:$4 sm:$0xff]  }
 0x476   :  { %3349 = vmatprep.subr.bf16.mxu1 %v5896_v2  ;;  %3595 = vmatprep.subr.bf16.mxu0 %v5938_v55  ;;  %v5974_v40 = vld [vmem:[#allocation13 + $0xb4] ss:$8 sps:$4 sm:$0xff]  }
 0x479   :  { %3350 = vmatpush1.bf16.msra.mxu1 %v5894_v50 }
 0x47a   :  { %3351 = vmatprep.subr.bf16.mxu1 %v5899_v3 }
 0x47d   :  { %3352 = vmatpush1.bf16.msra.mxu1 %v5897_v4 }
 0x47e   :  { %3353 = vmatprep.subr.bf16.mxu1 %v5902_v6 }
 0x481   :  { %3354 = vmatpush1.bf16.msra.mxu1 %v5900_v7 }
 0x482   :  { %3355 = vmatprep.subr.bf16.mxu1 %v5905_v10 }
 0x485   :  { %3356 = vmatpush1.bf16.msra.mxu1 %v5903_v11 }
 0x486   :  { %3357 = vmatprep.subr.bf16.mxu1 %v5908_v12 }
 0x489   :  { %3358 = vmatpush1.bf16.msra.mxu1 %v5906_v13 }
 0x48a   :  { %3359 = vmatprep.subr.bf16.mxu1 %v5911_v14 }
 0x48d   :  { %3360 = vmatpush1.bf16.msra.mxu1 %v5909_v15 }
 0x48e   :  { %3361 = vmatprep.subr.bf16.mxu1 %v5914_v18  ;;  %v5941_v18 = vld [vmem:[#allocation13 + $0x64] ss:$8 sps:$4 sm:$0xff]  }
 0x491   :  { %3362 = vmatpush2.bf16.msra.mxu1 %v5912_v19  ;;  %v5939_v19 = vld [vmem:[#allocation13 + $0x60] ss:$8 sps:$4 sm:$0xff]  }
 0x492   :  { %3363 = vmatprep.subr.bf16.mxu1 %v5917_v20  ;;  %v5944_v20 = vld [vmem:[#allocation13 + $0x54] ss:$8 sps:$4 sm:$0xff]  }
 0x495   :  { %3364 = vmatpush2.bf16.msra.mxu1 %v5915_v21  ;;  %v5947_v21 = vld [vmem:[#allocation13 + $0x44] ss:$8 sps:$4 sm:$0xff]  }
 0x496   :  { %3365 = vmatprep.subr.bf16.mxu1 %v5920_v22  ;;  %v5950_v22 = vld [vmem:[#allocation13 + $0x34] ss:$8 sps:$4 sm:$0xff]  }
 0x499   :  { %3366 = vmatpush2.bf16.msra.mxu1 %v5918_v23  ;;  %v5948_v23 = vld [vmem:[#allocation13 + $0x30] ss:$8 sps:$4 sm:$0xff]  }
 0x49a   :  { %3367 = vmatprep.subr.bf16.mxu1 %v5923_v24  ;;  %v5953_v24 = vld [vmem:[#allocation13 + $0x24] ss:$8 sps:$4 sm:$0xff]  }
 0x49d   :  { %3368 = vmatpush2.bf16.msra.mxu1 %v5921_v25  ;;  %v5951_v25 = vld [vmem:[#allocation13 + $0x20] ss:$8 sps:$4 sm:$0xff]  }
 0x49e   :  { %3369 = vmatprep.subr.bf16.mxu1 %v5926_v26  ;;  %v5956_v26 = vld [vmem:[#allocation13 + $0x14] ss:$8 sps:$4 sm:$0xff]  }
 0x4a1   :  { %3370 = vmatpush2.bf16.msra.mxu1 %v5924_v27  ;;  %v5954_v27 = vld [vmem:[#allocation13 + $0x10] ss:$8 sps:$4 sm:$0xff]  }
 0x4a2   :  { %3371 = vmatprep.subr.bf16.mxu1 %v5929_v28  ;;  %v5959_v28 = vld [vmem:[#allocation13 + $0x4] ss:$8 sps:$4 sm:$0xff]  }
 0x4a5   :  { %3372 = vmatpush2.bf16.msra.mxu1 %v5927_v29  ;;  %v5957_v29 = vld [vmem:[#allocation13] ss:$8 sps:$4 sm:$0xff]  }
 0x4a6   :  { %3373 = vmatprep.subr.bf16.mxu1 %v5932_v32  ;;  %v5965_v32 = vld [vmem:[#allocation13 + $0xe4] ss:$8 sps:$4 sm:$0xff]  }
 0x4a9   :  { %3374 = vmatpush2.bf16.msra.mxu1 %v5930_v35  ;;  %v5963_v35 = vld [vmem:[#allocation13 + $0xe0] ss:$8 sps:$4 sm:$0xff]  }
 0x4aa   :  { %3375 = vmatprep.subr.bf16.mxu1 %v5935_v39  ;;  %v5971_v39 = vld [vmem:[#allocation13 + $0xc4] ss:$8 sps:$4 sm:$0xff]  }
 0x4ad   :  { %3376 = vmatpush2.bf16.msra.mxu1 %v5933_v17  ;;  %v5969_v17 = vld [vmem:[#allocation13 + $0xc0] ss:$8 sps:$4 sm:$0xff]  }
 0x4b0   :  { %v2765_v30 = vpop.f32.mrf.mxu0 }
 0x4b1   :  { %v2766_v43 = vadd.f32 %v2765_v30, %v2074_v41  ;;  %v5962_v30 = vld [vmem:[#allocation13 + $0xf4] ss:$8 sps:$4 sm:$0xff]   ;;  %v5972_v41 = vld [vmem:[#allocation13 + $0xb0] ss:$8 sps:$4 sm:$0xff]  }
 0x4b2   :  { %v2767_v31 = vpop.f32.mrf.mxu0 }
 0x4b3   :  { %v2768_v46 = vadd.f32 %v2767_v31, %v2078_v42  ;;  %v5960_v31 = vld [vmem:[#allocation13 + $0xf0] ss:$8 sps:$4 sm:$0xff]   ;;  %v5977_v42 = vld [vmem:[#allocation13 + $0xa4] ss:$8 sps:$4 sm:$0xff]  }
 0x4b4   :  { %v2769_v37 = vpop.f32.mrf.mxu0 }
 0x4b5   :  { %v5968_v37 = vld [vmem:[#allocation13 + $0xd4] ss:$8 sps:$4 sm:$0xff]  }
 0x4b6   :  { %v2770_v38 = vpop.f32.mrf.mxu0 }
 0x4b7   :  { %v5966_v38 = vld [vmem:[#allocation13 + $0xd0] ss:$8 sps:$4 sm:$0xff]  }
 0x4f0   :  { %v2806_v44 = vpop.f32.mrf.mxu1  ;;  %v2847_v45 = vpop.f32.mrf.mxu0 }
 0x4f1   :  { %v2807_v47 = vadd.f32 %v2806_v44, %v2766_v43  ;;  %v2848_v2 = vadd.f32 %v2847_v45, %v2082_v1  ;;  %v5975_v43 = vld [vmem:[#allocation13 + $0xa0] ss:$8 sps:$4 sm:$0xff]   ;;  %v5980_v44 = vld [vmem:[#allocation13 + $0x94] ss:$8 sps:$4 sm:$0xff]   ;;  %v5978_v45 = vld [vmem:[#allocation13 + $0x90] ss:$8 sps:$4 sm:$0xff]  }
 0x4f2   :  { %v2808_v16 = vpop.f32.mrf.mxu1  ;;  %v2849_v48 = vpop.f32.mrf.mxu0  ;;  %v6002_v1 = vld [vmem:[#allocation15 + $0x10] ss:$8 sps:$4 sm:$0xff]  }
 0x4f3   :  { %v2895_v49 = vadd.f32 %v2807_v47, %v6651_v5  ;;  %v2809_v51 = vadd.f32 %v2808_v16, %v2768_v46  ;;  %v2850_v5 = vadd.f32 %v2849_v48, %v2086_v58  ;;  %v5983_v46 = vld [vmem:[#allocation13 + $0x84] ss:$8 sps:$4 sm:$0xff]   ;;  %v5981_v47 = vld [vmem:[#allocation13 + $0x80] ss:$8 sps:$4 sm:$0xff]   ;;  %v5984_v16 = vld [vmem:[#allocation15 + $0x70] ss:$8 sps:$4 sm:$0xff]  }
 0x4f4   :  { %v2810_v52 = vpop.f32.mrf.mxu1  ;;  %v2851_v54 = vpop.f32.mrf.mxu0  ;;  %v5986_v48 = vld [vmem:[#allocation15 + $0x74] ss:$8 sps:$4 sm:$0xff]   ;;  %v6007_v58 = vld [vmem:[#allocation15 + $0x4] ss:$8 sps:$4 sm:$0xff]  }
 0x4f5   :  { %v2896_v56 = vadd.f32 %v2809_v51, %v6655_v8  ;;  %v2899_v57 = vmax.f32 %v2895_v49, 0.0  ;;  %v5989_v49 = vld [vmem:[#allocation15 + $0x64] ss:$8 sps:$4 sm:$0xff]   ;;  %3845 = vmatprep.subr.bf16.mxu1 %v5986_v48  ;;  %v5987_v51 = vld [vmem:[#allocation15 + $0x60] ss:$8 sps:$4 sm:$0xff]  }
 0x4f6   :  { %v2811_v59 = vpop.f32.mrf.mxu1  ;;  %v2852_v60 = vpop.f32.mrf.mxu0  ;;  %v5992_v52 = vld [vmem:[#allocation15 + $0x54] ss:$8 sps:$4 sm:$0xff]   ;;  %v5990_v54 = vld [vmem:[#allocation15 + $0x50] ss:$8 sps:$4 sm:$0xff]  }
 0x4f7   :  { %v2900_v61 = vmax.f32 %v2896_v56, 0.0  ;;  %v2903_v63 = vpack.c.bf16 %v2899_v57, %v2899_v57  ;;  %v5995_v56 = vld [vmem:[#allocation15 + $0x44] ss:$8 sps:$4 sm:$0xff]   ;;  %v5993_v57 = vld [vmem:[#allocation15 + $0x40] ss:$8 sps:$4 sm:$0xff]  }
 0x4f8   :  { %v5998_v59 = vld [vmem:[#allocation15 + $0x34] ss:$8 sps:$4 sm:$0xff]   ;;  %v5996_v60 = vld [vmem:[#allocation15 + $0x30] ss:$8 sps:$4 sm:$0xff]  }
 0x4f9   :  { %v2904_v62 = vpack.c.bf16 %v2900_v61, %v2900_v61  ;;  %v6001_v61 = vld [vmem:[#allocation15 + $0x24] ss:$8 sps:$4 sm:$0xff]  }
 0x4fb   :  { %3336 = vmatprep.mubr.bf16.mxu0 %v2904_v62  ;;  %v5999_v62 = vld [vmem:[#allocation15 + $0x20] ss:$8 sps:$4 sm:$0xff]  }
 0x4fc   :  { %3337 = vmatmul.mubr.bf16.vlgmr.msra.gmra.mxu0 %v2903_v63  ;;  %v6004_v63 = vld [vmem:[#allocation15 + $0x14] ss:$8 sps:$4 sm:$0xff]  }
 0x4fd   :  { %3596 = vmatpush1.bf16.msra.mxu0 %v5936_v53 }
 0x4fe   :  { %3597 = vmatprep.subr.bf16.mxu0 %v5941_v18 }
 0x501   :  { %3598 = vmatpush1.bf16.msra.mxu0 %v5939_v19  ;;  %v2972_v19 = vld [vmem:[#allocation25 + $0x5] ss:$8 sm:$0x3] }
 0x502   :  { %3599 = vmatprep.subr.bf16.mxu0 %v5944_v20  ;;  %v2977_v20 = vrot.slane %v2972_v19, %v6634_v34 }
 0x530   :  { %v2888_v50 = vpop.f32.mrf.mxu1 }
 0x531   :  { %v2889_v3 = vadd.f32 %v2888_v50, %v2848_v2  ;;  %v6005_v2 = vld [vmem:[#allocation15] ss:$8 sps:$4 sm:$0xff]   ;;  %v6010_v50 = vld [vmem:[#allocation15 + $0xf4] ss:$8 sps:$4 sm:$0xff]  }
 0x532   :  { %v2890_v4 = vpop.f32.mrf.mxu1 }
 0x533   :  { %v2897_v6 = vadd.f32 %v2889_v3, %v6653_v33  ;;  %v2891_v8 = vadd.f32 %v2890_v4, %v2850_v5  ;;  %v5942_v33 = vld [vmem:[#allocation13 + $0x50] ss:$8 sps:$4 sm:$0xff]   ;;  %v6013_v3 = vld [vmem:[#allocation15 + $0xe4] ss:$8 sps:$4 sm:$0xff]   ;;  %v6011_v4 = vld [vmem:[#allocation15 + $0xe0] ss:$8 sps:$4 sm:$0xff]  }
 0x534   :  { %v2892_v7 = vpop.f32.mrf.mxu1  ;;  %3600 = vmatpush1.bf16.msra.mxu0 %v5942_v33  ;;  %v6008_v5 = vld [vmem:[#allocation15 + $0xf0] ss:$8 sps:$4 sm:$0xff]   ;;  %v2981_v33 = vrot.slane %v2972_v19, %v6637_v36 }
 0x535   :  { %v2898_v10 = vadd.f32 %v2891_v8, %v6657_v9  ;;  %v2901_v11 = vmax.f32 %v2897_v6, 0.0  ;;  %v5945_v9 = vld [vmem:[#allocation13 + $0x40] ss:$8 sps:$4 sm:$0xff]   ;;  %3601 = vmatprep.subr.bf16.mxu0 %v5947_v21  ;;  %v6016_v6 = vld [vmem:[#allocation15 + $0xd4] ss:$8 sps:$4 sm:$0xff]  }
 0x536   :  { %v2893_v12 = vpop.f32.mrf.mxu1  ;;  %v6014_v8 = vld [vmem:[#allocation15 + $0xd0] ss:$8 sps:$4 sm:$0xff]   ;;  %v6019_v7 = vld [vmem:[#allocation15 + $0xc4] ss:$8 sps:$4 sm:$0xff]  }
 0x537   :  { %v2902_v13 = vmax.f32 %v2898_v10, 0.0  ;;  %v2905_v15 = vpack.c.bf16 %v2901_v11, %v2901_v11  ;;  %v6017_v10 = vld [vmem:[#allocation15 + $0xc0] ss:$8 sps:$4 sm:$0xff]   ;;  %v6022_v11 = vld [vmem:[#allocation15 + $0xb4] ss:$8 sps:$4 sm:$0xff]  }
 0x538   :  { %3602 = vmatpush1.bf16.msra.mxu0 %v5945_v9  ;;  %v6020_v12 = vld [vmem:[#allocation15 + $0xb0] ss:$8 sps:$4 sm:$0xff]  }
 0x539   :  { %v2906_v14 = vpack.c.bf16 %v2902_v13, %v2902_v13  ;;  %3603 = vmatprep.subr.bf16.mxu0 %v5950_v22  ;;  %v6025_v13 = vld [vmem:[#allocation15 + $0xa4] ss:$8 sps:$4 sm:$0xff]  }
 0x53b   :  { %3377 = vmatprep.mubr.bf16.mxu1 %v2906_v14  ;;  %v6023_v14 = vld [vmem:[#allocation15 + $0xa0] ss:$8 sps:$4 sm:$0xff]  }
 0x53c   :  { %3378 = vmatmul.mubr.bf16.vlgmr.msra.gmra.mxu1 %v2905_v15  ;;  %3604 = vmatpush1.bf16.msra.mxu0 %v5948_v23 }
 0x53d   :  { %3605 = vmatprep.subr.bf16.mxu0 %v5953_v24  ;;  %3846 = vmatpush1.bf16.msra.mxu1 %v5984_v16  ;;  %v3423_v16 = vld [vmem:[#allocation25 + $0x6] ss:$8 sm:$0x3] }
 0x53e   :  { %3847 = vmatprep.subr.bf16.mxu1 %v5989_v49  ;;  %v3428_v48 = vrot.slane %v3423_v16, %v6634_v34  ;;  %v3432_v49 = vrot.slane %v3423_v16, %v6637_v36  ;;  %v6068_v16 = vld [vmem:[#allocation21 + $0x18] sm:$0xff]  }
 0x540   :  { %3606 = vmatpush1.bf16.msra.mxu0 %v5951_v25 }
 0x541   :  { %3607 = vmatprep.subr.bf16.mxu0 %v5956_v26  ;;  %3848 = vmatpush1.bf16.msra.mxu1 %v5987_v51 }
 0x542   :  { %3849 = vmatprep.subr.bf16.mxu1 %v5992_v52 }
 0x544   :  { %3608 = vmatpush1.bf16.msra.mxu0 %v5954_v27 }
 0x545   :  { %3609 = vmatprep.subr.bf16.mxu0 %v5959_v28  ;;  %3850 = vmatpush1.bf16.msra.mxu1 %v5990_v54 }
 0x546   :  { %3851 = vmatprep.subr.bf16.mxu1 %v5995_v56 }
 0x548   :  { %3610 = vmatpush1.bf16.msra.mxu0 %v5957_v29 }
 0x549   :  { %3611 = vmatprep.subr.bf16.mxu0 %v5962_v30  ;;  %3852 = vmatpush1.bf16.msra.mxu1 %v5993_v57 }
 0x54a   :  { %3853 = vmatprep.subr.bf16.mxu1 %v5998_v59 }
 0x54c   :  { %3612 = vmatpush2.bf16.msra.mxu0 %v5960_v31 }
 0x54d   :  { %3613 = vmatprep.subr.bf16.mxu0 %v5965_v32  ;;  %3854 = vmatpush1.bf16.msra.mxu1 %v5996_v60  ;;  %v6028_v32 = vld [vmem:[#allocation15 + $0x94] ss:$8 sps:$4 sm:$0xff]  }
 0x54e   :  { %3855 = vmatprep.subr.bf16.mxu1 %v6001_v61 }
 0x550   :  { %3614 = vmatpush2.bf16.msra.mxu0 %v5963_v35  ;;  %v6026_v35 = vld [vmem:[#allocation15 + $0x90] ss:$8 sps:$4 sm:$0xff]  }
 0x551   :  { %3615 = vmatprep.subr.bf16.mxu0 %v5968_v37  ;;  %3856 = vmatpush1.bf16.msra.mxu1 %v5999_v62  ;;  %v6031_v37 = vld [vmem:[#allocation15 + $0x84] ss:$8 sps:$4 sm:$0xff]  }
 0x552   :  { %3857 = vmatprep.subr.bf16.mxu1 %v6004_v63 }
 0x554   :  { %3616 = vmatpush2.bf16.msra.mxu0 %v5966_v38  ;;  %v6029_v38 = vld [vmem:[#allocation15 + $0x80] ss:$8 sps:$4 sm:$0xff]  }
 0x555   :  { %3617 = vmatprep.subr.bf16.mxu0 %v5971_v39  ;;  %3858 = vmatpush1.bf16.msra.mxu1 %v6002_v1  ;;  %v6032_v39 = vld [vmem:[#allocation16 + $0x78] sm:$0xff]   ;;  %v6042_v1 = vld [vmem:[#allocation16 + $0x50] sm:$0xff]  }
 0x556   :  { %3859 = vmatprep.subr.bf16.mxu1 %v6007_v58  ;;  %v6043_v58 = vld [vmem:[#allocation16 + $0x10] sm:$0xff]  }
 0x558   :  { %3618 = vmatpush2.bf16.msra.mxu0 %v5969_v17  ;;  %v6033_v17 = vld [vmem:[#allocation16 + $0x38] sm:$0xff]  }
 0x559   :  { %3619 = vmatprep.subr.bf16.mxu0 %v5974_v40  ;;  %3860 = vmatpush1.bf16.msra.mxu1 %v6005_v2  ;;  %v6034_v40 = vld [vmem:[#allocation16 + $0x70] sm:$0xff]   ;;  %v6044_v2 = vld [vmem:[#allocation16 + $0x48] sm:$0xff]  }
 0x55a   :  { %3861 = vmatprep.subr.bf16.mxu1 %v6010_v50  ;;  %v6045_v50 = vld [vmem:[#allocation16 + $0x8] sm:$0xff]  }
 0x55c   :  { %3620 = vmatpush2.bf16.msra.mxu0 %v5972_v41  ;;  %v6035_v41 = vld [vmem:[#allocation16 + $0x30] sm:$0xff]  }
 0x55d   :  { %3621 = vmatprep.subr.bf16.mxu0 %v5977_v42  ;;  %3862 = vmatpush2.bf16.msra.mxu1 %v6008_v5  ;;  %v6036_v42 = vld [vmem:[#allocation16 + $0x68] sm:$0xff]   ;;  %v6046_v5 = vld [vmem:[#allocation16 + $0x40] sm:$0xff]  }
 0x55e   :  { %3863 = vmatprep.subr.bf16.mxu1 %v6013_v3  ;;  %v6047_v3 = vld [vmem:[#allocation16] sm:$0xff]  }
 0x560   :  { %3622 = vmatpush2.bf16.msra.mxu0 %v5975_v43  ;;  %v6037_v43 = vld [vmem:[#allocation16 + $0x28] sm:$0xff]  }
 0x561   :  { %3623 = vmatprep.subr.bf16.mxu0 %v5980_v44  ;;  %3864 = vmatpush2.bf16.msra.mxu1 %v6011_v4  ;;  %v6038_v44 = vld [vmem:[#allocation16 + $0x60] sm:$0xff]   ;;  %v6048_v4 = vld [vmem:[#allocation18 + $0x38] sm:$0xff]  }
 0x562   :  { %3865 = vmatprep.subr.bf16.mxu1 %v6016_v6  ;;  %v6049_v6 = vld [vmem:[#allocation18 + $0x30] sm:$0xff]  }
 0x564   :  { %3624 = vmatpush2.bf16.msra.mxu0 %v5978_v45  ;;  %v6039_v45 = vld [vmem:[#allocation16 + $0x20] sm:$0xff]  }
 0x565   :  { %3625 = vmatprep.subr.bf16.mxu0 %v5983_v46  ;;  %3866 = vmatpush2.bf16.msra.mxu1 %v6014_v8  ;;  %v6040_v46 = vld [vmem:[#allocation16 + $0x58] sm:$0xff]   ;;  %v6050_v8 = vld [vmem:[#allocation18 + $0x28] sm:$0xff]  }
 0x566   :  { %3867 = vmatprep.subr.bf16.mxu1 %v6019_v7  ;;  %v6051_v7 = vld [vmem:[#allocation18 + $0x20] sm:$0xff]  }
 0x568   :  { %3626 = vmatpush2.bf16.msra.mxu0 %v5981_v47  ;;  %v6041_v47 = vld [vmem:[#allocation16 + $0x18] sm:$0xff]  }
 0x569   :  { %3868 = vmatpush2.bf16.msra.mxu1 %v6017_v10  ;;  %5135 = vmatprep.subr.bf16.mxu0 %v6032_v39  ;;  %v6052_v10 = vld [vmem:[#allocation18 + $0x18] sm:$0xff]  }
 0x56a   :  { %3869 = vmatprep.subr.bf16.mxu1 %v6022_v11  ;;  %v3673_v11 = vld [vmem:[#allocation25 + $0x7] ss:$8 sm:$0x3] }
 0x56d   :  { %3870 = vmatpush2.bf16.msra.mxu1 %v6020_v12  ;;  %v3678_v12 = vrot.slane %v3673_v11, %v6634_v34  ;;  %v6053_v34 = vld [vmem:[#allocation18 + $0x10] sm:$0xff]  }
 0x56e   :  { %3871 = vmatprep.subr.bf16.mxu1 %v6025_v13  ;;  %v3682_v13 = vrot.slane %v3673_v11, %v6637_v36  ;;  %v6054_v36 = vld [vmem:[#allocation18 + $0x8] sm:$0xff]  }
 0x571   :  { %3872 = vmatpush2.bf16.msra.mxu1 %v6023_v14 }
 0x572   :  { %3873 = vmatprep.subr.bf16.mxu1 %v6028_v32  ;;  %v3924_v32 = vld [vmem:[#allocation25 + $0x20] ss:$0 sm:$0xff] }
 0x575   :  { %3874 = vmatpush2.bf16.msra.mxu1 %v6026_v35 }
 0x576   :  { %3875 = vmatprep.subr.bf16.mxu1 %v6031_v37 }
 0x579   :  { %3876 = vmatpush2.bf16.msra.mxu1 %v6029_v38 }
 0x57a   :  { %5208 = vmatprep.subr.bf16.mxu1 %v6450_v0 }
 0x5bc   :  { %v3338_v15 = vpop.f32.mrf.mxu0 }
 0x5bd   :  { %v3339_v21 = vadd.f32 %v3338_v15, %v2977_v20 }
 0x5be   :  { %v3340_v53 = vpop.f32.mrf.mxu0 }
 0x5bf   :  { %v3341_v22 = vadd.f32 %v3340_v53, %v2981_v33 }
 0x5c0   :  { %v3342_v55 = vpop.f32.mrf.mxu0 }
 0x5c2   :  { %v3343_v18 = vpop.f32.mrf.mxu0 }
 0x5fc   :  { %v3379_v9 = vpop.f32.mrf.mxu1 }
 0x5fd   :  { %v3380_v23 = vadd.f32 %v3379_v9, %v3339_v21 }
 0x5fe   :  { %v3381_v24 = vpop.f32.mrf.mxu1 }
 0x5ff   :  { %v3382_v25 = vadd.f32 %v3381_v24, %v3341_v22  ;;  %v6703_v26 = vmax.f32 %v3380_v23, 0.0  ;;  %v6055_v24 = vld [vmem:[#allocation18] sm:$0xff]  }
 0x600   :  { %v3383_v27 = vpop.f32.mrf.mxu1 }
 0x601   :  { %v6705_v28 = vmax.f32 %v3382_v25, 0.0  ;;  %v3388_v31 = vpack.c.bf16 %v6703_v26, %v6703_v26  ;;  %v6056_v25 = vld [vmem:[#allocation19 + $0x38] sm:$0xff]   ;;  %v6058_v27 = vld [vmem:[#allocation19 + $0x28] sm:$0xff]  }
 0x602   :  { %v3384_v29 = vpop.f32.mrf.mxu1 }
 0x603   :  { %v3389_v30 = vpack.c.bf16 %v6705_v28, %v6705_v28  ;;  %v6060_v29 = vld [vmem:[#allocation19 + $0x18] sm:$0xff]  }
 0x605   :  { %3627 = vmatprep.mubr.bf16.mxu0 %v3389_v30  ;;  %v6061_v30 = vld [vmem:[#allocation19 + $0x10] sm:$0xff]  }
 0x606   :  { %3628 = vmatmul.mubr.bf16.vlgmr.msra.gmra.mxu0 %v3388_v31 }
 0x607   :  { %5136 = vmatpush3.bf16.msra.mxu0 %v6033_v17 }
 0x608   :  { %5137 = vmatprep.subr.bf16.mxu0 %v6034_v40 }
 0x60b   :  { %5138 = vmatpush3.bf16.msra.mxu0 %v6035_v41 }
 0x60c   :  { %5139 = vmatprep.subr.bf16.mxu0 %v6036_v42  ;;  %v6062_v42 = vld [vmem:[#allocation19 + $0x8] sm:$0xff]  }
 0x60f   :  { %5140 = vmatpush3.bf16.msra.mxu0 %v6037_v43  ;;  %v6063_v43 = vld [vmem:[#allocation19] sm:$0xff]  }
 0x610   :  { %5141 = vmatprep.subr.bf16.mxu0 %v6038_v44  ;;  %v6064_v44 = vld [vmem:[#allocation21 + $0x38] sm:$0xff]  }
 0x613   :  { %5142 = vmatpush3.bf16.msra.mxu0 %v6039_v45  ;;  %v6065_v45 = vld [vmem:[#allocation21 + $0x30] sm:$0xff]  }
 0x614   :  { %5143 = vmatprep.subr.bf16.mxu0 %v6040_v46  ;;  %v6066_v46 = vld [vmem:[#allocation21 + $0x28] sm:$0xff]  }
 0x617   :  { %5144 = vmatpush3.bf16.msra.mxu0 %v6041_v47  ;;  %v6067_v47 = vld [vmem:[#allocation21 + $0x20] sm:$0xff]  }
 0x618   :  { %5145 = vmatprep.subr.bf16.mxu0 %v6042_v1  ;;  %v6073_v1 = vld [vmem:[#allocation22 + $0x30] sm:$0xff]  }
 0x61b   :  { %5146 = vmatpush3.bf16.msra.mxu0 %v6043_v58  ;;  %v6074_v58 = vld [vmem:[#allocation22 + $0x28] sm:$0xff]  }
 0x61c   :  { %5147 = vmatprep.subr.bf16.mxu0 %v6044_v2  ;;  %v6075_v2 = vld [vmem:[#allocation22 + $0x20] sm:$0xff]  }
 0x61f   :  { %5148 = vmatpush3.bf16.msra.mxu0 %v6045_v50  ;;  %v6076_v50 = vld [vmem:[#allocation22 + $0x18] sm:$0xff]  }
 0x620   :  { %5149 = vmatprep.subr.bf16.mxu0 %v6046_v5  ;;  %v6077_v5 = vld [vmem:[#allocation22 + $0x10] sm:$0xff]  }
 0x623   :  { %5150 = vmatpush3.bf16.msra.mxu0 %v6047_v3  ;;  %v4186_v3 = vld [vmem:[#allocation25 + $0x22] ss:$0 sm:$0xff] }
 0x624   :  { %5228 = vmatprep.subr.bf16.mxu0 %v6450_v0 }
 0x6c6   :  { %v3629_v51 = vpop.f32.mrf.mxu0 }
 0x6c7   :  { %v3630_v52 = vadd.f32 %v3629_v51, %v3428_v48  ;;  %v6069_v48 = vld [vmem:[#allocation21 + $0x10] sm:$0xff]  }
 0x6c8   :  { %v3631_v54 = vpop.f32.mrf.mxu0 }
 0x6c9   :  { %v3632_v56 = vadd.f32 %v3631_v54, %v3432_v49  ;;  %v3636_v57 = vmax.f32 %v3630_v52, 0.0  ;;  %v4079_v49 = vld [vmem:[#allocation25 + $0x21] ss:$0 sm:$0xff] }
 0x6ca   :  { %v3633_v59 = vpop.f32.mrf.mxu0 }
 0x6cb   :  { %v3637_v60 = vmax.f32 %v3632_v56, 0.0  ;;  %v3638_v63 = vpack.c.bf16 %v3636_v57, %v3636_v57 }
 0x6cc   :  { %v3634_v61 = vpop.f32.mrf.mxu0 }
 0x6cd   :  { %v3639_v62 = vpack.c.bf16 %v3637_v60, %v3637_v60  ;;  %v6070_v61 = vld [vmem:[#allocation21 + $0x8] sm:$0xff]  }
 0x6cf   :  { %3877 = vmatprep.mubr.bf16.mxu1 %v3639_v62  ;;  %v6071_v62 = vld [vmem:[#allocation21] sm:$0xff]  }
 0x6d0   :  { %3878 = vmatmul.mubr.bf16.vlgmr.msra.gmra.mxu1 %v3638_v63  ;;  %v6072_v63 = vld [vmem:[#allocation22 + $0x38] sm:$0xff]  }
 0x6d1   :  { %5224 = vmatprep.mubr.msk.bf16.mxu1 %vm6451_vm0, %v6450_v0  ;;  %5209 = vmatpush3.bf16.msra.mxu1 %v6048_v4 }
 0x6d2   :  { %5210 = vmatprep.subr.bf16.mxu1 %v6450_v0 }
 0x6d5   :  { %5211 = vmatpush3.bf16.msra.mxu1 %v6049_v6 }
 0x6d6   :  { %5212 = vmatprep.subr.bf16.mxu1 %v6450_v0 }
 0x6d9   :  { %5213 = vmatpush3.bf16.msra.mxu1 %v6050_v8 }
 0x6da   :  { %5214 = vmatprep.subr.bf16.mxu1 %v6450_v0 }
 0x6dd   :  { %5215 = vmatpush3.bf16.msra.mxu1 %v6051_v7 }
 0x6de   :  { %5216 = vmatprep.subr.bf16.mxu1 %v6450_v0 }
 0x6e1   :  { %5217 = vmatpush3.bf16.msra.mxu1 %v6052_v10 }
 0x6e2   :  { %5218 = vmatprep.subr.bf16.mxu1 %v6450_v0 }
 0x6e5   :  { %5219 = vmatpush3.bf16.msra.mxu1 %v6053_v34 }
 0x6e6   :  { %5220 = vmatprep.subr.bf16.mxu1 %v6450_v0 }
 0x6e9   :  { %5221 = vmatpush3.bf16.msra.mxu1 %v6054_v36 }
 0x6ea   :  { %5222 = vmatprep.subr.bf16.mxu1 %v6450_v0 }
 0x6ed   :  { %5223 = vmatpush3.bf16.msra.mxu1 %v6055_v24 }
 0x6ee   :  { %5248 = vmatprep.subr.bf16.mxu1 %v6450_v0 }
 0x790   :  { %v3879_v14 = vpop.f32.mrf.mxu1 }
 0x791   :  { %v3880_v15 = vadd.f32 %v3879_v14, %v3678_v12  ;;  %v6078_v14 = vld [vmem:[#allocation22 + $0x8] sm:$0xff]  }
 0x792   :  { %v3881_v53 = vpop.f32.mrf.mxu1 }
 0x793   :  { %v3886_v55 = vadd.f32 %v3880_v15, %v6703_v26  ;;  %v3882_v18 = vadd.f32 %v3881_v53, %v3682_v13  ;;  %v6057_v26 = vld [vmem:[#allocation19 + $0x30] sm:$0xff]   ;;  %v6079_v15 = vld [vmem:[#allocation22] sm:$0xff]   ;;  %v6080_v53 = vld [vmem:[#allocation24 + $0x38] sm:$0xff]  }
 0x794   :  { %v3883_v19 = vpop.f32.mrf.mxu1 }
 0x795   :  { %v3887_v20 = vadd.f32 %v3882_v18, %v6705_v28  ;;  %v3888_v33 = vmax.f32 %v3886_v55, 0.0  ;;  %v6059_v28 = vld [vmem:[#allocation19 + $0x20] sm:$0xff]   ;;  %v6081_v55 = vld [vmem:[#allocation24 + $0x30] sm:$0xff]   ;;  %v6082_v18 = vld [vmem:[#allocation24 + $0x28] sm:$0xff]  }
 0x796   :  { %v3884_v21 = vpop.f32.mrf.mxu1  ;;  %v6083_v19 = vld [vmem:[#allocation24 + $0x20] sm:$0xff]  }
 0x797   :  { %v3889_v9 = vmax.f32 %v3887_v20, 0.0  ;;  %v3890_v23 = vpack.c.bf16 %v3888_v33, %v3888_v33  ;;  %v6084_v20 = vld [vmem:[#allocation24 + $0x18] sm:$0xff]   ;;  %v6085_v33 = vld [vmem:[#allocation24 + $0x10] sm:$0xff]   ;;  %v4294_v21 = vld [vmem:[#allocation25 + $0x23] ss:$0 sm:$0xff] }
 0x799   :  { %v3891_v22 = vpack.c.bf16 %v3889_v9, %v3889_v9 }
 0x79b   :  { %4053 = vmatprep.mubr.bf16.mxu0 %v3891_v22 }
 0x79c   :  { %4054 = vmatmul.mubr.bf16.vlgmr.msra.gmra.mxu0 %v3890_v23 }
 0x79d   :  { %5244 = vmatprep.mubr.msk.bf16.mxu0 %vm6451_vm0, %v6450_v0  ;;  %5229 = vmatpush3.bf16.msra.mxu0 %v6056_v25 }
 0x79e   :  { %5230 = vmatprep.subr.bf16.mxu0 %v6450_v0 }
 0x7a1   :  { %5231 = vmatpush3.bf16.msra.mxu0 %v6057_v26  ;;  %v6086_v26 = vld [vmem:[#allocation24 + $0x8] sm:$0xff]  }
 0x7a2   :  { %5232 = vmatprep.subr.bf16.mxu0 %v6450_v0 }
 0x7a5   :  { %5233 = vmatpush3.bf16.msra.mxu0 %v6058_v27  ;;  %v6087_v27 = vld [vmem:[#allocation24] sm:$0xff]  }
 0x7a6   :  { %5234 = vmatprep.subr.bf16.mxu0 %v6450_v0 }
 0x7a9   :  { %5235 = vmatpush3.bf16.msra.mxu0 %v6059_v28  ;;  %v4401_v28 = vld [vmem:[#allocation25 + $0x24] ss:$0 sm:$0xff] }
 0x7aa   :  { %5236 = vmatprep.subr.bf16.mxu0 %v6450_v0 }
 0x7ad   :  { %5237 = vmatpush3.bf16.msra.mxu0 %v6060_v29 }
 0x7ae   :  { %5238 = vmatprep.subr.bf16.mxu0 %v6450_v0 }
 0x7b1   :  { %5239 = vmatpush3.bf16.msra.mxu0 %v6061_v30 }
 0x7b2   :  { %5240 = vmatprep.subr.bf16.mxu0 %v6450_v0 }
 0x7b5   :  { %5241 = vmatpush3.bf16.msra.mxu0 %v6062_v42 }
 0x7b6   :  { %5242 = vmatprep.subr.bf16.mxu0 %v6450_v0 }
 0x7b9   :  { %5243 = vmatpush3.bf16.msra.mxu0 %v6063_v43 }
 0x7ba   :  { %5268 = vmatprep.subr.bf16.mxu0 %v6450_v0 }
 0x85c   :  { %v5151_v31 = vpop.f32.mrf.mxu0 }
 0x85e   :  { %v5152_v35 = vpop.f32.mrf.mxu0 }
 0x85f   :  { %v5153_v37 = vadd.f32 %v5152_v35, %v5151_v31 }
 0x860   :  { %v5154_v38 = vpop.f32.mrf.mxu0 }
 0x861   :  { %v4056_v39 = vadd.f32 %v5153_v37, %v3924_v32 }
 0x862   :  { %v5155_v17 = vpop.f32.mrf.mxu0 }
 0x863   :  { %v6737_v40 = vmax.f32 %v4056_v39, 0.0  ;;  %v4508_v39 = vld [vmem:[#allocation25 + $0x25] ss:$0 sm:$0xff] }
 0x865   :  { %v4062_v41 = vpack.c.bf16 %v6737_v40, %v6737_v40 }
 0x867   :  { %5225 = vmatmul.mubr.bf16.vlgmr.msra.gmra.mxu1 %v4062_v41 }
 0x868   :  { %5264 = vmatprep.mubr.msk.bf16.mxu1 %vm6451_vm0, %v6450_v0  ;;  %5249 = vmatpush3.bf16.msra.mxu1 %v6064_v44 }
 0x869   :  { %5250 = vmatprep.subr.bf16.mxu1 %v6450_v0 }
 0x86c   :  { %5251 = vmatpush3.bf16.msra.mxu1 %v6065_v45 }
 0x86d   :  { %5252 = vmatprep.subr.bf16.mxu1 %v6450_v0 }
 0x870   :  { %5253 = vmatpush3.bf16.msra.mxu1 %v6066_v46 }
 0x871   :  { %5254 = vmatprep.subr.bf16.mxu1 %v6450_v0 }
 0x874   :  { %5255 = vmatpush3.bf16.msra.mxu1 %v6067_v47 }
 0x875   :  { %5256 = vmatprep.subr.bf16.mxu1 %v6450_v0 }
 0x878   :  { %5257 = vmatpush3.bf16.msra.mxu1 %v6068_v16 }
 0x879   :  { %5258 = vmatprep.subr.bf16.mxu1 %v6450_v0 }
 0x87c   :  { %5259 = vmatpush3.bf16.msra.mxu1 %v6069_v48 }
 0x87d   :  { %5260 = vmatprep.subr.bf16.mxu1 %v6450_v0 }
 0x880   :  { %5261 = vmatpush3.bf16.msra.mxu1 %v6070_v61 }
 0x881   :  { %5262 = vmatprep.subr.bf16.mxu1 %v6450_v0 }
 0x884   :  { %5263 = vmatpush3.bf16.msra.mxu1 %v6071_v62 }
 0x885   :  { %5288 = vmatprep.subr.bf16.mxu1 %v6450_v0 }
 0x927   :  { %v4162_v51 = vpop.f32.mrf.mxu1 }
 0x928   :  { %v4163_v52 = vadd.f32 %v4162_v51, %v4079_v49 }
 0x929   :  { %v5226_v54 = vpop.f32.mrf.mxu1 }
 0x92a   :  { %v4168_v56 = vmax.f32 %v4163_v52, 0.0 }
 0x92b   :  { %v4165_v57 = vpop.f32.mrf.mxu1 }
 0x92c   :  { %v4169_v59 = vpack.c.bf16 %v4168_v56, %v4168_v56 }
 0x92d   :  { %v5227_v60 = vpop.f32.mrf.mxu1 }
 0x92e   :  { %5245 = vmatmul.mubr.bf16.vlgmr.msra.gmra.mxu0 %v4169_v59 }
 0x92f   :  { %5284 = vmatprep.mubr.msk.bf16.mxu0 %vm6451_vm0, %v6450_v0  ;;  %5269 = vmatpush3.bf16.msra.mxu0 %v6072_v63 }
 0x930   :  { %5270 = vmatprep.subr.bf16.mxu0 %v6450_v0 }
 0x933   :  { %5271 = vmatpush3.bf16.msra.mxu0 %v6073_v1 }
 0x934   :  { %5272 = vmatprep.subr.bf16.mxu0 %v6450_v0 }
 0x937   :  { %5273 = vmatpush3.bf16.msra.mxu0 %v6074_v58 }
 0x938   :  { %5274 = vmatprep.subr.bf16.mxu0 %v6450_v0 }
 0x93b   :  { %5275 = vmatpush3.bf16.msra.mxu0 %v6075_v2 }
 0x93c   :  { %5276 = vmatprep.subr.bf16.mxu0 %v6450_v0 }
 0x93f   :  { %5277 = vmatpush3.bf16.msra.mxu0 %v6076_v50 }
 0x940   :  { %5278 = vmatprep.subr.bf16.mxu0 %v6450_v0 }
 0x943   :  { %5279 = vmatpush3.bf16.msra.mxu0 %v6077_v5 }
 0x944   :  { %5280 = vmatprep.subr.bf16.mxu0 %v6450_v0 }
 0x947   :  { %5281 = vmatpush3.bf16.msra.mxu0 %v6078_v14 }
 0x948   :  { %5282 = vmatprep.subr.bf16.mxu0 %v6450_v0 }
 0x94b   :  { %5283 = vmatpush3.bf16.msra.mxu0 %v6079_v15 }
 0x9ee   :  { %v4269_v4 = vpop.f32.mrf.mxu0 }
 0x9ef   :  { %v4270_v6 = vadd.f32 %v4269_v4, %v4186_v3 }
 0x9f0   :  { %v5246_v8 = vpop.f32.mrf.mxu0 }
 0x9f1   :  { %v4275_v7 = vadd.f32 %v4270_v6, %v6737_v40 }
 0x9f2   :  { %v4272_v10 = vpop.f32.mrf.mxu0 }
 0x9f3   :  { %v4276_v11 = vmax.f32 %v4275_v7, 0.0 }
 0x9f4   :  { %v5247_v12 = vpop.f32.mrf.mxu0 }
 0x9f5   :  { %v4277_v13 = vpack.c.bf16 %v4276_v11, %v4276_v11 }
 0x9f7   :  { %5265 = vmatmul.mubr.bf16.vlgmr.msra.gmra.mxu1 %v4277_v13 }
 0x9f8   :  { %5304 = vmatprep.mubr.msk.bf16.mxu1 %vm6451_vm0, %v6450_v0  ;;  %5289 = vmatpush3.bf16.msra.mxu1 %v6080_v53 }
 0x9f9   :  { %5290 = vmatprep.subr.bf16.mxu1 %v6450_v0 }
 0x9fc   :  { %5291 = vmatpush3.bf16.msra.mxu1 %v6081_v55 }
 0x9fd   :  { %5292 = vmatprep.subr.bf16.mxu1 %v6450_v0 }
 0xa00   :  { %5293 = vmatpush3.bf16.msra.mxu1 %v6082_v18 }
 0xa01   :  { %5294 = vmatprep.subr.bf16.mxu1 %v6450_v0 }
 0xa04   :  { %5295 = vmatpush3.bf16.msra.mxu1 %v6083_v19 }
 0xa05   :  { %5296 = vmatprep.subr.bf16.mxu1 %v6450_v0 }
 0xa08   :  { %5297 = vmatpush3.bf16.msra.mxu1 %v6084_v20 }
 0xa09   :  { %5298 = vmatprep.subr.bf16.mxu1 %v6450_v0 }
 0xa0c   :  { %5299 = vmatpush3.bf16.msra.mxu1 %v6085_v33 }
 0xa0d   :  { %5300 = vmatprep.subr.bf16.mxu1 %v6450_v0 }
 0xa10   :  { %5301 = vmatpush3.bf16.msra.mxu1 %v6086_v26 }
 0xa11   :  { %5302 = vmatprep.subr.bf16.mxu1 %v6450_v0 }
 0xa14   :  { %5303 = vmatpush3.bf16.msra.mxu1 %v6087_v27 }
 0xab7   :  { %v4377_v9 = vpop.f32.mrf.mxu1 }
 0xab8   :  { %v4378_v22 = vadd.f32 %v4377_v9, %v4294_v21 }
 0xab9   :  { %v5266_v23 = vpop.f32.mrf.mxu1 }
 0xaba   :  { %v4383_v34 = vmax.f32 %v4378_v22, 0.0 }
 0xabb   :  { %v4380_v36 = vpop.f32.mrf.mxu1 }
 0xabc   :  { %v4384_v24 = vpack.c.bf16 %v4383_v34, %v4383_v34 }
 0xabd   :  { %v5267_v25 = vpop.f32.mrf.mxu1 }
 0xabe   :  { %5285 = vmatmul.mubr.bf16.vlgmr.msra.gmra.mxu0 %v4384_v24 }
 0xb7e   :  { %v4484_v29 = vpop.f32.mrf.mxu0 }
 0xb7f   :  { %v4485_v30 = vadd.f32 %v4484_v29, %v4401_v28 }
 0xb80   :  { %v5286_v31 = vpop.f32.mrf.mxu0 }
 0xb81   :  { %v4490_v32 = vmax.f32 %v4485_v30, 0.0 }
 0xb82   :  { %v4487_v35 = vpop.f32.mrf.mxu0 }
 0xb83   :  { %v4491_v37 = vpack.c.bf16 %v4490_v32, %v4490_v32 }
 0xb84   :  { %v5287_v38 = vpop.f32.mrf.mxu0 }
 0xb85   :  { %5305 = vmatmul.mubr.bf16.vlgmr.msra.gmra.mxu1 %v4491_v37 }
 0xc45   :  { %v4591_v17 = vpop.f32.mrf.mxu1 }
 0xc46   :  { %v4592_v40 = vadd.f32 %v4591_v17, %v4508_v39 }
 0xc47   :  { %v5306_v41 = vpop.f32.mrf.mxu1 }
 0xc48   :  { %4597 = vst [vmem:[%s6791_s16] sm:$0xff] %v4592_v40 }
 0xc49   :  { %v4594_v0 = vpop.f32.mrf.mxu1 }
 0xc4b   :  { %v5307_v42 = vpop.f32.mrf.mxu1 }
 0xc4c   :  { %4602 = vsyncpa [#allocation3], 1 }
 0xc4d   :  { %4603 = vsyncpa [#allocation5], 1 }
 0xc4e   :  { %4604 = vsyncpa [#allocation8], 1 }
 0xc4f   :  { %4605 = vsyncpa [#allocation11], 1 }
 0xc50   :  { %4606 = vsyncpa [#allocation14], 1 }
 0xc51   :  { %4607 = vsyncpa [#allocation17], 1 }
 0xc52   :  { %4608 = vsyncpa [#allocation20], 1 }
 0xc53   :  { %4609 = vsyncpa [#allocation23], 1 }
 0xc54   :  { %4610 = vsyncpa [#allocation26], 1 }

</bundles_post_ra>
